<compile_context>
chip_gen: v6e
topology: v6e:2x2x1
jax: 0.10.0
libtpu: 0.0.40
codegen_flags: <defaults>
</compile_context>

<pallas_src>
import functools
import math
import numpy as np

import jax
import jax.numpy as jnp
from jax.experimental import pallas as pl
from jax.experimental.pallas import tpu as pltpu


# ---------------------------------------------------------------------------
# Pallas kernel: one batch element per grid step.
# Encoder layer + final LN, decoder layer + final LN, generator Linear.
# ---------------------------------------------------------------------------
def make_kernel(n_heads):
    def kernel(src_ref, tgt_ref,
               e_wqkv, e_bqkv, e_wo, e_bo, e_w1, e_b1, e_w2, e_b2,
               e_ln1w, e_ln1b, e_ln2w, e_ln2b, e_lnfw, e_lnfb,
               dsa_wqkv, dsa_bqkv, dsa_wo, dsa_bo,
               dca_wq, dca_bq, dca_wkv, dca_bkv, dca_wo, dca_bo,
               d_w1, d_b1, d_w2, d_b2,
               d_ln1w, d_ln1b, d_ln2w, d_ln2b, d_ln3w, d_ln3b,
               d_lnfw, d_lnfb,
               g_w, g_b,
               out_ref):
        E = src_ref.shape[-1]
        hd = E // n_heads
        scale = 1.0 / math.sqrt(hd)
        bf16 = jnp.bfloat16

        def mm(x, w_ref):
            # bf16 operands, f32 accumulation on the MXU
            return jnp.dot(x.astype(bf16), w_ref[...],
                           preferred_element_type=jnp.float32)

        def lin(x, w_ref, b_ref):
            return mm(x, w_ref) + b_ref[...]

        def ln(x, w_ref, b_ref, eps=1e-5):
            m = jnp.mean(x, axis=-1, keepdims=True)
            c = x - m
            v = jnp.mean(c * c, axis=-1, keepdims=True)
            return c * jax.lax.rsqrt(v + eps) * w_ref[...] + b_ref[...]

        def softmax(s):
            s = s - jnp.max(s, axis=-1, keepdims=True)
            e = jnp.exp(s)
            denom = jnp.sum(e, axis=-1, keepdims=True)
            return e * pl.reciprocal(denom, approx=True)

        def attend(qp, kp, vp, wo_ref, bo_ref):
            # heads statically unrolled (n_heads=2, tiny 8x8 score tiles)
            heads = []
            for h in range(n_heads):
                lo = h * hd
                qh = qp[:, lo:lo + hd]
                kh = kp[:, lo:lo + hd]
                vh = vp[:, lo:lo + hd]
                s = jax.lax.dot_general(
                    qh.astype(bf16), kh.astype(bf16),
                    (((1,), (1,)), ((), ())),
                    preferred_element_type=jnp.float32) * scale
                p = softmax(s)
                heads.append(jnp.dot(p.astype(bf16), vh.astype(bf16),
                                     preferred_element_type=jnp.float32))
            o = jnp.concatenate(heads, axis=-1)          # (Sq, E)
            return lin(o, wo_ref, bo_ref)                # single (E,E) out-proj

        src = src_ref[...]     # (S_src, E) f32
        tgt = tgt_ref[...]     # (S_tgt, E) f32

        # ---------------- encoder layer (post-norm) ----------------
        qkv = lin(src, e_wqkv, e_bqkv)                   # fused (S, 3E)
        sa = attend(qkv[:, :E], qkv[:, E:2 * E], qkv[:, 2 * E:], e_wo, e_bo)
        x = ln(src + sa, e_ln1w, e_ln1b)
        ff = lin(jnp.maximum(lin(x, e_w1, e_b1), 0.0), e_w2, e_b2)
        x = ln(x + ff, e_ln2w, e_ln2b)
        memory = ln(x, e_lnfw, e_lnfb)                   # TransformerEncoder final norm

        # ---------------- decoder layer (post-norm, no masks) -------
        qkv = lin(tgt, dsa_wqkv, dsa_bqkv)
        sa = attend(qkv[:, :E], qkv[:, E:2 * E], qkv[:, 2 * E:], dsa_wo, dsa_bo)
        yv = ln(tgt + sa, d_ln1w, d_ln1b)

        qp = lin(yv, dca_wq, dca_bq)                     # cross-attn Q
        kv = lin(memory, dca_wkv, dca_bkv)               # fused cross-attn K|V
        ca = attend(qp, kv[:, :E], kv[:, E:], dca_wo, dca_bo)
        yv = ln(yv + ca, d_ln2w, d_ln2b)

        ff = lin(jnp.maximum(lin(yv, d_w1, d_b1), 0.0), d_w2, d_b2)
        yv = ln(yv + ff, d_ln3w, d_ln3b)
        yv = ln(yv, d_lnfw, d_lnfb)                      # TransformerDecoder final norm

        # ---------------- generator (V padded to lane-dense 128) ----
        out_ref[...] = lin(yv, g_w, g_b)

    return kernel


# ---------------------------------------------------------------------------
# Glue: positional encoding, one-time parameter packing, pallas_call wrapper
# ---------------------------------------------------------------------------
def make_pos_embedding(emb_size, maxlen=256):
    den = jnp.exp(-jnp.arange(0, emb_size, 2, dtype=jnp.float32)
                  * math.log(10000.0) / emb_size)
    pos = jnp.arange(0, maxlen, dtype=jnp.float32).reshape(maxlen, 1)
    pe = jnp.zeros((maxlen, emb_size), jnp.float32)
    pe = pe.at[:, 0::2].set(jnp.sin(pos * den))
    pe = pe.at[:, 1::2].set(jnp.cos(pos * den))
    return pe[:, None, :]   # (maxlen, 1, E)


def pack_params(p):
    """One-time weight packing (transpose, fuse QKV, bf16, pad generator)."""
    E = p['src_emb'].shape[1]
    V = p['g_w'].shape[0]
    Vp = max(128, -(-V // 128) * 128)          # pad vocab to lane-dense multiple of 128
    bf = jnp.bfloat16

    def Wt(w):   # PyTorch Linear (out, in) -> (in, out), bf16
        return jnp.asarray(w, jnp.float32).T.astype(bf)

    def Row(b):  # 1-D bias / LN param -> (1, dim) f32 row
        return jnp.asarray(b, jnp.float32).reshape(1, -1)

    g_w = jnp.asarray(p['g_w'], jnp.float32).T                 # (E, V)
    g_w = jnp.pad(g_w, ((0, 0), (0, Vp - V))).astype(bf)        # (E, Vp)
    g_b = jnp.pad(jnp.asarray(p['g_b'], jnp.float32), (0, Vp - V)).reshape(1, -1)

    weights = (
        # encoder layer
        Wt(p['e_in_w']), Row(p['e_in_b']), Wt(p['e_out_w']), Row(p['e_out_b']),
        Wt(p['e_w1']), Row(p['e_b1']), Wt(p['e_w2']), Row(p['e_b2']),
        Row(p['e_ln1_w']), Row(p['e_ln1_b']), Row(p['e_ln2_w']), Row(p['e_ln2_b']),
        Row(p['e_lnf_w']), Row(p['e_lnf_b']),
        # decoder self-attn (fused QKV)
        Wt(p['d_sa_in_w']), Row(p['d_sa_in_b']), Wt(p['d_sa_out_w']), Row(p['d_sa_out_b']),
        # decoder cross-attn (Q separate, fused K|V)
        Wt(p['d_ca_in_w'][:E]), Row(p['d_ca_in_b'][:E]),
        Wt(p['d_ca_in_w'][E:]), Row(p['d_ca_in_b'][E:]),
        Wt(p['d_ca_out_w']), Row(p['d_ca_out_b']),
        # decoder FFN
        Wt(p['d_w1']), Row(p['d_b1']), Wt(p['d_w2']), Row(p['d_b2']),
        # decoder layer norms
        Row(p['d_ln1_w']), Row(p['d_ln1_b']), Row(p['d_ln2_w']), Row(p['d_ln2_b']),
        Row(p['d_ln3_w']), Row(p['d_ln3_b']), Row(p['d_lnf_w']), Row(p['d_lnf_b']),
        # generator (lane-padded)
        g_w, g_b,
    )
    return {
        'src_emb': jnp.asarray(p['src_emb'], jnp.float32),
        'tgt_emb': jnp.asarray(p['tgt_emb'], jnp.float32),
        'pe': make_pos_embedding(E),
        'weights': weights,
    }


def transformer_pallas(packed, x, y, *, n_heads, tgt_vocab):
    weights = packed['weights']
    E = packed['src_emb'].shape[1]
    pe = packed['pe']

    # embedding lookup + positional encoding (dropout == identity, eval mode)
    src = jnp.take(packed['src_emb'], x, axis=0) + pe[:x.shape[0]]   # (S_src, N, E)
    tgt = jnp.take(packed['tgt_emb'], y, axis=0) + pe[:y.shape[0]]   # (S_tgt, N, E)

    src_b = jnp.transpose(src, (1, 0, 2))   # (N, S_src, E) f32
    tgt_b = jnp.transpose(tgt, (1, 0, 2))   # (N, S_tgt, E) f32

    N, Ss, _ = src_b.shape
    St = tgt_b.shape[1]
    Vp = weights[-2].shape[1]               # padded vocab (lane-dense)
    FF = weights[4].shape[1]                # e_w1 is (E, FF)

    def full_spec(_a):                      # whole 2-D weight resident in VMEM
        return pl.BlockSpec(_a.shape, lambda n: (0, 0))

    # advisory cost estimate (helps XLA schedule the surrounding gather/PE ops)
    flops_per_batch = (
        2 * Ss * E * 3 * E + 4 * Ss * Ss * E + 2 * Ss * E * E + 4 * Ss * E * FF   # encoder
        + 2 * St * E * 3 * E + 4 * St * St * E + 2 * St * E * E                  # dec self-attn
        + 2 * St * E * E + 2 * Ss * E * 2 * E + 4 * St * Ss * E + 2 * St * E * E  # dec cross-attn
        + 4 * St * E * FF                                                        # dec FFN
        + 2 * St * E * Vp                                                        # generator
    )
    transc = N * (n_heads * (Ss * Ss + St * St + St * Ss) + 8 * (Ss + St))
    bytes_accessed = (sum(int(w.size) * w.dtype.itemsize for w in weights)
                      + int(src_b.size) * 4 + int(tgt_b.size) * 4 + N * St * Vp * 4)

    out = pl.pallas_call(
        make_kernel(n_heads),
        out_shape=jax.ShapeDtypeStruct((N, St, Vp), jnp.float32),
        grid=(N,),
        in_specs=[pl.BlockSpec((None, Ss, E), lambda n: (n, 0, 0)),
                  pl.BlockSpec((None, St, E), lambda n: (n, 0, 0))]
                 + [full_spec(w) for w in weights],
        out_specs=pl.BlockSpec((None, St, Vp), lambda n: (n, 0, 0)),
        compiler_params=pltpu.CompilerParams(
            dimension_semantics=("parallel",),
            vmem_limit_bytes=32 * 1024 * 1024),
        cost_estimate=pl.CostEstimate(
            flops=int(N * flops_per_batch),
            transcendentals=int(transc),
            bytes_accessed=int(bytes_accessed)),
    )(src_b, tgt_b, *weights)

    logits = out[:, :, :tgt_vocab]                      # drop lane padding
    return jnp.transpose(logits, (1, 0, 2))             # back to PyTorch (S_tgt, N, V)


# ---------------------------------------------------------------------------
# Deterministic parameter init (PyTorch shapes)
# ---------------------------------------------------------------------------
def init_params(key, src_vocab, tgt_vocab, E, FF):
    ks = iter(jax.random.split(key, 64))

    def w(shape, s=0.05):
        return (s * jax.random.normal(next(ks), shape)).astype(jnp.float32)

    p = {}
    p['src_emb'] = w((src_vocab, E), 1.0)
    p['tgt_emb'] = w((tgt_vocab, E), 1.0)
    # encoder layer
    p['e_in_w'] = w((3 * E, E)); p['e_in_b'] = w((3 * E,), 0.02)
    p['e_out_w'] = w((E, E));    p['e_out_b'] = w((E,), 0.02)
    p['e_w1'] = w((FF, E));      p['e_b1'] = w((FF,), 0.02)
    p['e_w2'] = w((E, FF));      p['e_b2'] = w((E,), 0.02)
    # decoder layer
    p['d_sa_in_w'] = w((3 * E, E)); p['d_sa_in_b'] = w((3 * E,), 0.02)
    p['d_sa_out_w'] = w((E, E));    p['d_sa_out_b'] = w((E,), 0.02)
    p['d_ca_in_w'] = w((3 * E, E)); p['d_ca_in_b'] = w((3 * E,), 0.02)
    p['d_ca_out_w'] = w((E, E));    p['d_ca_out_b'] = w((E,), 0.02)
    p['d_w1'] = w((FF, E));         p['d_b1'] = w((FF,), 0.02)
    p['d_w2'] = w((E, FF));         p['d_b2'] = w((E,), 0.02)
    # layer norms (PyTorch default init: ones / zeros)
    for nm in ['e_ln1', 'e_ln2', 'e_lnf', 'd_ln1', 'd_ln2', 'd_ln3', 'd_lnf']:
        p[nm + '_w'] = jnp.ones((E,), jnp.float32)
        p[nm + '_b'] = jnp.zeros((E,), jnp.float32)
    # generator
    p['g_w'] = w((tgt_vocab, E)); p['g_b'] = w((tgt_vocab,), 0.02)
    return p


# ---------------------------------------------------------------------------
# Pure-JAX f32 reference (mirrors PyTorch post-norm Transformer, eval mode)
# ---------------------------------------------------------------------------
def _ref_lin(x, w, b):
    return x @ w.T + b


def _ref_ln(x, w, b, eps=1e-5):
    m = x.mean(-1, keepdims=True)
    v = ((x - m) ** 2).mean(-1, keepdims=True)
    return (x - m) / jnp.sqrt(v + eps) * w + b


def _ref_mha(q, k, v, in_w, in_b, out_w, out_b, H):
    E = q.shape[-1]
    hd = E // H
    wq, wk, wv = in_w[:E], in_w[E:2 * E], in_w[2 * E:]
    bq, bk, bv = in_b[:E], in_b[E:2 * E], in_b[2 * E:]
    qp, kp, vp = q @ wq.T + bq, k @ wk.T + bk, v @ wv.T + bv
    Sq, N, _ = q.shape
    Sk = k.shape[0]
    qh = qp.reshape(Sq, N, H, hd).transpose(1, 2, 0, 3)
    kh = kp.reshape(Sk, N, H, hd).transpose(1, 2, 0, 3)
    vh = vp.reshape(Sk, N, H, hd).transpose(1, 2, 0, 3)
    s = jnp.einsum('nhqd,nhkd->nhqk', qh, kh) / math.sqrt(hd)
    p = jax.nn.softmax(s, axis=-1)
    o = jnp.einsum('nhqk,nhkd->nhqd', p, vh).transpose(2, 0, 1, 3).reshape(Sq, N, E)
    return o @ out_w.T + out_b


def ref_forward(p, x, y, n_heads):
    E = p['src_emb'].shape[1]
    pe = make_pos_embedding(E)
    src = jnp.take(p['src_emb'], x, axis=0) + pe[:x.shape[0]]
    tgt = jnp.take(p['tgt_emb'], y, axis=0) + pe[:y.shape[0]]

    sa = _ref_mha(src, src, src, p['e_in_w'], p['e_in_b'], p['e_out_w'], p['e_out_b'], n_heads)
    h = _ref_ln(src + sa, p['e_ln1_w'], p['e_ln1_b'])
    ff = _ref_lin(jax.nn.relu(_ref_lin(h, p['e_w1'], p['e_b1'])), p['e_w2'], p['e_b2'])
    h = _ref_ln(h + ff, p['e_ln2_w'], p['e_ln2_b'])
    memory = _ref_ln(h, p['e_lnf_w'], p['e_lnf_b'])

    sa = _ref_mha(tgt, tgt, tgt, p['d_sa_in_w'], p['d_sa_in_b'], p['d_sa_out_w'], p['d_sa_out_b'], n_heads)
    t = _ref_ln(tgt + sa, p['d_ln1_w'], p['d_ln1_b'])
    ca = _ref_mha(t, memory, memory, p['d_ca_in_w'], p['d_ca_in_b'], p['d_ca_out_w'], p['d_ca_out_b'], n_heads)
    t = _ref_ln(t + ca, p['d_ln2_w'], p['d_ln2_b'])
    ff = _ref_lin(jax.nn.relu(_ref_lin(t, p['d_w1'], p['d_b1'])), p['d_w2'], p['d_b2'])
    t = _ref_ln(t + ff, p['d_ln3_w'], p['d_ln3_b'])
    t = _ref_ln(t, p['d_lnf_w'], p['d_lnf_b'])
    return _ref_lin(t, p['g_w'], p['g_b'])


# ---------------------------------------------------------------------------
if __name__ == "__main__":
    SRC_VOCAB, TGT_VOCAB = 50, 64
    DIM_EMB, N_HEADS, FF_DIM = 128, 2, 512
    S_SRC, S_TGT, BATCH = 8, 8, 2

    key = jax.random.PRNGKey(0)
    pkey, xkey, ykey = jax.random.split(key, 3)
    params = init_params(pkey, SRC_VOCAB, TGT_VOCAB, DIM_EMB, FF_DIM)

    x = jax.random.randint(xkey, (S_SRC, BATCH), 0, SRC_VOCAB, dtype=jnp.int32)
    y = jax.random.randint(ykey, (S_TGT, BATCH), 0, TGT_VOCAB, dtype=jnp.int32)

    # hoist weight packing out of the per-call path (done once, reused)
    packed = pack_params(params)
    forward = jax.jit(functools.partial(transformer_pallas,
                                        n_heads=N_HEADS, tgt_vocab=TGT_VOCAB))

    logits = forward(packed, x, y)
    jax.block_until_ready(logits)

    assert logits.shape == (S_TGT, BATCH, TGT_VOCAB)
    ref = ref_forward(params, x, y, N_HEADS)
    # bf16 weights / matmul operands (f32 accumulation) -> slightly looser tolerance
    np.testing.assert_allclose(np.asarray(logits), np.asarray(ref),
                               rtol=2e-2, atol=2e-2)
    print("KERNEL_OK")
</pallas_src>

<mosaic_0001>
module attributes {stable_mosaic.version = 11 : i64} {
  func.func @kernel(%arg0: i32, %arg1: memref<1x8x128xf32, #tpu.memory_space<vmem>>, %arg2: memref<1x8x128xf32, #tpu.memory_space<vmem>>, %arg3: memref<128x384xbf16, #tpu.memory_space<vmem>>, %arg4: memref<1x384xf32, #tpu.memory_space<vmem>>, %arg5: memref<128x128xbf16, #tpu.memory_space<vmem>>, %arg6: memref<1x128xf32, #tpu.memory_space<vmem>>, %arg7: memref<128x512xbf16, #tpu.memory_space<vmem>>, %arg8: memref<1x512xf32, #tpu.memory_space<vmem>>, %arg9: memref<512x128xbf16, #tpu.memory_space<vmem>>, %arg10: memref<1x128xf32, #tpu.memory_space<vmem>>, %arg11: memref<1x128xf32, #tpu.memory_space<vmem>>, %arg12: memref<1x128xf32, #tpu.memory_space<vmem>>, %arg13: memref<1x128xf32, #tpu.memory_space<vmem>>, %arg14: memref<1x128xf32, #tpu.memory_space<vmem>>, %arg15: memref<1x128xf32, #tpu.memory_space<vmem>>, %arg16: memref<1x128xf32, #tpu.memory_space<vmem>>, %arg17: memref<128x384xbf16, #tpu.memory_space<vmem>>, %arg18: memref<1x384xf32, #tpu.memory_space<vmem>>, %arg19: memref<128x128xbf16, #tpu.memory_space<vmem>>, %arg20: memref<1x128xf32, #tpu.memory_space<vmem>>, %arg21: memref<128x128xbf16, #tpu.memory_space<vmem>>, %arg22: memref<1x128xf32, #tpu.memory_space<vmem>>, %arg23: memref<128x256xbf16, #tpu.memory_space<vmem>>, %arg24: memref<1x256xf32, #tpu.memory_space<vmem>>, %arg25: memref<128x128xbf16, #tpu.memory_space<vmem>>, %arg26: memref<1x128xf32, #tpu.memory_space<vmem>>, %arg27: memref<128x512xbf16, #tpu.memory_space<vmem>>, %arg28: memref<1x512xf32, #tpu.memory_space<vmem>>, %arg29: memref<512x128xbf16, #tpu.memory_space<vmem>>, %arg30: memref<1x128xf32, #tpu.memory_space<vmem>>, %arg31: memref<1x128xf32, #tpu.memory_space<vmem>>, %arg32: memref<1x128xf32, #tpu.memory_space<vmem>>, %arg33: memref<1x128xf32, #tpu.memory_space<vmem>>, %arg34: memref<1x128xf32, #tpu.memory_space<vmem>>, %arg35: memref<1x128xf32, #tpu.memory_space<vmem>>, %arg36: memref<1x128xf32, #tpu.memory_space<vmem>>, %arg37: memref<1x128xf32, #tpu.memory_space<vmem>>, %arg38: memref<1x128xf32, #tpu.memory_space<vmem>>, %arg39: memref<128x128xbf16, #tpu.memory_space<vmem>>, %arg40: memref<1x128xf32, #tpu.memory_space<vmem>>, %arg41: memref<1x8x128xf32, #tpu.memory_space<vmem>>) attributes {dimension_semantics = [#tpu.dimension_semantics<parallel>], iteration_bounds = array<i64: 2>, scalar_prefetch = 0 : i64, scratch_operands = 0 : i64, tpu.core_type = #tpu.core_type<tc>, window_params = [{transform_indices = @transform_0, window_bounds = array<i64: 1, 8, 128>}, {transform_indices = @transform_1, window_bounds = array<i64: 1, 8, 128>}, {pipeline_mode = #tpu.pipeline_mode<synchronous>, transform_indices = @transform_2, window_bounds = array<i64: 128, 384>}, {pipeline_mode = #tpu.pipeline_mode<synchronous>, transform_indices = @transform_3, window_bounds = array<i64: 1, 384>}, {pipeline_mode = #tpu.pipeline_mode<synchronous>, transform_indices = @transform_4, window_bounds = array<i64: 128, 128>}, {pipeline_mode = #tpu.pipeline_mode<synchronous>, transform_indices = @transform_5, window_bounds = array<i64: 1, 128>}, {pipeline_mode = #tpu.pipeline_mode<synchronous>, transform_indices = @transform_6, window_bounds = array<i64: 128, 512>}, {pipeline_mode = #tpu.pipeline_mode<synchronous>, transform_indices = @transform_7, window_bounds = array<i64: 1, 512>}, {pipeline_mode = #tpu.pipeline_mode<synchronous>, transform_indices = @transform_8, window_bounds = array<i64: 512, 128>}, {pipeline_mode = #tpu.pipeline_mode<synchronous>, transform_indices = @transform_9, window_bounds = array<i64: 1, 128>}, {pipeline_mode = #tpu.pipeline_mode<synchronous>, transform_indices = @transform_10, window_bounds = array<i64: 1, 128>}, {pipeline_mode = #tpu.pipeline_mode<synchronous>, transform_indices = @transform_11, window_bounds = array<i64: 1, 128>}, {pipeline_mode = #tpu.pipeline_mode<synchronous>, transform_indices = @transform_12, window_bounds = array<i64: 1, 128>}, {pipeline_mode = #tpu.pipeline_mode<synchronous>, transform_indices = @transform_13, window_bounds = array<i64: 1, 128>}, {pipeline_mode = #tpu.pipeline_mode<synchronous>, transform_indices = @transform_14, window_bounds = array<i64: 1, 128>}, {pipeline_mode = #tpu.pipeline_mode<synchronous>, transform_indices = @transform_15, window_bounds = array<i64: 1, 128>}, {pipeline_mode = #tpu.pipeline_mode<synchronous>, transform_indices = @transform_16, window_bounds = array<i64: 128, 384>}, {pipeline_mode = #tpu.pipeline_mode<synchronous>, transform_indices = @transform_17, window_bounds = array<i64: 1, 384>}, {pipeline_mode = #tpu.pipeline_mode<synchronous>, transform_indices = @transform_18, window_bounds = array<i64: 128, 128>}, {pipeline_mode = #tpu.pipeline_mode<synchronous>, transform_indices = @transform_19, window_bounds = array<i64: 1, 128>}, {pipeline_mode = #tpu.pipeline_mode<synchronous>, transform_indices = @transform_20, window_bounds = array<i64: 128, 128>}, {pipeline_mode = #tpu.pipeline_mode<synchronous>, transform_indices = @transform_21, window_bounds = array<i64: 1, 128>}, {pipeline_mode = #tpu.pipeline_mode<synchronous>, transform_indices = @transform_22, window_bounds = array<i64: 128, 256>}, {pipeline_mode = #tpu.pipeline_mode<synchronous>, transform_indices = @transform_23, window_bounds = array<i64: 1, 256>}, {pipeline_mode = #tpu.pipeline_mode<synchronous>, transform_indices = @transform_24, window_bounds = array<i64: 128, 128>}, {pipeline_mode = #tpu.pipeline_mode<synchronous>, transform_indices = @transform_25, window_bounds = array<i64: 1, 128>}, {pipeline_mode = #tpu.pipeline_mode<synchronous>, transform_indices = @transform_26, window_bounds = array<i64: 128, 512>}, {pipeline_mode = #tpu.pipeline_mode<synchronous>, transform_indices = @transform_27, window_bounds = array<i64: 1, 512>}, {pipeline_mode = #tpu.pipeline_mode<synchronous>, transform_indices = @transform_28, window_bounds = array<i64: 512, 128>}, {pipeline_mode = #tpu.pipeline_mode<synchronous>, transform_indices = @transform_29, window_bounds = array<i64: 1, 128>}, {pipeline_mode = #tpu.pipeline_mode<synchronous>, transform_indices = @transform_30, window_bounds = array<i64: 1, 128>}, {pipeline_mode = #tpu.pipeline_mode<synchronous>, transform_indices = @transform_31, window_bounds = array<i64: 1, 128>}, {pipeline_mode = #tpu.pipeline_mode<synchronous>, transform_indices = @transform_32, window_bounds = array<i64: 1, 128>}, {pipeline_mode = #tpu.pipeline_mode<synchronous>, transform_indices = @transform_33, window_bounds = array<i64: 1, 128>}, {pipeline_mode = #tpu.pipeline_mode<synchronous>, transform_indices = @transform_34, window_bounds = array<i64: 1, 128>}, {pipeline_mode = #tpu.pipeline_mode<synchronous>, transform_indices = @transform_35, window_bounds = array<i64: 1, 128>}, {pipeline_mode = #tpu.pipeline_mode<synchronous>, transform_indices = @transform_36, window_bounds = array<i64: 1, 128>}, {pipeline_mode = #tpu.pipeline_mode<synchronous>, transform_indices = @transform_37, window_bounds = array<i64: 1, 128>}, {pipeline_mode = #tpu.pipeline_mode<synchronous>, transform_indices = @transform_38, window_bounds = array<i64: 128, 128>}, {pipeline_mode = #tpu.pipeline_mode<synchronous>, transform_indices = @transform_39, window_bounds = array<i64: 1, 128>}, {transform_indices = @transform_40, window_bounds = array<i64: 1, 8, 128>}]} {
    %c0 = arith.constant 0 : index
    %c0_0 = arith.constant 0 : index
    %c0_1 = arith.constant 0 : index
    %0 = vector.load %arg1[%c0, %c0_0, %c0_1] : memref<1x8x128xf32, #tpu.memory_space<vmem>>, vector<1x8x128xf32>
    %1 = vector.shape_cast %0 : vector<1x8x128xf32> to vector<8x128xf32>
    %c0_2 = arith.constant 0 : index
    %c0_3 = arith.constant 0 : index
    %c0_4 = arith.constant 0 : index
    %2 = vector.load %arg2[%c0_2, %c0_3, %c0_4] : memref<1x8x128xf32, #tpu.memory_space<vmem>>, vector<1x8x128xf32>
    %3 = vector.shape_cast %2 : vector<1x8x128xf32> to vector<8x128xf32>
    %4 = arith.truncf %1 : vector<8x128xf32> to vector<8x128xbf16>
    %c0_5 = arith.constant 0 : index
    %c0_6 = arith.constant 0 : index
    %5 = vector.load %arg3[%c0_5, %c0_6] : memref<128x384xbf16, #tpu.memory_space<vmem>>, vector<128x384xbf16>
    %cst = arith.constant dense<0.000000e+00> : vector<8x384xf32>
    %6 = tpu.matmul %4, %5, %cst {dimension_numbers = #tpu.dot_dimension_numbers<[1], [0], [0], [1], [0, 0, 1, 1], [], []>} : vector<8x128xbf16>, vector<128x384xbf16>, vector<8x384xf32> -> vector<8x384xf32>
    %c0_7 = arith.constant 0 : index
    %c0_8 = arith.constant 0 : index
    %7 = vector.load %arg4[%c0_7, %c0_8] : memref<1x384xf32, #tpu.memory_space<vmem>>, vector<1x384xf32>
    %8 = vector.broadcast %7 : vector<1x384xf32> to vector<8x384xf32>
    %9 = arith.addf %6, %8 : vector<8x384xf32>
    %10 = vector.extract_strided_slice %9 {offsets = [0, 0], sizes = [8, 128], strides = [1, 1]} : vector<8x384xf32> to vector<8x128xf32>
    %11 = vector.extract_strided_slice %9 {offsets = [0, 128], sizes = [8, 128], strides = [1, 1]} : vector<8x384xf32> to vector<8x128xf32>
    %12 = vector.extract_strided_slice %9 {offsets = [0, 256], sizes = [8, 128], strides = [1, 1]} : vector<8x384xf32> to vector<8x128xf32>
    %13 = vector.extract_strided_slice %10 {offsets = [0, 0], sizes = [8, 64], strides = [1, 1]} : vector<8x128xf32> to vector<8x64xf32>
    %14 = vector.extract_strided_slice %11 {offsets = [0, 0], sizes = [8, 64], strides = [1, 1]} : vector<8x128xf32> to vector<8x64xf32>
    %15 = vector.extract_strided_slice %12 {offsets = [0, 0], sizes = [8, 64], strides = [1, 1]} : vector<8x128xf32> to vector<8x64xf32>
    %16 = arith.truncf %13 : vector<8x64xf32> to vector<8x64xbf16>
    %17 = arith.truncf %14 : vector<8x64xf32> to vector<8x64xbf16>
    %cst_9 = arith.constant dense<0.000000e+00> : vector<8x8xf32>
    %18 = tpu.matmul %16, %17, %cst_9 {dimension_numbers = #tpu.dot_dimension_numbers<[1], [1], [0], [0], [0, 0, 1, 0], [], []>} : vector<8x64xbf16>, vector<8x64xbf16>, vector<8x8xf32> -> vector<8x8xf32>
    %cst_10 = arith.constant 1.250000e-01 : f32
    %19 = vector.broadcast %cst_10 : f32 to vector<8x8xf32>
    %20 = arith.mulf %18, %19 : vector<8x8xf32>
    %cst_11 = arith.constant dense<0xFF800000> : vector<8xf32>
    %21 = vector.multi_reduction <maximumf>, %20, %cst_11 [1] : vector<8x8xf32> to vector<8xf32>
    %22 = vector.shape_cast %21 : vector<8xf32> to vector<8x1xf32>
    %23 = vector.broadcast %22 : vector<8x1xf32> to vector<8x8xf32>
    %24 = arith.subf %20, %23 : vector<8x8xf32>
    %25 = math.exp %24 : vector<8x8xf32>
    %cst_12 = arith.constant dense<0.000000e+00> : vector<8xf32>
    %26 = vector.multi_reduction <add>, %25, %cst_12 [1] : vector<8x8xf32> to vector<8xf32>
    %27 = vector.shape_cast %26 : vector<8xf32> to vector<8x1xf32>
    %28 = tpu.reciprocal %27 {approx = true} : vector<8x1xf32> -> vector<8x1xf32>
    %29 = vector.broadcast %28 : vector<8x1xf32> to vector<8x8xf32>
    %30 = arith.mulf %25, %29 : vector<8x8xf32>
    %31 = arith.truncf %30 : vector<8x8xf32> to vector<8x8xbf16>
    %32 = arith.truncf %15 : vector<8x64xf32> to vector<8x64xbf16>
    %cst_13 = arith.constant dense<0.000000e+00> : vector<8x64xf32>
    %33 = tpu.matmul %31, %32, %cst_13 {dimension_numbers = #tpu.dot_dimension_numbers<[1], [0], [0], [1], [0, 0, 1, 1], [], []>} : vector<8x8xbf16>, vector<8x64xbf16>, vector<8x64xf32> -> vector<8x64xf32>
    %34 = vector.extract_strided_slice %10 {offsets = [0, 64], sizes = [8, 64], strides = [1, 1]} : vector<8x128xf32> to vector<8x64xf32>
    %35 = vector.extract_strided_slice %11 {offsets = [0, 64], sizes = [8, 64], strides = [1, 1]} : vector<8x128xf32> to vector<8x64xf32>
    %36 = vector.extract_strided_slice %12 {offsets = [0, 64], sizes = [8, 64], strides = [1, 1]} : vector<8x128xf32> to vector<8x64xf32>
    %37 = arith.truncf %34 : vector<8x64xf32> to vector<8x64xbf16>
    %38 = arith.truncf %35 : vector<8x64xf32> to vector<8x64xbf16>
    %cst_14 = arith.constant dense<0.000000e+00> : vector<8x8xf32>
    %39 = tpu.matmul %37, %38, %cst_14 {dimension_numbers = #tpu.dot_dimension_numbers<[1], [1], [0], [0], [0, 0, 1, 0], [], []>} : vector<8x64xbf16>, vector<8x64xbf16>, vector<8x8xf32> -> vector<8x8xf32>
    %cst_15 = arith.constant 1.250000e-01 : f32
    %40 = vector.broadcast %cst_15 : f32 to vector<8x8xf32>
    %41 = arith.mulf %39, %40 : vector<8x8xf32>
    %cst_16 = arith.constant dense<0xFF800000> : vector<8xf32>
    %42 = vector.multi_reduction <maximumf>, %41, %cst_16 [1] : vector<8x8xf32> to vector<8xf32>
    %43 = vector.shape_cast %42 : vector<8xf32> to vector<8x1xf32>
    %44 = vector.broadcast %43 : vector<8x1xf32> to vector<8x8xf32>
    %45 = arith.subf %41, %44 : vector<8x8xf32>
    %46 = math.exp %45 : vector<8x8xf32>
    %cst_17 = arith.constant dense<0.000000e+00> : vector<8xf32>
    %47 = vector.multi_reduction <add>, %46, %cst_17 [1] : vector<8x8xf32> to vector<8xf32>
    %48 = vector.shape_cast %47 : vector<8xf32> to vector<8x1xf32>
    %49 = tpu.reciprocal %48 {approx = true} : vector<8x1xf32> -> vector<8x1xf32>
    %50 = vector.broadcast %49 : vector<8x1xf32> to vector<8x8xf32>
    %51 = arith.mulf %46, %50 : vector<8x8xf32>
    %52 = arith.truncf %51 : vector<8x8xf32> to vector<8x8xbf16>
    %53 = arith.truncf %36 : vector<8x64xf32> to vector<8x64xbf16>
    %cst_18 = arith.constant dense<0.000000e+00> : vector<8x64xf32>
    %54 = tpu.matmul %52, %53, %cst_18 {dimension_numbers = #tpu.dot_dimension_numbers<[1], [0], [0], [1], [0, 0, 1, 1], [], []>} : vector<8x8xbf16>, vector<8x64xbf16>, vector<8x64xf32> -> vector<8x64xf32>
    %55 = tpu.concatenate %33, %54 in 1 : vector<8x64xf32>, vector<8x64xf32> -> vector<8x128xf32>
    %56 = arith.truncf %55 : vector<8x128xf32> to vector<8x128xbf16>
    %c0_19 = arith.constant 0 : index
    %c0_20 = arith.constant 0 : index
    %57 = vector.load %arg5[%c0_19, %c0_20] : memref<128x128xbf16, #tpu.memory_space<vmem>>, vector<128x128xbf16>
    %cst_21 = arith.constant dense<0.000000e+00> : vector<8x128xf32>
    %58 = tpu.matmul %56, %57, %cst_21 {dimension_numbers = #tpu.dot_dimension_numbers<[1], [0], [0], [1], [0, 0, 1, 1], [], []>} : vector<8x128xbf16>, vector<128x128xbf16>, vector<8x128xf32> -> vector<8x128xf32>
    %c0_22 = arith.constant 0 : index
    %c0_23 = arith.constant 0 : index
    %59 = vector.load %arg6[%c0_22, %c0_23] : memref<1x128xf32, #tpu.memory_space<vmem>>, vector<1x128xf32>
    %60 = vector.broadcast %59 : vector<1x128xf32> to vector<8x128xf32>
    %61 = arith.addf %58, %60 : vector<8x128xf32>
    %62 = arith.addf %1, %61 : vector<8x128xf32>
    %cst_24 = arith.constant dense<0.000000e+00> : vector<8xf32>
    %63 = vector.multi_reduction <add>, %62, %cst_24 [1] : vector<8x128xf32> to vector<8xf32>
    %64 = vector.shape_cast %63 : vector<8xf32> to vector<8x1xf32>
    %cst_25 = arith.constant 1.280000e+02 : f32
    %65 = vector.broadcast %cst_25 : f32 to vector<8x1xf32>
    %66 = arith.divf %64, %65 : vector<8x1xf32>
    %67 = vector.broadcast %66 : vector<8x1xf32> to vector<8x128xf32>
    %68 = arith.subf %62, %67 : vector<8x128xf32>
    %69 = arith.mulf %68, %68 : vector<8x128xf32>
    %cst_26 = arith.constant dense<0.000000e+00> : vector<8xf32>
    %70 = vector.multi_reduction <add>, %69, %cst_26 [1] : vector<8x128xf32> to vector<8xf32>
    %71 = vector.shape_cast %70 : vector<8xf32> to vector<8x1xf32>
    %cst_27 = arith.constant 1.280000e+02 : f32
    %72 = vector.broadcast %cst_27 : f32 to vector<8x1xf32>
    %73 = arith.divf %71, %72 : vector<8x1xf32>
    %cst_28 = arith.constant 9.99999974E-6 : f32
    %74 = vector.broadcast %cst_28 : f32 to vector<8x1xf32>
    %75 = arith.addf %73, %74 : vector<8x1xf32>
    %76 = math.rsqrt %75 : vector<8x1xf32>
    %77 = vector.broadcast %76 : vector<8x1xf32> to vector<8x128xf32>
    %78 = arith.mulf %68, %77 : vector<8x128xf32>
    %c0_29 = arith.constant 0 : index
    %c0_30 = arith.constant 0 : index
    %79 = vector.load %arg11[%c0_29, %c0_30] : memref<1x128xf32, #tpu.memory_space<vmem>>, vector<1x128xf32>
    %80 = vector.broadcast %79 : vector<1x128xf32> to vector<8x128xf32>
    %81 = arith.mulf %78, %80 : vector<8x128xf32>
    %c0_31 = arith.constant 0 : index
    %c0_32 = arith.constant 0 : index
    %82 = vector.load %arg12[%c0_31, %c0_32] : memref<1x128xf32, #tpu.memory_space<vmem>>, vector<1x128xf32>
    %83 = vector.broadcast %82 : vector<1x128xf32> to vector<8x128xf32>
    %84 = arith.addf %81, %83 : vector<8x128xf32>
    %85 = arith.truncf %84 : vector<8x128xf32> to vector<8x128xbf16>
    %c0_33 = arith.constant 0 : index
    %c0_34 = arith.constant 0 : index
    %86 = vector.load %arg7[%c0_33, %c0_34] : memref<128x512xbf16, #tpu.memory_space<vmem>>, vector<128x512xbf16>
    %cst_35 = arith.constant dense<0.000000e+00> : vector<8x512xf32>
    %87 = tpu.matmul %85, %86, %cst_35 {dimension_numbers = #tpu.dot_dimension_numbers<[1], [0], [0], [1], [0, 0, 1, 1], [], []>} : vector<8x128xbf16>, vector<128x512xbf16>, vector<8x512xf32> -> vector<8x512xf32>
    %c0_36 = arith.constant 0 : index
    %c0_37 = arith.constant 0 : index
    %88 = vector.load %arg8[%c0_36, %c0_37] : memref<1x512xf32, #tpu.memory_space<vmem>>, vector<1x512xf32>
    %89 = vector.broadcast %88 : vector<1x512xf32> to vector<8x512xf32>
    %90 = arith.addf %87, %89 : vector<8x512xf32>
    %cst_38 = arith.constant 0.000000e+00 : f32
    %91 = vector.broadcast %cst_38 : f32 to vector<8x512xf32>
    %92 = arith.maximumf %90, %91 : vector<8x512xf32>
    %93 = arith.truncf %92 : vector<8x512xf32> to vector<8x512xbf16>
    %c0_39 = arith.constant 0 : index
    %c0_40 = arith.constant 0 : index
    %94 = vector.load %arg9[%c0_39, %c0_40] : memref<512x128xbf16, #tpu.memory_space<vmem>>, vector<512x128xbf16>
    %cst_41 = arith.constant dense<0.000000e+00> : vector<8x128xf32>
    %95 = tpu.matmul %93, %94, %cst_41 {dimension_numbers = #tpu.dot_dimension_numbers<[1], [0], [0], [1], [0, 0, 1, 1], [], []>} : vector<8x512xbf16>, vector<512x128xbf16>, vector<8x128xf32> -> vector<8x128xf32>
    %c0_42 = arith.constant 0 : index
    %c0_43 = arith.constant 0 : index
    %96 = vector.load %arg10[%c0_42, %c0_43] : memref<1x128xf32, #tpu.memory_space<vmem>>, vector<1x128xf32>
    %97 = vector.broadcast %96 : vector<1x128xf32> to vector<8x128xf32>
    %98 = arith.addf %95, %97 : vector<8x128xf32>
    %99 = arith.addf %84, %98 : vector<8x128xf32>
    %cst_44 = arith.constant dense<0.000000e+00> : vector<8xf32>
    %100 = vector.multi_reduction <add>, %99, %cst_44 [1] : vector<8x128xf32> to vector<8xf32>
    %101 = vector.shape_cast %100 : vector<8xf32> to vector<8x1xf32>
    %cst_45 = arith.constant 1.280000e+02 : f32
    %102 = vector.broadcast %cst_45 : f32 to vector<8x1xf32>
    %103 = arith.divf %101, %102 : vector<8x1xf32>
    %104 = vector.broadcast %103 : vector<8x1xf32> to vector<8x128xf32>
    %105 = arith.subf %99, %104 : vector<8x128xf32>
    %106 = arith.mulf %105, %105 : vector<8x128xf32>
    %cst_46 = arith.constant dense<0.000000e+00> : vector<8xf32>
    %107 = vector.multi_reduction <add>, %106, %cst_46 [1] : vector<8x128xf32> to vector<8xf32>
    %108 = vector.shape_cast %107 : vector<8xf32> to vector<8x1xf32>
    %cst_47 = arith.constant 1.280000e+02 : f32
    %109 = vector.broadcast %cst_47 : f32 to vector<8x1xf32>
    %110 = arith.divf %108, %109 : vector<8x1xf32>
    %cst_48 = arith.constant 9.99999974E-6 : f32
    %111 = vector.broadcast %cst_48 : f32 to vector<8x1xf32>
    %112 = arith.addf %110, %111 : vector<8x1xf32>
    %113 = math.rsqrt %112 : vector<8x1xf32>
    %114 = vector.broadcast %113 : vector<8x1xf32> to vector<8x128xf32>
    %115 = arith.mulf %105, %114 : vector<8x128xf32>
    %c0_49 = arith.constant 0 : index
    %c0_50 = arith.constant 0 : index
    %116 = vector.load %arg13[%c0_49, %c0_50] : memref<1x128xf32, #tpu.memory_space<vmem>>, vector<1x128xf32>
    %117 = vector.broadcast %116 : vector<1x128xf32> to vector<8x128xf32>
    %118 = arith.mulf %115, %117 : vector<8x128xf32>
    %c0_51 = arith.constant 0 : index
    %c0_52 = arith.constant 0 : index
    %119 = vector.load %arg14[%c0_51, %c0_52] : memref<1x128xf32, #tpu.memory_space<vmem>>, vector<1x128xf32>
    %120 = vector.broadcast %119 : vector<1x128xf32> to vector<8x128xf32>
    %121 = arith.addf %118, %120 : vector<8x128xf32>
    %cst_53 = arith.constant dense<0.000000e+00> : vector<8xf32>
    %122 = vector.multi_reduction <add>, %121, %cst_53 [1] : vector<8x128xf32> to vector<8xf32>
    %123 = vector.shape_cast %122 : vector<8xf32> to vector<8x1xf32>
    %cst_54 = arith.constant 1.280000e+02 : f32
    %124 = vector.broadcast %cst_54 : f32 to vector<8x1xf32>
    %125 = arith.divf %123, %124 : vector<8x1xf32>
    %126 = vector.broadcast %125 : vector<8x1xf32> to vector<8x128xf32>
    %127 = arith.subf %121, %126 : vector<8x128xf32>
    %128 = arith.mulf %127, %127 : vector<8x128xf32>
    %cst_55 = arith.constant dense<0.000000e+00> : vector<8xf32>
    %129 = vector.multi_reduction <add>, %128, %cst_55 [1] : vector<8x128xf32> to vector<8xf32>
    %130 = vector.shape_cast %129 : vector<8xf32> to vector<8x1xf32>
    %cst_56 = arith.constant 1.280000e+02 : f32
    %131 = vector.broadcast %cst_56 : f32 to vector<8x1xf32>
    %132 = arith.divf %130, %131 : vector<8x1xf32>
    %cst_57 = arith.constant 9.99999974E-6 : f32
    %133 = vector.broadcast %cst_57 : f32 to vector<8x1xf32>
    %134 = arith.addf %132, %133 : vector<8x1xf32>
    %135 = math.rsqrt %134 : vector<8x1xf32>
    %136 = vector.broadcast %135 : vector<8x1xf32> to vector<8x128xf32>
    %137 = arith.mulf %127, %136 : vector<8x128xf32>
    %c0_58 = arith.constant 0 : index
    %c0_59 = arith.constant 0 : index
    %138 = vector.load %arg15[%c0_58, %c0_59] : memref<1x128xf32, #tpu.memory_space<vmem>>, vector<1x128xf32>
    %139 = vector.broadcast %138 : vector<1x128xf32> to vector<8x128xf32>
    %140 = arith.mulf %137, %139 : vector<8x128xf32>
    %c0_60 = arith.constant 0 : index
    %c0_61 = arith.constant 0 : index
    %141 = vector.load %arg16[%c0_60, %c0_61] : memref<1x128xf32, #tpu.memory_space<vmem>>, vector<1x128xf32>
    %142 = vector.broadcast %141 : vector<1x128xf32> to vector<8x128xf32>
    %143 = arith.addf %140, %142 : vector<8x128xf32>
    %144 = arith.truncf %3 : vector<8x128xf32> to vector<8x128xbf16>
    %c0_62 = arith.constant 0 : index
    %c0_63 = arith.constant 0 : index
    %145 = vector.load %arg17[%c0_62, %c0_63] : memref<128x384xbf16, #tpu.memory_space<vmem>>, vector<128x384xbf16>
    %cst_64 = arith.constant dense<0.000000e+00> : vector<8x384xf32>
    %146 = tpu.matmul %144, %145, %cst_64 {dimension_numbers = #tpu.dot_dimension_numbers<[1], [0], [0], [1], [0, 0, 1, 1], [], []>} : vector<8x128xbf16>, vector<128x384xbf16>, vector<8x384xf32> -> vector<8x384xf32>
    %c0_65 = arith.constant 0 : index
    %c0_66 = arith.constant 0 : index
    %147 = vector.load %arg18[%c0_65, %c0_66] : memref<1x384xf32, #tpu.memory_space<vmem>>, vector<1x384xf32>
    %148 = vector.broadcast %147 : vector<1x384xf32> to vector<8x384xf32>
    %149 = arith.addf %146, %148 : vector<8x384xf32>
    %150 = vector.extract_strided_slice %149 {offsets = [0, 0], sizes = [8, 128], strides = [1, 1]} : vector<8x384xf32> to vector<8x128xf32>
    %151 = vector.extract_strided_slice %149 {offsets = [0, 128], sizes = [8, 128], strides = [1, 1]} : vector<8x384xf32> to vector<8x128xf32>
    %152 = vector.extract_strided_slice %149 {offsets = [0, 256], sizes = [8, 128], strides = [1, 1]} : vector<8x384xf32> to vector<8x128xf32>
    %153 = vector.extract_strided_slice %150 {offsets = [0, 0], sizes = [8, 64], strides = [1, 1]} : vector<8x128xf32> to vector<8x64xf32>
    %154 = vector.extract_strided_slice %151 {offsets = [0, 0], sizes = [8, 64], strides = [1, 1]} : vector<8x128xf32> to vector<8x64xf32>
    %155 = vector.extract_strided_slice %152 {offsets = [0, 0], sizes = [8, 64], strides = [1, 1]} : vector<8x128xf32> to vector<8x64xf32>
    %156 = arith.truncf %153 : vector<8x64xf32> to vector<8x64xbf16>
    %157 = arith.truncf %154 : vector<8x64xf32> to vector<8x64xbf16>
    %cst_67 = arith.constant dense<0.000000e+00> : vector<8x8xf32>
    %158 = tpu.matmul %156, %157, %cst_67 {dimension_numbers = #tpu.dot_dimension_numbers<[1], [1], [0], [0], [0, 0, 1, 0], [], []>} : vector<8x64xbf16>, vector<8x64xbf16>, vector<8x8xf32> -> vector<8x8xf32>
    %cst_68 = arith.constant 1.250000e-01 : f32
    %159 = vector.broadcast %cst_68 : f32 to vector<8x8xf32>
    %160 = arith.mulf %158, %159 : vector<8x8xf32>
    %cst_69 = arith.constant dense<0xFF800000> : vector<8xf32>
    %161 = vector.multi_reduction <maximumf>, %160, %cst_69 [1] : vector<8x8xf32> to vector<8xf32>
    %162 = vector.shape_cast %161 : vector<8xf32> to vector<8x1xf32>
    %163 = vector.broadcast %162 : vector<8x1xf32> to vector<8x8xf32>
    %164 = arith.subf %160, %163 : vector<8x8xf32>
    %165 = math.exp %164 : vector<8x8xf32>
    %cst_70 = arith.constant dense<0.000000e+00> : vector<8xf32>
    %166 = vector.multi_reduction <add>, %165, %cst_70 [1] : vector<8x8xf32> to vector<8xf32>
    %167 = vector.shape_cast %166 : vector<8xf32> to vector<8x1xf32>
    %168 = tpu.reciprocal %167 {approx = true} : vector<8x1xf32> -> vector<8x1xf32>
    %169 = vector.broadcast %168 : vector<8x1xf32> to vector<8x8xf32>
    %170 = arith.mulf %165, %169 : vector<8x8xf32>
    %171 = arith.truncf %170 : vector<8x8xf32> to vector<8x8xbf16>
    %172 = arith.truncf %155 : vector<8x64xf32> to vector<8x64xbf16>
    %cst_71 = arith.constant dense<0.000000e+00> : vector<8x64xf32>
    %173 = tpu.matmul %171, %172, %cst_71 {dimension_numbers = #tpu.dot_dimension_numbers<[1], [0], [0], [1], [0, 0, 1, 1], [], []>} : vector<8x8xbf16>, vector<8x64xbf16>, vector<8x64xf32> -> vector<8x64xf32>
    %174 = vector.extract_strided_slice %150 {offsets = [0, 64], sizes = [8, 64], strides = [1, 1]} : vector<8x128xf32> to vector<8x64xf32>
    %175 = vector.extract_strided_slice %151 {offsets = [0, 64], sizes = [8, 64], strides = [1, 1]} : vector<8x128xf32> to vector<8x64xf32>
    %176 = vector.extract_strided_slice %152 {offsets = [0, 64], sizes = [8, 64], strides = [1, 1]} : vector<8x128xf32> to vector<8x64xf32>
    %177 = arith.truncf %174 : vector<8x64xf32> to vector<8x64xbf16>
    %178 = arith.truncf %175 : vector<8x64xf32> to vector<8x64xbf16>
    %cst_72 = arith.constant dense<0.000000e+00> : vector<8x8xf32>
    %179 = tpu.matmul %177, %178, %cst_72 {dimension_numbers = #tpu.dot_dimension_numbers<[1], [1], [0], [0], [0, 0, 1, 0], [], []>} : vector<8x64xbf16>, vector<8x64xbf16>, vector<8x8xf32> -> vector<8x8xf32>
    %cst_73 = arith.constant 1.250000e-01 : f32
    %180 = vector.broadcast %cst_73 : f32 to vector<8x8xf32>
    %181 = arith.mulf %179, %180 : vector<8x8xf32>
    %cst_74 = arith.constant dense<0xFF800000> : vector<8xf32>
    %182 = vector.multi_reduction <maximumf>, %181, %cst_74 [1] : vector<8x8xf32> to vector<8xf32>
    %183 = vector.shape_cast %182 : vector<8xf32> to vector<8x1xf32>
    %184 = vector.broadcast %183 : vector<8x1xf32> to vector<8x8xf32>
    %185 = arith.subf %181, %184 : vector<8x8xf32>
    %186 = math.exp %185 : vector<8x8xf32>
    %cst_75 = arith.constant dense<0.000000e+00> : vector<8xf32>
    %187 = vector.multi_reduction <add>, %186, %cst_75 [1] : vector<8x8xf32> to vector<8xf32>
    %188 = vector.shape_cast %187 : vector<8xf32> to vector<8x1xf32>
    %189 = tpu.reciprocal %188 {approx = true} : vector<8x1xf32> -> vector<8x1xf32>
    %190 = vector.broadcast %189 : vector<8x1xf32> to vector<8x8xf32>
    %191 = arith.mulf %186, %190 : vector<8x8xf32>
    %192 = arith.truncf %191 : vector<8x8xf32> to vector<8x8xbf16>
    %193 = arith.truncf %176 : vector<8x64xf32> to vector<8x64xbf16>
    %cst_76 = arith.constant dense<0.000000e+00> : vector<8x64xf32>
    %194 = tpu.matmul %192, %193, %cst_76 {dimension_numbers = #tpu.dot_dimension_numbers<[1], [0], [0], [1], [0, 0, 1, 1], [], []>} : vector<8x8xbf16>, vector<8x64xbf16>, vector<8x64xf32> -> vector<8x64xf32>
    %195 = tpu.concatenate %173, %194 in 1 : vector<8x64xf32>, vector<8x64xf32> -> vector<8x128xf32>
    %196 = arith.truncf %195 : vector<8x128xf32> to vector<8x128xbf16>
    %c0_77 = arith.constant 0 : index
    %c0_78 = arith.constant 0 : index
    %197 = vector.load %arg19[%c0_77, %c0_78] : memref<128x128xbf16, #tpu.memory_space<vmem>>, vector<128x128xbf16>
    %cst_79 = arith.constant dense<0.000000e+00> : vector<8x128xf32>
    %198 = tpu.matmul %196, %197, %cst_79 {dimension_numbers = #tpu.dot_dimension_numbers<[1], [0], [0], [1], [0, 0, 1, 1], [], []>} : vector<8x128xbf16>, vector<128x128xbf16>, vector<8x128xf32> -> vector<8x128xf32>
    %c0_80 = arith.constant 0 : index
    %c0_81 = arith.constant 0 : index
    %199 = vector.load %arg20[%c0_80, %c0_81] : memref<1x128xf32, #tpu.memory_space<vmem>>, vector<1x128xf32>
    %200 = vector.broadcast %199 : vector<1x128xf32> to vector<8x128xf32>
    %201 = arith.addf %198, %200 : vector<8x128xf32>
    %202 = arith.addf %3, %201 : vector<8x128xf32>
    %cst_82 = arith.constant dense<0.000000e+00> : vector<8xf32>
    %203 = vector.multi_reduction <add>, %202, %cst_82 [1] : vector<8x128xf32> to vector<8xf32>
    %204 = vector.shape_cast %203 : vector<8xf32> to vector<8x1xf32>
    %cst_83 = arith.constant 1.280000e+02 : f32
    %205 = vector.broadcast %cst_83 : f32 to vector<8x1xf32>
    %206 = arith.divf %204, %205 : vector<8x1xf32>
    %207 = vector.broadcast %206 : vector<8x1xf32> to vector<8x128xf32>
    %208 = arith.subf %202, %207 : vector<8x128xf32>
    %209 = arith.mulf %208, %208 : vector<8x128xf32>
    %cst_84 = arith.constant dense<0.000000e+00> : vector<8xf32>
    %210 = vector.multi_reduction <add>, %209, %cst_84 [1] : vector<8x128xf32> to vector<8xf32>
    %211 = vector.shape_cast %210 : vector<8xf32> to vector<8x1xf32>
    %cst_85 = arith.constant 1.280000e+02 : f32
    %212 = vector.broadcast %cst_85 : f32 to vector<8x1xf32>
    %213 = arith.divf %211, %212 : vector<8x1xf32>
    %cst_86 = arith.constant 9.99999974E-6 : f32
    %214 = vector.broadcast %cst_86 : f32 to vector<8x1xf32>
    %215 = arith.addf %213, %214 : vector<8x1xf32>
    %216 = math.rsqrt %215 : vector<8x1xf32>
    %217 = vector.broadcast %216 : vector<8x1xf32> to vector<8x128xf32>
    %218 = arith.mulf %208, %217 : vector<8x128xf32>
    %c0_87 = arith.constant 0 : index
    %c0_88 = arith.constant 0 : index
    %219 = vector.load %arg31[%c0_87, %c0_88] : memref<1x128xf32, #tpu.memory_space<vmem>>, vector<1x128xf32>
    %220 = vector.broadcast %219 : vector<1x128xf32> to vector<8x128xf32>
    %221 = arith.mulf %218, %220 : vector<8x128xf32>
    %c0_89 = arith.constant 0 : index
    %c0_90 = arith.constant 0 : index
    %222 = vector.load %arg32[%c0_89, %c0_90] : memref<1x128xf32, #tpu.memory_space<vmem>>, vector<1x128xf32>
    %223 = vector.broadcast %222 : vector<1x128xf32> to vector<8x128xf32>
    %224 = arith.addf %221, %223 : vector<8x128xf32>
    %225 = arith.truncf %224 : vector<8x128xf32> to vector<8x128xbf16>
    %c0_91 = arith.constant 0 : index
    %c0_92 = arith.constant 0 : index
    %226 = vector.load %arg21[%c0_91, %c0_92] : memref<128x128xbf16, #tpu.memory_space<vmem>>, vector<128x128xbf16>
    %cst_93 = arith.constant dense<0.000000e+00> : vector<8x128xf32>
    %227 = tpu.matmul %225, %226, %cst_93 {dimension_numbers = #tpu.dot_dimension_numbers<[1], [0], [0], [1], [0, 0, 1, 1], [], []>} : vector<8x128xbf16>, vector<128x128xbf16>, vector<8x128xf32> -> vector<8x128xf32>
    %c0_94 = arith.constant 0 : index
    %c0_95 = arith.constant 0 : index
    %228 = vector.load %arg22[%c0_94, %c0_95] : memref<1x128xf32, #tpu.memory_space<vmem>>, vector<1x128xf32>
    %229 = vector.broadcast %228 : vector<1x128xf32> to vector<8x128xf32>
    %230 = arith.addf %227, %229 : vector<8x128xf32>
    %231 = arith.truncf %143 : vector<8x128xf32> to vector<8x128xbf16>
    %c0_96 = arith.constant 0 : index
    %c0_97 = arith.constant 0 : index
    %232 = vector.load %arg23[%c0_96, %c0_97] : memref<128x256xbf16, #tpu.memory_space<vmem>>, vector<128x256xbf16>
    %cst_98 = arith.constant dense<0.000000e+00> : vector<8x256xf32>
    %233 = tpu.matmul %231, %232, %cst_98 {dimension_numbers = #tpu.dot_dimension_numbers<[1], [0], [0], [1], [0, 0, 1, 1], [], []>} : vector<8x128xbf16>, vector<128x256xbf16>, vector<8x256xf32> -> vector<8x256xf32>
    %c0_99 = arith.constant 0 : index
    %c0_100 = arith.constant 0 : index
    %234 = vector.load %arg24[%c0_99, %c0_100] : memref<1x256xf32, #tpu.memory_space<vmem>>, vector<1x256xf32>
    %235 = vector.broadcast %234 : vector<1x256xf32> to vector<8x256xf32>
    %236 = arith.addf %233, %235 : vector<8x256xf32>
    %237 = vector.extract_strided_slice %236 {offsets = [0, 0], sizes = [8, 128], strides = [1, 1]} : vector<8x256xf32> to vector<8x128xf32>
    %238 = vector.extract_strided_slice %236 {offsets = [0, 128], sizes = [8, 128], strides = [1, 1]} : vector<8x256xf32> to vector<8x128xf32>
    %239 = vector.extract_strided_slice %230 {offsets = [0, 0], sizes = [8, 64], strides = [1, 1]} : vector<8x128xf32> to vector<8x64xf32>
    %240 = vector.extract_strided_slice %237 {offsets = [0, 0], sizes = [8, 64], strides = [1, 1]} : vector<8x128xf32> to vector<8x64xf32>
    %241 = vector.extract_strided_slice %238 {offsets = [0, 0], sizes = [8, 64], strides = [1, 1]} : vector<8x128xf32> to vector<8x64xf32>
    %242 = arith.truncf %239 : vector<8x64xf32> to vector<8x64xbf16>
    %243 = arith.truncf %240 : vector<8x64xf32> to vector<8x64xbf16>
    %cst_101 = arith.constant dense<0.000000e+00> : vector<8x8xf32>
    %244 = tpu.matmul %242, %243, %cst_101 {dimension_numbers = #tpu.dot_dimension_numbers<[1], [1], [0], [0], [0, 0, 1, 0], [], []>} : vector<8x64xbf16>, vector<8x64xbf16>, vector<8x8xf32> -> vector<8x8xf32>
    %cst_102 = arith.constant 1.250000e-01 : f32
    %245 = vector.broadcast %cst_102 : f32 to vector<8x8xf32>
    %246 = arith.mulf %244, %245 : vector<8x8xf32>
    %cst_103 = arith.constant dense<0xFF800000> : vector<8xf32>
    %247 = vector.multi_reduction <maximumf>, %246, %cst_103 [1] : vector<8x8xf32> to vector<8xf32>
    %248 = vector.shape_cast %247 : vector<8xf32> to vector<8x1xf32>
    %249 = vector.broadcast %248 : vector<8x1xf32> to vector<8x8xf32>
    %250 = arith.subf %246, %249 : vector<8x8xf32>
    %251 = math.exp %250 : vector<8x8xf32>
    %cst_104 = arith.constant dense<0.000000e+00> : vector<8xf32>
    %252 = vector.multi_reduction <add>, %251, %cst_104 [1] : vector<8x8xf32> to vector<8xf32>
    %253 = vector.shape_cast %252 : vector<8xf32> to vector<8x1xf32>
    %254 = tpu.reciprocal %253 {approx = true} : vector<8x1xf32> -> vector<8x1xf32>
    %255 = vector.broadcast %254 : vector<8x1xf32> to vector<8x8xf32>
    %256 = arith.mulf %251, %255 : vector<8x8xf32>
    %257 = arith.truncf %256 : vector<8x8xf32> to vector<8x8xbf16>
    %258 = arith.truncf %241 : vector<8x64xf32> to vector<8x64xbf16>
    %cst_105 = arith.constant dense<0.000000e+00> : vector<8x64xf32>
    %259 = tpu.matmul %257, %258, %cst_105 {dimension_numbers = #tpu.dot_dimension_numbers<[1], [0], [0], [1], [0, 0, 1, 1], [], []>} : vector<8x8xbf16>, vector<8x64xbf16>, vector<8x64xf32> -> vector<8x64xf32>
    %260 = vector.extract_strided_slice %230 {offsets = [0, 64], sizes = [8, 64], strides = [1, 1]} : vector<8x128xf32> to vector<8x64xf32>
    %261 = vector.extract_strided_slice %237 {offsets = [0, 64], sizes = [8, 64], strides = [1, 1]} : vector<8x128xf32> to vector<8x64xf32>
    %262 = vector.extract_strided_slice %238 {offsets = [0, 64], sizes = [8, 64], strides = [1, 1]} : vector<8x128xf32> to vector<8x64xf32>
    %263 = arith.truncf %260 : vector<8x64xf32> to vector<8x64xbf16>
    %264 = arith.truncf %261 : vector<8x64xf32> to vector<8x64xbf16>
    %cst_106 = arith.constant dense<0.000000e+00> : vector<8x8xf32>
    %265 = tpu.matmul %263, %264, %cst_106 {dimension_numbers = #tpu.dot_dimension_numbers<[1], [1], [0], [0], [0, 0, 1, 0], [], []>} : vector<8x64xbf16>, vector<8x64xbf16>, vector<8x8xf32> -> vector<8x8xf32>
    %cst_107 = arith.constant 1.250000e-01 : f32
    %266 = vector.broadcast %cst_107 : f32 to vector<8x8xf32>
    %267 = arith.mulf %265, %266 : vector<8x8xf32>
    %cst_108 = arith.constant dense<0xFF800000> : vector<8xf32>
    %268 = vector.multi_reduction <maximumf>, %267, %cst_108 [1] : vector<8x8xf32> to vector<8xf32>
    %269 = vector.shape_cast %268 : vector<8xf32> to vector<8x1xf32>
    %270 = vector.broadcast %269 : vector<8x1xf32> to vector<8x8xf32>
    %271 = arith.subf %267, %270 : vector<8x8xf32>
    %272 = math.exp %271 : vector<8x8xf32>
    %cst_109 = arith.constant dense<0.000000e+00> : vector<8xf32>
    %273 = vector.multi_reduction <add>, %272, %cst_109 [1] : vector<8x8xf32> to vector<8xf32>
    %274 = vector.shape_cast %273 : vector<8xf32> to vector<8x1xf32>
    %275 = tpu.reciprocal %274 {approx = true} : vector<8x1xf32> -> vector<8x1xf32>
    %276 = vector.broadcast %275 : vector<8x1xf32> to vector<8x8xf32>
    %277 = arith.mulf %272, %276 : vector<8x8xf32>
    %278 = arith.truncf %277 : vector<8x8xf32> to vector<8x8xbf16>
    %279 = arith.truncf %262 : vector<8x64xf32> to vector<8x64xbf16>
    %cst_110 = arith.constant dense<0.000000e+00> : vector<8x64xf32>
    %280 = tpu.matmul %278, %279, %cst_110 {dimension_numbers = #tpu.dot_dimension_numbers<[1], [0], [0], [1], [0, 0, 1, 1], [], []>} : vector<8x8xbf16>, vector<8x64xbf16>, vector<8x64xf32> -> vector<8x64xf32>
    %281 = tpu.concatenate %259, %280 in 1 : vector<8x64xf32>, vector<8x64xf32> -> vector<8x128xf32>
    %282 = arith.truncf %281 : vector<8x128xf32> to vector<8x128xbf16>
    %c0_111 = arith.constant 0 : index
    %c0_112 = arith.constant 0 : index
    %283 = vector.load %arg25[%c0_111, %c0_112] : memref<128x128xbf16, #tpu.memory_space<vmem>>, vector<128x128xbf16>
    %cst_113 = arith.constant dense<0.000000e+00> : vector<8x128xf32>
    %284 = tpu.matmul %282, %283, %cst_113 {dimension_numbers = #tpu.dot_dimension_numbers<[1], [0], [0], [1], [0, 0, 1, 1], [], []>} : vector<8x128xbf16>, vector<128x128xbf16>, vector<8x128xf32> -> vector<8x128xf32>
    %c0_114 = arith.constant 0 : index
    %c0_115 = arith.constant 0 : index
    %285 = vector.load %arg26[%c0_114, %c0_115] : memref<1x128xf32, #tpu.memory_space<vmem>>, vector<1x128xf32>
    %286 = vector.broadcast %285 : vector<1x128xf32> to vector<8x128xf32>
    %287 = arith.addf %284, %286 : vector<8x128xf32>
    %288 = arith.addf %224, %287 : vector<8x128xf32>
    %cst_116 = arith.constant dense<0.000000e+00> : vector<8xf32>
    %289 = vector.multi_reduction <add>, %288, %cst_116 [1] : vector<8x128xf32> to vector<8xf32>
    %290 = vector.shape_cast %289 : vector<8xf32> to vector<8x1xf32>
    %cst_117 = arith.constant 1.280000e+02 : f32
    %291 = vector.broadcast %cst_117 : f32 to vector<8x1xf32>
    %292 = arith.divf %290, %291 : vector<8x1xf32>
    %293 = vector.broadcast %292 : vector<8x1xf32> to vector<8x128xf32>
    %294 = arith.subf %288, %293 : vector<8x128xf32>
    %295 = arith.mulf %294, %294 : vector<8x128xf32>
    %cst_118 = arith.constant dense<0.000000e+00> : vector<8xf32>
    %296 = vector.multi_reduction <add>, %295, %cst_118 [1] : vector<8x128xf32> to vector<8xf32>
    %297 = vector.shape_cast %296 : vector<8xf32> to vector<8x1xf32>
    %cst_119 = arith.constant 1.280000e+02 : f32
    %298 = vector.broadcast %cst_119 : f32 to vector<8x1xf32>
    %299 = arith.divf %297, %298 : vector<8x1xf32>
    %cst_120 = arith.constant 9.99999974E-6 : f32
    %300 = vector.broadcast %cst_120 : f32 to vector<8x1xf32>
    %301 = arith.addf %299, %300 : vector<8x1xf32>
    %302 = math.rsqrt %301 : vector<8x1xf32>
    %303 = vector.broadcast %302 : vector<8x1xf32> to vector<8x128xf32>
    %304 = arith.mulf %294, %303 : vector<8x128xf32>
    %c0_121 = arith.constant 0 : index
    %c0_122 = arith.constant 0 : index
    %305 = vector.load %arg33[%c0_121, %c0_122] : memref<1x128xf32, #tpu.memory_space<vmem>>, vector<1x128xf32>
    %306 = vector.broadcast %305 : vector<1x128xf32> to vector<8x128xf32>
    %307 = arith.mulf %304, %306 : vector<8x128xf32>
    %c0_123 = arith.constant 0 : index
    %c0_124 = arith.constant 0 : index
    %308 = vector.load %arg34[%c0_123, %c0_124] : memref<1x128xf32, #tpu.memory_space<vmem>>, vector<1x128xf32>
    %309 = vector.broadcast %308 : vector<1x128xf32> to vector<8x128xf32>
    %310 = arith.addf %307, %309 : vector<8x128xf32>
    %311 = arith.truncf %310 : vector<8x128xf32> to vector<8x128xbf16>
    %c0_125 = arith.constant 0 : index
    %c0_126 = arith.constant 0 : index
    %312 = vector.load %arg27[%c0_125, %c0_126] : memref<128x512xbf16, #tpu.memory_space<vmem>>, vector<128x512xbf16>
    %cst_127 = arith.constant dense<0.000000e+00> : vector<8x512xf32>
    %313 = tpu.matmul %311, %312, %cst_127 {dimension_numbers = #tpu.dot_dimension_numbers<[1], [0], [0], [1], [0, 0, 1, 1], [], []>} : vector<8x128xbf16>, vector<128x512xbf16>, vector<8x512xf32> -> vector<8x512xf32>
    %c0_128 = arith.constant 0 : index
    %c0_129 = arith.constant 0 : index
    %314 = vector.load %arg28[%c0_128, %c0_129] : memref<1x512xf32, #tpu.memory_space<vmem>>, vector<1x512xf32>
    %315 = vector.broadcast %314 : vector<1x512xf32> to vector<8x512xf32>
    %316 = arith.addf %313, %315 : vector<8x512xf32>
    %cst_130 = arith.constant 0.000000e+00 : f32
    %317 = vector.broadcast %cst_130 : f32 to vector<8x512xf32>
    %318 = arith.maximumf %316, %317 : vector<8x512xf32>
    %319 = arith.truncf %318 : vector<8x512xf32> to vector<8x512xbf16>
    %c0_131 = arith.constant 0 : index
    %c0_132 = arith.constant 0 : index
    %320 = vector.load %arg29[%c0_131, %c0_132] : memref<512x128xbf16, #tpu.memory_space<vmem>>, vector<512x128xbf16>
    %cst_133 = arith.constant dense<0.000000e+00> : vector<8x128xf32>
    %321 = tpu.matmul %319, %320, %cst_133 {dimension_numbers = #tpu.dot_dimension_numbers<[1], [0], [0], [1], [0, 0, 1, 1], [], []>} : vector<8x512xbf16>, vector<512x128xbf16>, vector<8x128xf32> -> vector<8x128xf32>
    %c0_134 = arith.constant 0 : index
    %c0_135 = arith.constant 0 : index
    %322 = vector.load %arg30[%c0_134, %c0_135] : memref<1x128xf32, #tpu.memory_space<vmem>>, vector<1x128xf32>
    %323 = vector.broadcast %322 : vector<1x128xf32> to vector<8x128xf32>
    %324 = arith.addf %321, %323 : vector<8x128xf32>
    %325 = arith.addf %310, %324 : vector<8x128xf32>
    %cst_136 = arith.constant dense<0.000000e+00> : vector<8xf32>
    %326 = vector.multi_reduction <add>, %325, %cst_136 [1] : vector<8x128xf32> to vector<8xf32>
    %327 = vector.shape_cast %326 : vector<8xf32> to vector<8x1xf32>
    %cst_137 = arith.constant 1.280000e+02 : f32
    %328 = vector.broadcast %cst_137 : f32 to vector<8x1xf32>
    %329 = arith.divf %327, %328 : vector<8x1xf32>
    %330 = vector.broadcast %329 : vector<8x1xf32> to vector<8x128xf32>
    %331 = arith.subf %325, %330 : vector<8x128xf32>
    %332 = arith.mulf %331, %331 : vector<8x128xf32>
    %cst_138 = arith.constant dense<0.000000e+00> : vector<8xf32>
    %333 = vector.multi_reduction <add>, %332, %cst_138 [1] : vector<8x128xf32> to vector<8xf32>
    %334 = vector.shape_cast %333 : vector<8xf32> to vector<8x1xf32>
    %cst_139 = arith.constant 1.280000e+02 : f32
    %335 = vector.broadcast %cst_139 : f32 to vector<8x1xf32>
    %336 = arith.divf %334, %335 : vector<8x1xf32>
    %cst_140 = arith.constant 9.99999974E-6 : f32
    %337 = vector.broadcast %cst_140 : f32 to vector<8x1xf32>
    %338 = arith.addf %336, %337 : vector<8x1xf32>
    %339 = math.rsqrt %338 : vector<8x1xf32>
    %340 = vector.broadcast %339 : vector<8x1xf32> to vector<8x128xf32>
    %341 = arith.mulf %331, %340 : vector<8x128xf32>
    %c0_141 = arith.constant 0 : index
    %c0_142 = arith.constant 0 : index
    %342 = vector.load %arg35[%c0_141, %c0_142] : memref<1x128xf32, #tpu.memory_space<vmem>>, vector<1x128xf32>
    %343 = vector.broadcast %342 : vector<1x128xf32> to vector<8x128xf32>
    %344 = arith.mulf %341, %343 : vector<8x128xf32>
    %c0_143 = arith.constant 0 : index
    %c0_144 = arith.constant 0 : index
    %345 = vector.load %arg36[%c0_143, %c0_144] : memref<1x128xf32, #tpu.memory_space<vmem>>, vector<1x128xf32>
    %346 = vector.broadcast %345 : vector<1x128xf32> to vector<8x128xf32>
    %347 = arith.addf %344, %346 : vector<8x128xf32>
    %cst_145 = arith.constant dense<0.000000e+00> : vector<8xf32>
    %348 = vector.multi_reduction <add>, %347, %cst_145 [1] : vector<8x128xf32> to vector<8xf32>
    %349 = vector.shape_cast %348 : vector<8xf32> to vector<8x1xf32>
    %cst_146 = arith.constant 1.280000e+02 : f32
    %350 = vector.broadcast %cst_146 : f32 to vector<8x1xf32>
    %351 = arith.divf %349, %350 : vector<8x1xf32>
    %352 = vector.broadcast %351 : vector<8x1xf32> to vector<8x128xf32>
    %353 = arith.subf %347, %352 : vector<8x128xf32>
    %354 = arith.mulf %353, %353 : vector<8x128xf32>
    %cst_147 = arith.constant dense<0.000000e+00> : vector<8xf32>
    %355 = vector.multi_reduction <add>, %354, %cst_147 [1] : vector<8x128xf32> to vector<8xf32>
    %356 = vector.shape_cast %355 : vector<8xf32> to vector<8x1xf32>
    %cst_148 = arith.constant 1.280000e+02 : f32
    %357 = vector.broadcast %cst_148 : f32 to vector<8x1xf32>
    %358 = arith.divf %356, %357 : vector<8x1xf32>
    %cst_149 = arith.constant 9.99999974E-6 : f32
    %359 = vector.broadcast %cst_149 : f32 to vector<8x1xf32>
    %360 = arith.addf %358, %359 : vector<8x1xf32>
    %361 = math.rsqrt %360 : vector<8x1xf32>
    %362 = vector.broadcast %361 : vector<8x1xf32> to vector<8x128xf32>
    %363 = arith.mulf %353, %362 : vector<8x128xf32>
    %c0_150 = arith.constant 0 : index
    %c0_151 = arith.constant 0 : index
    %364 = vector.load %arg37[%c0_150, %c0_151] : memref<1x128xf32, #tpu.memory_space<vmem>>, vector<1x128xf32>
    %365 = vector.broadcast %364 : vector<1x128xf32> to vector<8x128xf32>
    %366 = arith.mulf %363, %365 : vector<8x128xf32>
    %c0_152 = arith.constant 0 : index
    %c0_153 = arith.constant 0 : index
    %367 = vector.load %arg38[%c0_152, %c0_153] : memref<1x128xf32, #tpu.memory_space<vmem>>, vector<1x128xf32>
    %368 = vector.broadcast %367 : vector<1x128xf32> to vector<8x128xf32>
    %369 = arith.addf %366, %368 : vector<8x128xf32>
    %370 = arith.truncf %369 : vector<8x128xf32> to vector<8x128xbf16>
    %c0_154 = arith.constant 0 : index
    %c0_155 = arith.constant 0 : index
    %371 = vector.load %arg39[%c0_154, %c0_155] : memref<128x128xbf16, #tpu.memory_space<vmem>>, vector<128x128xbf16>
    %cst_156 = arith.constant dense<0.000000e+00> : vector<8x128xf32>
    %372 = tpu.matmul %370, %371, %cst_156 {dimension_numbers = #tpu.dot_dimension_numbers<[1], [0], [0], [1], [0, 0, 1, 1], [], []>} : vector<8x128xbf16>, vector<128x128xbf16>, vector<8x128xf32> -> vector<8x128xf32>
    %c0_157 = arith.constant 0 : index
    %c0_158 = arith.constant 0 : index
    %373 = vector.load %arg40[%c0_157, %c0_158] : memref<1x128xf32, #tpu.memory_space<vmem>>, vector<1x128xf32>
    %374 = vector.broadcast %373 : vector<1x128xf32> to vector<8x128xf32>
    %375 = arith.addf %372, %374 : vector<8x128xf32>
    %c0_159 = arith.constant 0 : index
    %c0_160 = arith.constant 0 : index
    %c0_161 = arith.constant 0 : index
    %376 = vector.load %arg41[%c0_159, %c0_160, %c0_161] : memref<1x8x128xf32, #tpu.memory_space<vmem>>, vector<1x8x128xf32>
    %377 = vector.shape_cast %376 : vector<1x8x128xf32> to vector<8x128xf32>
    %378 = vector.shape_cast %375 : vector<8x128xf32> to vector<1x8x128xf32>
    tpu.vector_store %arg41[%c0_159, %c0_160, %c0_161], %378 {strides = array<i32>} : memref<1x8x128xf32, #tpu.memory_space<vmem>>, vector<1x8x128xf32>,
    return
  }
  func.func @transform_0(%arg0: i32) -> (i32, i32, i32) {
    %c0_i32 = arith.constant 0 : i32
    %c0_i32_0 = arith.constant 0 : i32
    %c0_i32_1 = arith.constant 0 : i32
    return %arg0, %c0_i32, %c0_i32_0 : i32, i32, i32
  }
  func.func @transform_1(%arg0: i32) -> (i32, i32, i32) {
    %c0_i32 = arith.constant 0 : i32
    %c0_i32_0 = arith.constant 0 : i32
    %c0_i32_1 = arith.constant 0 : i32
    return %arg0, %c0_i32, %c0_i32_0 : i32, i32, i32
  }
  func.func @transform_2(%arg0: i32) -> (i32, i32) {
    %c0_i32 = arith.constant 0 : i32
    %c0_i32_0 = arith.constant 0 : i32
    %c0_i32_1 = arith.constant 0 : i32
    return %c0_i32, %c0_i32_0 : i32, i32
  }
  func.func @transform_3(%arg0: i32) -> (i32, i32) {
    %c0_i32 = arith.constant 0 : i32
    %c0_i32_0 = arith.constant 0 : i32
    %c0_i32_1 = arith.constant 0 : i32
    return %c0_i32, %c0_i32_0 : i32, i32
  }
  func.func @transform_4(%arg0: i32) -> (i32, i32) {
    %c0_i32 = arith.constant 0 : i32
    %c0_i32_0 = arith.constant 0 : i32
    %c0_i32_1 = arith.constant 0 : i32
    return %c0_i32, %c0_i32_0 : i32, i32
  }
  func.func @transform_5(%arg0: i32) -> (i32, i32) {
    %c0_i32 = arith.constant 0 : i32
    %c0_i32_0 = arith.constant 0 : i32
    %c0_i32_1 = arith.constant 0 : i32
    return %c0_i32, %c0_i32_0 : i32, i32
  }
  func.func @transform_6(%arg0: i32) -> (i32, i32) {
    %c0_i32 = arith.constant 0 : i32
    %c0_i32_0 = arith.constant 0 : i32
    %c0_i32_1 = arith.constant 0 : i32
    return %c0_i32, %c0_i32_0 : i32, i32
  }
  func.func @transform_7(%arg0: i32) -> (i32, i32) {
    %c0_i32 = arith.constant 0 : i32
    %c0_i32_0 = arith.constant 0 : i32
    %c0_i32_1 = arith.constant 0 : i32
    return %c0_i32, %c0_i32_0 : i32, i32
  }
  func.func @transform_8(%arg0: i32) -> (i32, i32) {
    %c0_i32 = arith.constant 0 : i32
    %c0_i32_0 = arith.constant 0 : i32
    %c0_i32_1 = arith.constant 0 : i32
    return %c0_i32, %c0_i32_0 : i32, i32
  }
  func.func @transform_9(%arg0: i32) -> (i32, i32) {
    %c0_i32 = arith.constant 0 : i32
    %c0_i32_0 = arith.constant 0 : i32
    %c0_i32_1 = arith.constant 0 : i32
    return %c0_i32, %c0_i32_0 : i32, i32
  }
  func.func @transform_10(%arg0: i32) -> (i32, i32) {
    %c0_i32 = arith.constant 0 : i32
    %c0_i32_0 = arith.constant 0 : i32
    %c0_i32_1 = arith.constant 0 : i32
    return %c0_i32, %c0_i32_0 : i32, i32
  }
  func.func @transform_11(%arg0: i32) -> (i32, i32) {
    %c0_i32 = arith.constant 0 : i32
    %c0_i32_0 = arith.constant 0 : i32
    %c0_i32_1 = arith.constant 0 : i32
    return %c0_i32, %c0_i32_0 : i32, i32
  }
  func.func @transform_12(%arg0: i32) -> (i32, i32) {
    %c0_i32 = arith.constant 0 : i32
    %c0_i32_0 = arith.constant 0 : i32
    %c0_i32_1 = arith.constant 0 : i32
    return %c0_i32, %c0_i32_0 : i32, i32
  }
  func.func @transform_13(%arg0: i32) -> (i32, i32) {
    %c0_i32 = arith.constant 0 : i32
    %c0_i32_0 = arith.constant 0 : i32
    %c0_i32_1 = arith.constant 0 : i32
    return %c0_i32, %c0_i32_0 : i32, i32
  }
  func.func @transform_14(%arg0: i32) -> (i32, i32) {
    %c0_i32 = arith.constant 0 : i32
    %c0_i32_0 = arith.constant 0 : i32
    %c0_i32_1 = arith.constant 0 : i32
    return %c0_i32, %c0_i32_0 : i32, i32
  }
  func.func @transform_15(%arg0: i32) -> (i32, i32) {
    %c0_i32 = arith.constant 0 : i32
    %c0_i32_0 = arith.constant 0 : i32
    %c0_i32_1 = arith.constant 0 : i32
    return %c0_i32, %c0_i32_0 : i32, i32
  }
  func.func @transform_16(%arg0: i32) -> (i32, i32) {
    %c0_i32 = arith.constant 0 : i32
    %c0_i32_0 = arith.constant 0 : i32
    %c0_i32_1 = arith.constant 0 : i32
    return %c0_i32, %c0_i32_0 : i32, i32
  }
  func.func @transform_17(%arg0: i32) -> (i32, i32) {
    %c0_i32 = arith.constant 0 : i32
    %c0_i32_0 = arith.constant 0 : i32
    %c0_i32_1 = arith.constant 0 : i32
    return %c0_i32, %c0_i32_0 : i32, i32
  }
  func.func @transform_18(%arg0: i32) -> (i32, i32) {
    %c0_i32 = arith.constant 0 : i32
    %c0_i32_0 = arith.constant 0 : i32
    %c0_i32_1 = arith.constant 0 : i32
    return %c0_i32, %c0_i32_0 : i32, i32
  }
  func.func @transform_19(%arg0: i32) -> (i32, i32) {
    %c0_i32 = arith.constant 0 : i32
    %c0_i32_0 = arith.constant 0 : i32
    %c0_i32_1 = arith.constant 0 : i32
    return %c0_i32, %c0_i32_0 : i32, i32
  }
  func.func @transform_20(%arg0: i32) -> (i32, i32) {
    %c0_i32 = arith.constant 0 : i32
    %c0_i32_0 = arith.constant 0 : i32
    %c0_i32_1 = arith.constant 0 : i32
    return %c0_i32, %c0_i32_0 : i32, i32
  }
  func.func @transform_21(%arg0: i32) -> (i32, i32) {
    %c0_i32 = arith.constant 0 : i32
    %c0_i32_0 = arith.constant 0 : i32
    %c0_i32_1 = arith.constant 0 : i32
    return %c0_i32, %c0_i32_0 : i32, i32
  }
  func.func @transform_22(%arg0: i32) -> (i32, i32) {
    %c0_i32 = arith.constant 0 : i32
    %c0_i32_0 = arith.constant 0 : i32
    %c0_i32_1 = arith.constant 0 : i32
    return %c0_i32, %c0_i32_0 : i32, i32
  }
  func.func @transform_23(%arg0: i32) -> (i32, i32) {
    %c0_i32 = arith.constant 0 : i32
    %c0_i32_0 = arith.constant 0 : i32
    %c0_i32_1 = arith.constant 0 : i32
    return %c0_i32, %c0_i32_0 : i32, i32
  }
  func.func @transform_24(%arg0: i32) -> (i32, i32) {
    %c0_i32 = arith.constant 0 : i32
    %c0_i32_0 = arith.constant 0 : i32
    %c0_i32_1 = arith.constant 0 : i32
    return %c0_i32, %c0_i32_0 : i32, i32
  }
  func.func @transform_25(%arg0: i32) -> (i32, i32) {
    %c0_i32 = arith.constant 0 : i32
    %c0_i32_0 = arith.constant 0 : i32
    %c0_i32_1 = arith.constant 0 : i32
    return %c0_i32, %c0_i32_0 : i32, i32
  }
  func.func @transform_26(%arg0: i32) -> (i32, i32) {
    %c0_i32 = arith.constant 0 : i32
    %c0_i32_0 = arith.constant 0 : i32
    %c0_i32_1 = arith.constant 0 : i32
    return %c0_i32, %c0_i32_0 : i32, i32
  }
  func.func @transform_27(%arg0: i32) -> (i32, i32) {
    %c0_i32 = arith.constant 0 : i32
    %c0_i32_0 = arith.constant 0 : i32
    %c0_i32_1 = arith.constant 0 : i32
    return %c0_i32, %c0_i32_0 : i32, i32
  }
  func.func @transform_28(%arg0: i32) -> (i32, i32) {
    %c0_i32 = arith.constant 0 : i32
    %c0_i32_0 = arith.constant 0 : i32
    %c0_i32_1 = arith.constant 0 : i32
    return %c0_i32, %c0_i32_0 : i32, i32
  }
  func.func @transform_29(%arg0: i32) -> (i32, i32) {
    %c0_i32 = arith.constant 0 : i32
    %c0_i32_0 = arith.constant 0 : i32
    %c0_i32_1 = arith.constant 0 : i32
    return %c0_i32, %c0_i32_0 : i32, i32
  }
  func.func @transform_30(%arg0: i32) -> (i32, i32) {
    %c0_i32 = arith.constant 0 : i32
    %c0_i32_0 = arith.constant 0 : i32
    %c0_i32_1 = arith.constant 0 : i32
    return %c0_i32, %c0_i32_0 : i32, i32
  }
  func.func @transform_31(%arg0: i32) -> (i32, i32) {
    %c0_i32 = arith.constant 0 : i32
    %c0_i32_0 = arith.constant 0 : i32
    %c0_i32_1 = arith.constant 0 : i32
    return %c0_i32, %c0_i32_0 : i32, i32
  }
  func.func @transform_32(%arg0: i32) -> (i32, i32) {
    %c0_i32 = arith.constant 0 : i32
    %c0_i32_0 = arith.constant 0 : i32
    %c0_i32_1 = arith.constant 0 : i32
    return %c0_i32, %c0_i32_0 : i32, i32
  }
  func.func @transform_33(%arg0: i32) -> (i32, i32) {
    %c0_i32 = arith.constant 0 : i32
    %c0_i32_0 = arith.constant 0 : i32
    %c0_i32_1 = arith.constant 0 : i32
    return %c0_i32, %c0_i32_0 : i32, i32
  }
  func.func @transform_34(%arg0: i32) -> (i32, i32) {
    %c0_i32 = arith.constant 0 : i32
    %c0_i32_0 = arith.constant 0 : i32
    %c0_i32_1 = arith.constant 0 : i32
    return %c0_i32, %c0_i32_0 : i32, i32
  }
  func.func @transform_35(%arg0: i32) -> (i32, i32) {
    %c0_i32 = arith.constant 0 : i32
    %c0_i32_0 = arith.constant 0 : i32
    %c0_i32_1 = arith.constant 0 : i32
    return %c0_i32, %c0_i32_0 : i32, i32
  }
  func.func @transform_36(%arg0: i32) -> (i32, i32) {
    %c0_i32 = arith.constant 0 : i32
    %c0_i32_0 = arith.constant 0 : i32
    %c0_i32_1 = arith.constant 0 : i32
    return %c0_i32, %c0_i32_0 : i32, i32
  }
  func.func @transform_37(%arg0: i32) -> (i32, i32) {
    %c0_i32 = arith.constant 0 : i32
    %c0_i32_0 = arith.constant 0 : i32
    %c0_i32_1 = arith.constant 0 : i32
    return %c0_i32, %c0_i32_0 : i32, i32
  }
  func.func @transform_38(%arg0: i32) -> (i32, i32) {
    %c0_i32 = arith.constant 0 : i32
    %c0_i32_0 = arith.constant 0 : i32
    %c0_i32_1 = arith.constant 0 : i32
    return %c0_i32, %c0_i32_0 : i32, i32
  }
  func.func @transform_39(%arg0: i32) -> (i32, i32) {
    %c0_i32 = arith.constant 0 : i32
    %c0_i32_0 = arith.constant 0 : i32
    %c0_i32_1 = arith.constant 0 : i32
    return %c0_i32, %c0_i32_0 : i32, i32
  }
  func.func @transform_40(%arg0: i32) -> (i32, i32, i32) {
    %c0_i32 = arith.constant 0 : i32
    %c0_i32_0 = arith.constant 0 : i32
    %c0_i32_1 = arith.constant 0 : i32
    return %arg0, %c0_i32, %c0_i32_0 : i32, i32, i32
  }
}

</mosaic_0001>

<bundles_post_ra>
// kernel: transformer_pallas.1
= control target key start
LH: loop header
LB: loop body
LE: loop exit
PB: predicated region body
PF: predicated region fallthrough
CT: control target
= control target key end

     0   :  { %s7184_s6 = smov 1   ;;  %s7185_s10 = smov 2   ;;  %s8014_s0 = inlined_call_operand.smem [shape: u32[41], index: -1, kind: input, shape index: {}] }
   0x1   :  { %s7266_s5 = sld [smem:[%s8014_s0]]   ;;  %s7186_s14 = smov 3  }
   0x2   :  { %s7271_s9 = sld [smem:[%s8014_s0 + %s7184_s6]]   ;;  %s7187_s18 = smov 4  }
   0x3   :  { %s7276_s13 = sld [smem:[%s8014_s0 + %s7185_s10]]   ;;  %s7188_s22 = smov 5  }
   0x4   :  { %s7281_s17 = sld [smem:[%s8014_s0 + %s7186_s14]]   ;;  %s7189_s26 = smov 6  }
   0x5   :  { %s7286_s21 = sld [smem:[%s8014_s0 + %s7187_s18]]   ;;  %s7190_s30 = smov 7  }
   0x6   :  { %s7291_s25 = sld [smem:[%s8014_s0 + %s7188_s22]]   ;;  %s7191_s4 = smov 8  }
   0x7   :  { %8023 = sst [smem:[#allocation48_spill]] %s7266_s5  ;;  %s7192_s10 = smov 9  }
   0x8   :  { %8024 = sst [smem:[#allocation49_spill]] %s7271_s9  ;;  %s7193_s15 = smov 10  }
   0x9   :  { %s7296_s29 = sld [smem:[%s8014_s0 + %s7189_s26]]   ;;  %s7194_s20 = smov 11  }
   0xa   :  { %s7301_s3 = sld [smem:[%s8014_s0 + %s7190_s30]]   ;;  %s7195_s26 = smov 12  }
   0xb   :  { %s7306_s8 = sld [smem:[%s8014_s0 + %s7191_s4]]   ;;  %s7196_s1 = smov 13  }
   0xc   :  { %s7311_s14 = sld [smem:[%s8014_s0 + %s7192_s10]]   ;;  %s7197_s7 = smov 14  }
   0xd   :  { %s7316_s19 = sld [smem:[%s8014_s0 + %s7193_s15]]   ;;  %s7198_s15 = smov 15  }
   0xe   :  { %s7321_s24 = sld [smem:[%s8014_s0 + %s7194_s20]]   ;;  %s7199_s22 = smov 16  }
   0xf   :  { %8025 = sst [smem:[#allocation50_spill]] %s7296_s29  ;;  %s7200_s28 = smov 17  }
  0x10   :  { %s7326_s30 = sld [smem:[%s8014_s0 + %s7195_s26]]  }
  0x11   :  { %8026 = sst [smem:[#allocation51_spill]] %s7306_s8 }
  0x12   :  { %s7331_s6 = sld [smem:[%s8014_s0 + %s7196_s1]]  }
  0x13   :  { %s7336_s12 = sld [smem:[%s8014_s0 + %s7197_s7]]   ;;  %s7201_s7 = smov 18  }
  0x14   :  { %8027 = sst [smem:[#allocation52_spill]] %s7321_s24 }
  0x15   :  { %s7341_s20 = sld [smem:[%s8014_s0 + %s7198_s15]]   ;;  %s7202_s15 = smov 19  }
  0x16   :  { %s7346_s27 = sld [smem:[%s8014_s0 + %s7199_s22]]   ;;  %s7203_s22 = smov 20  }
  0x17   :  { %s7351_s4 = sld [smem:[%s8014_s0 + %s7200_s28]]   ;;  %s7204_s28 = smov 21  }
  0x18   :  { %8028 = sst [smem:[#allocation53_spill]] %s7331_s6 }
  0x19   :  { %s7356_s9 = sld [smem:[%s8014_s0 + %s7201_s7]]   ;;  %s7205_s7 = smov 22  }
  0x1a   :  { %s7361_s29 = sld [smem:[%s8014_s0 + %s7202_s15]]   ;;  %s7206_s15 = smov 23  }
  0x1b   :  { %8029 = sst [smem:[#allocation54_spill]] %s7341_s20 }
  0x1c   :  { %8030 = sst [smem:[#allocation55_spill]] %s7346_s27 }
  0x1d   :  { %8031 = sst [smem:[#allocation56_spill]] %s7351_s4 }
  0x1e   :  { %s7366_s27 = sld [smem:[%s8014_s0 + %s7203_s22]]   ;;  %s7207_s22 = smov 24  }
  0x1f   :  { %8032 = sst [smem:[#allocation57_spill]] %s7356_s9 }
  0x20   :  { %8033 = sst [smem:[#allocation58_spill]] %s7361_s29 }
  0x21   :  { %s7371_s5 = sld [smem:[%s8014_s0 + %s7204_s28]]   ;;  %s7208_s28 = smov 25  }
  0x22   :  { %s7376_s9 = sld [smem:[%s8014_s0 + %s7205_s7]]   ;;  %s7209_s7 = smov 26  }
  0x23   :  { %s7381_s29 = sld [smem:[%s8014_s0 + %s7206_s15]]   ;;  %s7210_s15 = smov 27  }
  0x24   :  { %s7386_s20 = sld [smem:[%s8014_s0 + %s7207_s22]]   ;;  %s7211_s22 = smov 28  }
  0x25   :  { %s7396_s6 = sld [smem:[%s8014_s0 + %s7209_s7]]   ;;  %s7213_s7 = smov 30  }
  0x26   :  { %s7416_s24 = sld [smem:[%s8014_s0 + %s7213_s7]]   ;;  %s7217_s7 = smov 34  }
  0x27   :  { %8034 = sst [smem:[#allocation59_spill]] %s7371_s5 }
  0x28   :  { %s7391_s5 = sld [smem:[%s8014_s0 + %s7208_s28]]   ;;  %s7212_s28 = smov 29  }
  0x29   :  { %8035 = sst [smem:[#allocation60_spill]] %s7381_s29 }
  0x2a   :  { %8036 = sst [smem:[#allocation61_spill]] %s7386_s20 }
  0x2b   :  { %8038 = sst [smem:[#allocation63_spill]] %s7396_s6 }
  0x2c   :  { %s7401_s29 = sld [smem:[%s8014_s0 + %s7210_s15]]   ;;  %s7214_s15 = smov 31  }
  0x2d   :  { %s7406_s20 = sld [smem:[%s8014_s0 + %s7211_s22]]   ;;  %s7215_s22 = smov 32  }
  0x2e   :  { %8037 = sst [smem:[#allocation62_spill]] %s7391_s5 }
  0x2f   :  { %s7411_s5 = sld [smem:[%s8014_s0 + %s7212_s28]]   ;;  %s7216_s28 = smov 33  }
  0x30   :  { %8042 = sst [smem:[#allocation67_spill]] %s7416_s24 }
  0x31   :  { %s7436_s24 = sld [smem:[%s8014_s0 + %s7217_s7]]   ;;  %s7221_s7 = smov 38  }
  0x32   :  { %8039 = sst [smem:[#allocation64_spill]] %s7401_s29 }
  0x33   :  { %8040 = sst [smem:[#allocation65_spill]] %s7406_s20 }
  0x34   :  { %s7421_s29 = sld [smem:[%s8014_s0 + %s7214_s15]]   ;;  %s7218_s15 = smov 35  }
  0x35   :  { %8041 = sst [smem:[#allocation66_spill]] %s7411_s5 }
  0x36   :  { %s7426_s20 = sld [smem:[%s8014_s0 + %s7215_s22]]   ;;  %s7219_s22 = smov 36  }
  0x37   :  { %s7431_s5 = sld [smem:[%s8014_s0 + %s7216_s28]]   ;;  %s7220_s28 = smov 37  }
  0x38   :  { %8046 = sst [smem:[#allocation71_spill]] %s7436_s24 }
  0x39   :  { %s7456_s24 = sld [smem:[%s8014_s0 + %s7221_s7]]  }
  0x3a   :  { %8043 = sst [smem:[#allocation68_spill]] %s7421_s29 }
  0x3b   :  { %s7441_s29 = sld [smem:[%s8014_s0 + %s7218_s15]]   ;;  %s7222_s15 = smov 39  }
  0x3c   :  { %8044 = sst [smem:[#allocation69_spill]] %s7426_s20 }
  0x3d   :  { %8045 = sst [smem:[#allocation70_spill]] %s7431_s5 }
  0x3e   :  { %s7446_s20 = sld [smem:[%s8014_s0 + %s7219_s22]]   ;;  %s7223_s22 = smov 40  }
  0x3f   :  { %s7451_s5 = sld [smem:[%s8014_s0 + %s7220_s28]]  }
  0x41   :  { %8047 = sst [smem:[#allocation72_spill]] %s7441_s29 }
  0x42   :  { %s7461_s29 = sld [smem:[%s8014_s0 + %s7222_s15]]  }
  0x44   :  { %8048 = sst [smem:[#allocation73_spill]] %s7446_s20 }
  0x45   :  { %s7466_s20 = sld [smem:[%s8014_s0 + %s7223_s22]]  }
  0x46   :  { %86 = vsyncpa [#allocation3], 0 }
  0x47   :  { %87 = vsyncpa [#allocation5], 0 }
  0x48   :  { %88 = vsyncpa [#allocation8], 0 }
  0x49   :  { %89 = vsyncpa [#allocation11], 0 }
  0x4a   :  { %90 = vsyncpa [#allocation14], 0 }
  0x4b   :  { %91 = vsyncpa [#allocation17], 0 }
  0x4c   :  { %92 = vsyncpa [#allocation20], 0 }
  0x4d   :  { %93 = vsyncpa [#allocation23], 0 }
  0x4e   :  { %94 = vsyncpa [#allocation26], 0 }
  0x4f   :  { %95 = vsyncpa [#allocation29], 0 }
  0x50   :  { %96 = vsyncpa [#allocation32], 0 }
  0x51   :  { %97 = vsyncpa [#allocation35], 0  ;;  %s7468_s28 = smov 0  }
  0x52 LB: > { %s7224_s0 = smov [#allocation4]   ;;  %s7474_s2 = sadd.s32 4294967295, %s7182_s28   ;;  %s7182_s28 = sphi %s7468_s28, %s103_s28  }
  0x53   : > { %s1010_s1 = sshll.u32 %s7224_s0, 4  ;;  %p5245_p0 = scmp.ge.s32.totalorder %s7182_s28, 1  ;;  %s1011_s1 = int_to_ptr.vmem [resolvable:$true] %s1010_s1 }
  0x54   : > { %p984_p1 = scmp.lt.s32.totalorder %s7182_s28, 3  ;;  %p8021_p2 = scmp.eq.s32.totalorder %s7474_s2, 0 }
  0x55   : > { %s7225_s10 = smov [#allocation7]   ;;  %s7226_s16 = smov [#allocation10]  }
  0x56   : > { %p7479_p3 = pnand %p5245_p0, %p984_p1  ;;  %s1034_s11 = sshll.u32 %s7225_s10, 4  ;;  %s7485_s11 = int_to_ptr.vmem [resolvable:$true] %s1034_s11 }
  0x57   : > { %s1058_s18 = sshll.u32 %s7226_s16, 4  ;;  %s7227_s22 = smov [#allocation13]   ;;  %s7493_s18 = int_to_ptr.vmem [resolvable:$true] %s1058_s18 }
  0x58   : > { %s8049_s7 = scalar_select %p7479_p3, 1, 0 }
  0x59   : > { %p6037_p4 = pneg %p7479_p3  ;;  %s7495_s23 = sshll.u32 %s7227_s22, 4  ;;  %s1084_s23 = int_to_ptr.vmem [resolvable:$true] %s7495_s23 }
  0x5a   : > { %s6567_s0 = scalar_lea.vmem %s1011_s1, 48  ;;  %s6574_s10 = scalar_lea.vmem %s1011_s1, 64 }
  0x5b   : > { %p7489_p5 = pnand %p8021_p2, %p6037_p4  ;;  %p6568_p7 = scmp.ne.s32.totalorder %s1011_s1, %s6567_s0 }
  0x5c   : > { %p6575_p10 = scmp.lt.s32.totalorder %s1011_s1, %s1011_s1  ;;  %p6576_p11 = scmp.lt.s32.totalorder %s6574_s10, %s6567_s0 }
  0x5d   : > { %p7499_p6 = pneg %p7489_p5 }
  0x5e   : > { %p6577_p12 = por %p6576_p11, %p6575_p10 }
  0x5f   : > { %p6570_p8 = pnand %p6568_p7, %p7499_p6 }
  0x61   : > { %p6571_p9 = pneg %p6570_p8 }
  0x63   : > { %p6578_p13 = pnand %p6577_p12, %p6571_p9 }
  0x65   : > { %6581 = shalt.err (!%p6578_p13)
}
  0x66   : > { %6043 = dma.hbm_to_vmem [thread:$0]  (!%p7489_p5), %s7281_s17, 48, %s1011_s1, [#allocation5]  }
  0x67   : > { %s6593_s16 = scalar_lea.vmem %s7485_s11, 16  ;;  %s6600_s22 = scalar_lea.vmem %s7485_s11, 32 }
  0x68   : > { %p6594_p0 = scmp.ne.s32.totalorder %s7485_s11, %s6593_s16  ;;  %p6601_p7 = scmp.lt.s32.totalorder %s7485_s11, %s7485_s11 }
  0x69   : > { %p6602_p8 = scmp.lt.s32.totalorder %s6600_s22, %s6593_s16 }
  0x6a   : > { %p6596_p1 = pnand %p6594_p0, %p7499_p6 }
  0x6b   : > { %p6603_p9 = por %p6602_p8, %p6601_p7 }
  0x6c   : > { %p6597_p4 = pneg %p6596_p1 }
  0x6e   : > { %p6604_p10 = pnand %p6603_p9, %p6597_p4 }
  0x70   : > { %6607 = shalt.err (!%p6604_p10)
}
  0x71   : > { %6049 = dma.hbm_to_vmem [thread:$0]  (!%p7489_p5), %s7291_s25, 16, %s7485_s11, [#allocation8]  }
  0x72   : > { %s6619_s1 = scalar_lea.vmem %s7493_s18, 4096  ;;  %p6627_p0 = scmp.lt.s32.totalorder %s7493_s18, %s7493_s18 }
  0x73   : > { %p6620_p11 = scmp.ne.s32.totalorder %s7493_s18, %s6619_s1  ;;  %p6628_p1 = scmp.lt.s32.totalorder %s6619_s1, %s6619_s1 }
  0x75   : > { %p6622_p12 = pnand %p6620_p11, %p7499_p6  ;;  %p6629_p7 = por %p6628_p1, %p6627_p0 }
  0x77   : > { %p6623_p13 = pneg %p6622_p12 }
  0x79   : > { %p6630_p4 = pnand %p6629_p7, %p6623_p13 }
  0x7b   : > { %6633 = shalt.err (!%p6630_p4)
}
  0x7c   : > { %s8017_s0 = smov 64   ;;  %s8052_s8 = sld [smem:[#allocation51_spill]] }
  0x7d   : > { %s8019_s10 = smov 4   ;;  %s6645_s11 = scalar_lea.vmem %s1084_s23, 16 }
  0x7e   : > { %p6646_p8 = scmp.ne.s32.totalorder %s1084_s23, %s6645_s11  ;;  %s6652_s16 = scalar_lea.vmem %s1084_s23, 32 }
  0x7f   : > { %p6653_p11 = scmp.lt.s32.totalorder %s1084_s23, %s1084_s23  ;;  %p6654_p12 = scmp.lt.s32.totalorder %s6652_s16, %s6645_s11 }
  0x80   : > { %p6648_p9 = pnand %p6646_p8, %p7499_p6 }
  0x81   : > { %p6655_p13 = por %p6654_p12, %p6653_p11 }
  0x82   : > { %6055 = dma.hbm_to_vmem [thread:$0]  (!%p7489_p5), %s8052_s8, 4096, %s7493_s18, [#allocation11], %s8017_s0, %s8017_s0, %s8019_s10  }
  0x83   : > { %p6649_p10 = pneg %p6648_p9 }
  0x85   : > { %p6656_p0 = pnand %p6655_p13, %p6649_p10 }
  0x87   : > { %6659 = shalt.err (!%p6656_p0)
}
  0x88   : > { %6061 = dma.hbm_to_vmem [thread:$0]  (!%p7489_p5), %s7316_s19, 16, %s1084_s23, [#allocation14]  }
  0x89   : > { %s7230_s22 = smov [#allocation16]   ;;  %s7231_s18 = smov [#allocation19]  }
  0x8a   : > { %s1105_s1 = sshll.u32 %s7230_s22, 4  ;;  %s1127_s0 = sshll.u32 %s7231_s18, 4  ;;  %s1106_s1 = int_to_ptr.vmem [resolvable:$true] %s1105_s1  ;;  %s1128_s0 = int_to_ptr.vmem [resolvable:$true] %s1127_s0 }
  0x8b   : > { %s6671_s10 = scalar_lea.vmem %s1106_s1, 16  ;;  %s6678_s8 = scalar_lea.vmem %s1106_s1, 32 }
  0x8c   : > { %p6672_p1 = scmp.ne.s32.totalorder %s1106_s1, %s6671_s10  ;;  %p6679_p8 = scmp.lt.s32.totalorder %s1106_s1, %s1106_s1 }
  0x8d   : > { %p6680_p9 = scmp.lt.s32.totalorder %s6678_s8, %s6671_s10 }
  0x8e   : > { %p6674_p7 = pnand %p6672_p1, %p7499_p6 }
  0x8f   : > { %p6681_p10 = por %p6680_p9, %p6679_p8 }
  0x90   : > { %p6675_p4 = pneg %p6674_p7 }
  0x92   : > { %p6682_p11 = pnand %p6681_p10, %p6675_p4 }
  0x94   : > { %6685 = shalt.err (!%p6682_p11)
}
  0x95   : > { %6067 = dma.hbm_to_vmem [thread:$0]  (!%p7489_p5), %s7326_s30, 16, %s1106_s1, [#allocation17]  }
  0x96   : > { %s6697_s23 = scalar_lea.vmem %s1128_s0, 16  ;;  %s6704_s11 = scalar_lea.vmem %s1128_s0, 32 }
  0x97   : > { %p6698_p12 = scmp.ne.s32.totalorder %s1128_s0, %s6697_s23  ;;  %p6705_p1 = scmp.lt.s32.totalorder %s1128_s0, %s1128_s0 }
  0x98   : > { %p6706_p7 = scmp.lt.s32.totalorder %s6704_s11, %s6697_s23 }
  0x99   : > { %p6700_p13 = pnand %p6698_p12, %p7499_p6 }
  0x9a   : > { %p6707_p2 = por %p6706_p7, %p6705_p1 }
  0x9b   : > { %p6701_p0 = pneg %p6700_p13 }
  0x9d   : > { %p6708_p3 = pnand %p6707_p2, %p6701_p0 }
  0x9f   : > { %6711 = shalt.err (!%p6708_p3)
}
  0xa0   : > { %6073 = dma.hbm_to_vmem [thread:$0]  (!%p7489_p5), %s7336_s12, 16, %s1128_s0, [#allocation20]  }
  0xa1   : > { %s7232_s8 = smov [#allocation22]   ;;  %s7233_s16 = smov [#allocation25]  }
  0xa2   : > { %s1152_s10 = sshll.u32 %s7232_s8, 4  ;;  %s1178_s22 = sshll.u32 %s7233_s16, 4  ;;  %s1153_s10 = int_to_ptr.vmem [resolvable:$true] %s1152_s10  ;;  %s1179_s22 = int_to_ptr.vmem [resolvable:$true] %s1178_s22 }
  0xa3   : > { %s6723_s1 = scalar_lea.vmem %s1153_s10, 48  ;;  %s6730_s18 = scalar_lea.vmem %s1153_s10, 64 }
  0xa4   : > { %p6724_p4 = scmp.ne.s32.totalorder %s1153_s10, %s6723_s1  ;;  %p6731_p10 = scmp.lt.s32.totalorder %s1153_s10, %s1153_s10 }
  0xa5   : > { %p6732_p11 = scmp.lt.s32.totalorder %s6730_s18, %s6723_s1 }
  0xa6   : > { %p6726_p8 = pnand %p6724_p4, %p7499_p6 }
  0xa7   : > { %p6733_p2 = por %p6732_p11, %p6731_p10 }
  0xa8   : > { %p6727_p9 = pneg %p6726_p8 }
  0xaa   : > { %p6734_p3 = pnand %p6733_p2, %p6727_p9 }
  0xac   : > { %6737 = shalt.err (!%p6734_p3)
}
  0xad   : > { %s8053_s4 = sld [smem:[#allocation56_spill]]  ;;  %s6749_s0 = scalar_lea.vmem %s1179_s22, 1024 }
  0xae   : > { %p6750_p12 = scmp.ne.s32.totalorder %s1179_s22, %s6749_s0  ;;  %p6757_p1 = scmp.lt.s32.totalorder %s1179_s22, %s1179_s22 }
  0xaf   : > { %p6758_p7 = scmp.lt.s32.totalorder %s6749_s0, %s6749_s0 }
  0xb0   : > { %p6752_p13 = pnand %p6750_p12, %p7499_p6 }
  0xb1   : > { %p6759_p4 = por %p6758_p7, %p6757_p1 }
  0xb2   : > { %p6753_p0 = pneg %p6752_p13 }
  0xb3   : > { %6079 = dma.hbm_to_vmem [thread:$0]  (!%p7489_p5), %s8053_s4, 48, %s1153_s10, [#allocation23]  }
  0xb4   : > { %p6760_p8 = pnand %p6759_p4, %p6753_p0 }
  0xb6   : > { %6763 = shalt.err (!%p6760_p8)
}
  0xb7   : > { %s8054_s23 = smov 4   ;;  %s8055_s11 = smov 64  }
  0xb8   : > { %6085 = dma.hbm_to_vmem [thread:$0]  (!%p7489_p5), %s7366_s27, 1024, %s1179_s22, [#allocation26], %s8055_s11, %s8055_s11, %s8054_s23  }
  0xb9   : > { %s7234_s8 = smov [#allocation28]  }
  0xba   : > { %s1202_s10 = sshll.u32 %s7234_s8, 4  ;;  %s1203_s10 = int_to_ptr.vmem [resolvable:$true] %s1202_s10 }
  0xbb   : > { %s6775_s16 = scalar_lea.vmem %s1203_s10, 2048  ;;  %p6783_p2 = scmp.lt.s32.totalorder %s1203_s10, %s1203_s10 }
  0xbc   : > { %p6776_p9 = scmp.ne.s32.totalorder %s1203_s10, %s6775_s16  ;;  %p6784_p3 = scmp.lt.s32.totalorder %s6775_s16, %s6775_s16 }
  0xbe   : > { %p6778_p10 = pnand %p6776_p9, %p7499_p6  ;;  %p6785_p12 = por %p6784_p3, %p6783_p2 }
  0xc0   : > { %p6779_p11 = pneg %p6778_p10 }
  0xc2   : > { %p6786_p13 = pnand %p6785_p12, %p6779_p11 }
  0xc4   : > { %6789 = shalt.err (!%p6786_p13)
}
  0xc5   : > { %s7235_s1 = smov 128   ;;  %s7236_s18 = smov 8  }
  0xc6   : > { %6091 = dma.hbm_to_vmem [thread:$0]  (!%p7489_p5), %s7376_s9, 2048, %s1203_s10, [#allocation29], %s7235_s1, %s7235_s1, %s7236_s18  }
  0xc7   : > { %s7237_s22 = smov [#allocation31]  }
  0xc8   : > { %s1234_s0 = sshll.u32 %s7237_s22, 4  ;;  %s1235_s0 = int_to_ptr.vmem [resolvable:$true] %s1234_s0 }
  0xc9   : > { %s6801_s8 = scalar_lea.vmem %s1235_s0, 4096  ;;  %p6809_p4 = scmp.lt.s32.totalorder %s1235_s0, %s1235_s0 }
  0xca   : > { %p6802_p0 = scmp.ne.s32.totalorder %s1235_s0, %s6801_s8  ;;  %p6810_p8 = scmp.lt.s32.totalorder %s6801_s8, %s6801_s8 }
  0xcc   : > { %p6804_p1 = pnand %p6802_p0, %p7499_p6  ;;  %p6811_p9 = por %p6810_p8, %p6809_p4 }
  0xce   : > { %p6805_p7 = pneg %p6804_p1 }
  0xd0   : > { %p6812_p10 = pnand %p6811_p9, %p6805_p7 }
  0xd2   : > { %6815 = shalt.err (!%p6812_p10)
}
  0xd3   : > { %s7238_s16 = smov 256   ;;  %s8056_s6 = sld [smem:[#allocation63_spill]] }
  0xd4   : > { %s7239_s4 = smov 16   ;;  %s7240_s10 = smov [#allocation2]  }
  0xd5   : > { %s996_s1 = sshll.u32 %s7240_s10, 4  ;;  %s997_s1 = int_to_ptr.vmem [resolvable:$true] %s996_s1 }
  0xd6   : > { %s6827_s18 = scalar_lea.vmem %s997_s1, 3072  ;;  %p6835_p12 = scmp.lt.s32.totalorder %s997_s1, %s997_s1 }
  0xd7   : > { %p6828_p11 = scmp.ne.s32.totalorder %s997_s1, %s6827_s18  ;;  %p6836_p13 = scmp.lt.s32.totalorder %s6827_s18, %s6827_s18 }
  0xd9   : > { %6097 = dma.hbm_to_vmem [thread:$0]  (!%p7489_p5), %s8056_s6, 4096, %s1235_s0, [#allocation32], %s7238_s16, %s7238_s16, %s7239_s4  }
  0xda   : > { %p6830_p2 = pnand %p6828_p11, %p7499_p6  ;;  %p6837_p0 = por %p6836_p13, %p6835_p12 }
  0xdc   : > { %p6831_p3 = pneg %p6830_p2 }
  0xde   : > { %p6838_p1 = pnand %p6837_p0, %p6831_p3 }
  0xe0   : > { %6841 = shalt.err (!%p6838_p1)
}
  0xe1   : > { %s7241_s22 = smov 192   ;;  %s7242_s8 = smov 12  }
  0xe2   : > { %6040 = dma.hbm_to_vmem [thread:$0]  (!%p7489_p5), %s7276_s13, 3072, %s997_s1, [#allocation3], %s7241_s22, %s7241_s22, %s7242_s8  }
  0xe3   : > { %s7243_s4 = smov [#allocation6]   ;;  %s7244_s16 = smov [#allocation9]  }
  0xe4   : > { %s1020_s0 = sshll.u32 %s7243_s4, 4  ;;  %s1048_s10 = sshll.u32 %s7244_s16, 4  ;;  %s1021_s0 = int_to_ptr.vmem [resolvable:$true] %s1020_s0  ;;  %s1049_s10 = int_to_ptr.vmem [resolvable:$true] %s1048_s10 }
  0xe5   : > { %s6853_s6 = scalar_lea.vmem %s1021_s0, 1024  ;;  %p6861_p9 = scmp.lt.s32.totalorder %s1021_s0, %s1021_s0 }
  0xe6   : > { %p6854_p7 = scmp.ne.s32.totalorder %s1021_s0, %s6853_s6  ;;  %p6862_p10 = scmp.lt.s32.totalorder %s6853_s6, %s6853_s6 }
  0xe8   : > { %p6856_p4 = pnand %p6854_p7, %p7499_p6  ;;  %p6863_p11 = por %p6862_p10, %p6861_p9 }
  0xea   : > { %p6857_p8 = pneg %p6856_p4 }
  0xec   : > { %p6864_p2 = pnand %p6863_p11, %p6857_p8 }
  0xee   : > { %6867 = shalt.err (!%p6864_p2)
}
  0xef   : > { %6046 = dma.hbm_to_vmem [thread:$0]  (!%p7489_p5), %s7286_s21, 1024, %s1021_s0, [#allocation5], %s8055_s11, %s8055_s11, %s8054_s23  }
  0xf0   : > { %s6879_s1 = scalar_lea.vmem %s1049_s10, 64  ;;  %p6887_p0 = scmp.lt.s32.totalorder %s1049_s10, %s1049_s10 }
  0xf1   : > { %p6880_p3 = scmp.ne.s32.totalorder %s1049_s10, %s6879_s1  ;;  %p6888_p1 = scmp.lt.s32.totalorder %s6879_s1, %s6879_s1 }
  0xf3   : > { %p6882_p12 = pnand %p6880_p3, %p7499_p6  ;;  %p6889_p7 = por %p6888_p1, %p6887_p0 }
  0xf5   : > { %p6883_p13 = pneg %p6882_p12 }
  0xf7   : > { %p6890_p4 = pnand %p6889_p7, %p6883_p13 }
  0xf9   : > { %6893 = shalt.err (!%p6890_p4)
}
  0xfa   : > { %6052 = dma.hbm_to_vmem [thread:$0]  (!%p7489_p5), %s7301_s3, 64, %s1049_s10, [#allocation8]  }
  0xfb   : > { %s7245_s6 = smov [#allocation12]   ;;  %s7246_s22 = smov [#allocation15]  }
  0xfc   : > { %s1072_s18 = sshll.u32 %s7245_s6, 4  ;;  %s1094_s8 = sshll.u32 %s7246_s22, 4  ;;  %s1073_s18 = int_to_ptr.vmem [resolvable:$true] %s1072_s18  ;;  %s1095_s8 = int_to_ptr.vmem [resolvable:$true] %s1094_s8 }
  0xfd   : > { %s6905_s4 = scalar_lea.vmem %s1073_s18, 16  ;;  %s6912_s0 = scalar_lea.vmem %s1073_s18, 32 }
  0xfe   : > { %p6906_p8 = scmp.ne.s32.totalorder %s1073_s18, %s6905_s4  ;;  %p6913_p11 = scmp.lt.s32.totalorder %s1073_s18, %s1073_s18 }
  0xff   : > { %p6914_p2 = scmp.lt.s32.totalorder %s6912_s0, %s6905_s4 }
 0x100   : > { %p6908_p9 = pnand %p6906_p8, %p7499_p6 }
 0x101   : > { %p6915_p3 = por %p6914_p2, %p6913_p11 }
 0x102   : > { %p6909_p10 = pneg %p6908_p9 }
 0x104   : > { %p6916_p12 = pnand %p6915_p3, %p6909_p10 }
 0x106   : > { %6919 = shalt.err (!%p6916_p12)
}
 0x107   : > { %6058 = dma.hbm_to_vmem [thread:$0]  (!%p7489_p5), %s7311_s14, 16, %s1073_s18, [#allocation11]  }
 0x108   : > { %s6931_s16 = scalar_lea.vmem %s1095_s8, 16  ;;  %s6938_s10 = scalar_lea.vmem %s1095_s8, 32 }
 0x109   : > { %p6932_p13 = scmp.ne.s32.totalorder %s1095_s8, %s6931_s16  ;;  %p6939_p7 = scmp.lt.s32.totalorder %s1095_s8, %s1095_s8 }
 0x10a   : > { %p6940_p4 = scmp.lt.s32.totalorder %s6938_s10, %s6931_s16 }
 0x10b   : > { %p6934_p0 = pnand %p6932_p13, %p7499_p6 }
 0x10c   : > { %p6941_p8 = por %p6940_p4, %p6939_p7 }
 0x10d   : > { %p6935_p1 = pneg %p6934_p0 }
 0x10f   : > { %p6942_p9 = pnand %p6941_p8, %p6935_p1 }
 0x111   : > { %6945 = shalt.err (!%p6942_p9)
}
 0x112   : > { %s8057_s1 = sld [smem:[#allocation52_spill]]  ;;  %s7247_s6 = smov [#allocation18]  }
 0x113   : > { %s1116_s22 = sshll.u32 %s7247_s6, 4  ;;  %s7248_s4 = smov [#allocation21]   ;;  %s1117_s22 = int_to_ptr.vmem [resolvable:$true] %s1116_s22 }
 0x114   : > { %s1138_s18 = sshll.u32 %s7248_s4, 4  ;;  %s6957_s0 = scalar_lea.vmem %s1117_s22, 16  ;;  %s1139_s18 = int_to_ptr.vmem [resolvable:$true] %s1138_s18 }
 0x115   : > { %p6958_p10 = scmp.ne.s32.totalorder %s1117_s22, %s6957_s0  ;;  %s6964_s16 = scalar_lea.vmem %s1117_s22, 32 }
 0x116   : > { %p6965_p3 = scmp.lt.s32.totalorder %s1117_s22, %s1117_s22  ;;  %p6966_p12 = scmp.lt.s32.totalorder %s6964_s16, %s6957_s0 }
 0x117   : > { %p6960_p11 = pnand %p6958_p10, %p7499_p6 }
 0x118   : > { %6064 = dma.hbm_to_vmem [thread:$0]  (!%p7489_p5), %s8057_s1, 16, %s1095_s8, [#allocation14]  }
 0x119   : > { %p6961_p2 = pneg %p6960_p11  ;;  %p6967_p13 = por %p6966_p12, %p6965_p3 }
 0x11b   : > { %p6968_p0 = pnand %p6967_p13, %p6961_p2 }
 0x11d   : > { %6971 = shalt.err (!%p6968_p0)
}
 0x11e   : > { %s8058_s8 = sld [smem:[#allocation53_spill]]  ;;  %s6983_s10 = scalar_lea.vmem %s1139_s18, 16 }
 0x11f   : > { %p6984_p1 = scmp.ne.s32.totalorder %s1139_s18, %s6983_s10  ;;  %s6990_s1 = scalar_lea.vmem %s1139_s18, 32 }
 0x120   : > { %p6991_p8 = scmp.lt.s32.totalorder %s1139_s18, %s1139_s18  ;;  %p6992_p9 = scmp.lt.s32.totalorder %s6990_s1, %s6983_s10 }
 0x121   : > { %p6986_p7 = pnand %p6984_p1, %p7499_p6 }
 0x122   : > { %p6993_p10 = por %p6992_p9, %p6991_p8 }
 0x123   : > { %p6987_p4 = pneg %p6986_p7 }
 0x124   : > { %6070 = dma.hbm_to_vmem [thread:$0]  (!%p7489_p5), %s8058_s8, 16, %s1117_s22, [#allocation17]  }
 0x125   : > { %p6994_p11 = pnand %p6993_p10, %p6987_p4 }
 0x127   : > { %6997 = shalt.err (!%p6994_p11)
}
 0x128   : > { %s8059_s6 = sld [smem:[#allocation54_spill]]  ;;  %s7249_s4 = smov [#allocation24]  }
 0x129   : > { %s1162_s0 = sshll.u32 %s7249_s4, 4  ;;  %s7250_s16 = smov [#allocation27]   ;;  %s1163_s0 = int_to_ptr.vmem [resolvable:$true] %s1162_s0 }
 0x12a   : > { %s1192_s22 = sshll.u32 %s7250_s16, 4  ;;  %s7009_s8 = scalar_lea.vmem %s1163_s0, 1024  ;;  %s1193_s22 = int_to_ptr.vmem [resolvable:$true] %s1192_s22 }
 0x12b   : > { %p7010_p2 = scmp.ne.s32.totalorder %s1163_s0, %s7009_s8  ;;  %p7017_p13 = scmp.lt.s32.totalorder %s1163_s0, %s1163_s0 }
 0x12c   : > { %p7018_p0 = scmp.lt.s32.totalorder %s7009_s8, %s7009_s8 }
 0x12d   : > { %p7012_p3 = pnand %p7010_p2, %p7499_p6 }
 0x12e   : > { %6076 = dma.hbm_to_vmem [thread:$0]  (!%p7489_p5), %s8059_s6, 16, %s1139_s18, [#allocation20]  }
 0x12f   : > { %p7013_p12 = pneg %p7012_p3  ;;  %p7019_p1 = por %p7018_p0, %p7017_p13 }
 0x131   : > { %p7020_p7 = pnand %p7019_p1, %p7013_p12 }
 0x133   : > { %7023 = shalt.err (!%p7020_p7)
}
 0x134   : > { %s8060_s18 = sld [smem:[#allocation57_spill]]  ;;  %s7035_s10 = scalar_lea.vmem %s1193_s22, 16 }
 0x135   : > { %p7036_p4 = scmp.ne.s32.totalorder %s1193_s22, %s7035_s10  ;;  %s7042_s1 = scalar_lea.vmem %s1193_s22, 32 }
 0x136   : > { %p7043_p10 = scmp.lt.s32.totalorder %s1193_s22, %s1193_s22  ;;  %p7044_p11 = scmp.lt.s32.totalorder %s7042_s1, %s7035_s10 }
 0x137   : > { %p7038_p8 = pnand %p7036_p4, %p7499_p6 }
 0x138   : > { %p7045_p2 = por %p7044_p11, %p7043_p10 }
 0x139   : > { %p7039_p9 = pneg %p7038_p8 }
 0x13a   : > { %6082 = dma.hbm_to_vmem [thread:$0]  (!%p7489_p5), %s8060_s18, 1024, %s1163_s0, [#allocation23], %s8055_s11, %s8055_s11, %s8054_s23  }
 0x13b   : > { %p7046_p3 = pnand %p7045_p2, %p7039_p9 }
 0x13d   : > { %7049 = shalt.err (!%p7046_p3)
}
 0x13e   : > { %s8061_s6 = sld [smem:[#allocation59_spill]]  ;;  %s7251_s4 = smov [#allocation30]  }
 0x13f   : > { %s1218_s16 = sshll.u32 %s7251_s4, 4  ;;  %s7252_s8 = smov [#allocation33]   ;;  %s1219_s16 = int_to_ptr.vmem [resolvable:$true] %s1218_s16 }
 0x140   : > { %s1250_s0 = sshll.u32 %s7252_s8, 4  ;;  %s7061_s18 = scalar_lea.vmem %s1219_s16, 1024  ;;  %s1251_s0 = int_to_ptr.vmem [resolvable:$true] %s1250_s0 }
 0x141   : > { %p7062_p12 = scmp.ne.s32.totalorder %s1219_s16, %s7061_s18  ;;  %p7069_p1 = scmp.lt.s32.totalorder %s1219_s16, %s1219_s16 }
 0x142   : > { %p7070_p7 = scmp.lt.s32.totalorder %s7061_s18, %s7061_s18 }
 0x143   : > { %p7064_p13 = pnand %p7062_p12, %p7499_p6 }
 0x144   : > { %6088 = dma.hbm_to_vmem [thread:$0]  (!%p7489_p5), %s8061_s6, 16, %s1193_s22, [#allocation26]  }
 0x145   : > { %p7065_p0 = pneg %p7064_p13  ;;  %p7071_p4 = por %p7070_p7, %p7069_p1 }
 0x147   : > { %p7072_p8 = pnand %p7071_p4, %p7065_p0 }
 0x149   : > { %7075 = shalt.err (!%p7072_p8)
}
 0x14a   : > { %s8062_s22 = sld [smem:[#allocation61_spill]]  ;;  %s7087_s10 = scalar_lea.vmem %s1251_s0, 4096 }
 0x14b   : > { %p7088_p9 = scmp.ne.s32.totalorder %s1251_s0, %s7087_s10  ;;  %p7095_p2 = scmp.lt.s32.totalorder %s1251_s0, %s1251_s0 }
 0x14c   : > { %p7096_p3 = scmp.lt.s32.totalorder %s7087_s10, %s7087_s10 }
 0x14d   : > { %p7090_p10 = pnand %p7088_p9, %p7499_p6 }
 0x14e   : > { %p7097_p12 = por %p7096_p3, %p7095_p2 }
 0x14f   : > { %p7091_p11 = pneg %p7090_p10 }
 0x150   : > { %6094 = dma.hbm_to_vmem [thread:$0]  (!%p7489_p5), %s8062_s22, 1024, %s1219_s16, [#allocation29], %s8055_s11, %s8055_s11, %s8054_s23  }
 0x151   : > { %p7098_p13 = pnand %p7097_p12, %p7091_p11 }
 0x153   : > { %7101 = shalt.err (!%p7098_p13)
}
 0x154   : > { %s8063_s1 = sld [smem:[#allocation65_spill]]  ;;  %s7253_s6 = smov [#allocation34]  }
 0x155   : > { %s1290_s4 = sshll.u32 %s7253_s6, 4  ;;  %s1291_s4 = int_to_ptr.vmem [resolvable:$true] %s1290_s4 }
 0x156   : > { %s7113_s16 = scalar_lea.vmem %s1291_s4, 1024  ;;  %p7121_p4 = scmp.lt.s32.totalorder %s1291_s4, %s1291_s4 }
 0x157   : > { %p7114_p0 = scmp.ne.s32.totalorder %s1291_s4, %s7113_s16  ;;  %p7122_p8 = scmp.lt.s32.totalorder %s7113_s16, %s7113_s16 }
 0x159   : > { %p7116_p1 = pnand %p7114_p0, %p7499_p6  ;;  %p7123_p9 = por %p7122_p8, %p7121_p4 }
 0x15a   : > { %6100 = dma.hbm_to_vmem [thread:$0]  (!%p7489_p5), %s8063_s1, 4096, %s1251_s0, [#allocation32], %s8055_s11, %s8055_s11, %s8054_s23  }
 0x15b   : > { %p7117_p7 = pneg %p7116_p1 }
 0x15d   : > { %p7124_p10 = pnand %p7123_p9, %p7117_p7 }
 0x15f   : > { %7127 = shalt.err (!%p7124_p10)
}
 0x160   : > { %6103 = dma.hbm_to_vmem [thread:$0]  (!%p7489_p5), %s7456_s24, 1024, %s1291_s4, [#allocation35], %s8055_s11, %s8055_s11, %s8054_s23  }
 0x161   : > { %p8064_p11 = scmp.ne.s32.totalorder %s8049_s7, 0 }
 0x162   : > { %p8065_p2 = scmp.eq.s32.totalorder (!%p8064_p11), %s7474_s2, 0 }
 0x163   : > { %1323 = sbr.rel (%p8064_p11) target bundleno = 7614 (0x1dbe), region = 180 }
 0x168   : > { %7133 = dma.done.wait (%p8065_p2), [#allocation3], 3072   ;;  %p8066_p6 = pmov %p8065_p2 }
 0x169   : > { %p8067_p3 = pmov %p8065_p2 }
 0x16a   : > { %7135 = vsyncadd (%p8066_p6), [#allocation3], 4294964224 }
 0x16b   : > { %7137 = dma.done.wait (%p8067_p3), [#allocation5], 1072   ;;  %p8068_p12 = pmov %p8065_p2 }
 0x16c   : > { %p8069_p13 = pmov %p8065_p2 }
 0x16d   : > { %7139 = vsyncadd (%p8068_p12), [#allocation5], 4294966224 }
 0x16e   : > { %7141 = dma.done.wait (%p8069_p13), [#allocation8], 80   ;;  %p8070_p5 = pmov %p8065_p2 }
 0x16f   : > { %p8071_p0 = pmov %p8065_p2 }
 0x170   : > { %7143 = vsyncadd (%p8070_p5), [#allocation8], 4294967216 }
 0x171   : > { %7145 = dma.done.wait (%p8071_p0), [#allocation11], 4112   ;;  %p8072_p1 = pmov %p8071_p0 }
 0x172   : > { %p8073_p7 = pmov %p8071_p0 }
 0x173   : > { %7147 = vsyncadd (%p8072_p1), [#allocation11], 4294963184 }
 0x174   : > { %7149 = dma.done.wait (%p8073_p7), [#allocation14], 32   ;;  %p8074_p4 = pmov %p8071_p0 }
 0x175   : > { %p8075_p8 = pmov %p8071_p0 }
 0x176   : > { %7151 = vsyncadd (%p8074_p4), [#allocation14], 4294967264 }
 0x177   : > { %7153 = dma.done.wait (%p8075_p8), [#allocation17], 32   ;;  %p8076_p9 = pmov %p8071_p0 }
 0x178   : > { %p8077_p10 = pmov %p8071_p0 }
 0x179   : > { %7155 = vsyncadd (%p8076_p9), [#allocation17], 4294967264 }
 0x17a   : > { %7157 = dma.done.wait (%p8077_p10), [#allocation20], 32   ;;  %p8078_p11 = pmov %p8071_p0 }
 0x17b   : > { %p8079_p2 = pmov %p8071_p0 }
 0x17c   : > { %7159 = vsyncadd (%p8078_p11), [#allocation20], 4294967264 }
 0x17d   : > { %7161 = dma.done.wait (%p8079_p2), [#allocation23], 1072   ;;  %p8080_p6 = pmov %p8071_p0 }
 0x17e   : > { %p8081_p3 = pmov %p8071_p0 }
 0x17f   : > { %7163 = vsyncadd (%p8080_p6), [#allocation23], 4294966224 }
 0x180   : > { %7165 = dma.done.wait (%p8081_p3), [#allocation26], 1040   ;;  %p8082_p12 = pmov %p8071_p0 }
 0x181   : > { %p8083_p13 = pmov %p8071_p0 }
 0x182   : > { %7167 = vsyncadd (%p8082_p12), [#allocation26], 4294966256 }
 0x183   : > { %7169 = dma.done.wait (%p8083_p13), [#allocation29], 3072   ;;  %p8084_p5 = pmov %p8071_p0 }
 0x185   : > { %7171 = vsyncadd (%p8084_p5), [#allocation29], 4294964224 }
 0x186   : > { %7173 = dma.done.wait (%p8071_p0), [#allocation32], 8192   ;;  %p8085_p1 = pmov %p8071_p0 }
 0x187   : > { %p8086_p7 = pmov %p8071_p0 }
 0x188   : > { %7175 = vsyncadd (%p8085_p1), [#allocation32], 4294959104 }
 0x189   : > { %7177 = dma.done.wait (%p8086_p7), [#allocation35], 1024   ;;  %p8087_p4 = pmov %p8071_p0 }
 0x18a   : > { %v7254_v0 = vmov 0   ;;  %v6230_v1 = vld [vmem:[#allocation2 + $0xac] ss:$12 sps:$4 sm:$0xff]   ;;  %v6232_v2 = vld [vmem:[#allocation2 + $0xa8] ss:$12 sps:$4 sm:$0xff]   ;;  %p1507_p8 = scmp.lt.s32.totalorder %s7474_s2, 1  ;;  %v1557_v20 = vlaneseq }
 0x18b   : > { %7179 = vsyncadd (%p8087_p4), [#allocation35], 4294966272  ;;  %1732 = vmatprep.mubr.bf16.mxu0 %v7254_v0  ;;  %1700 = vmatprep.subr.bf16.mxu0 %v6230_v1  ;;  %v6233_v3 = vld [vmem:[#allocation2 + $0x94] ss:$12 sps:$4 sm:$0xff]   ;;  %v6235_v4 = vld [vmem:[#allocation2 + $0x90] ss:$12 sps:$4 sm:$0xff]  }
 0x18c   : > { %1701 = vmatpush1.bf16.msra.mxu0 %v6232_v2  ;;  %v6236_v5 = vld [vmem:[#allocation2 + $0x7c] ss:$12 sps:$4 sm:$0xff]   ;;  %s8105_s2 = smov (!%p1507_p8, %s7474_s2), 1  ;;  %v6238_v6 = vld [vmem:[#allocation2 + $0x78] ss:$12 sps:$4 sm:$0xff]   ;;  %s8088_s7 = sld [smem:[#allocation48_spill]] }
 0x18d   : > { %1702 = vmatprep.subr.bf16.mxu0 %v6233_v3  ;;  %v6239_v7 = vld [vmem:[#allocation2 + $0x64] ss:$12 sps:$4 sm:$0xff]   ;;  %v6241_v8 = vld [vmem:[#allocation2 + $0x60] ss:$12 sps:$4 sm:$0xff]   ;;  %s7699_s15 = sshll.u32 %s8105_s2, 3  ;;  %v7255_v19 = vmov 0.0  }
 0x18e   : > { %v6242_v9 = vld [vmem:[#allocation2 + $0x4c] ss:$12 sps:$4 sm:$0xff]   ;;  %v6244_v10 = vld [vmem:[#allocation2 + $0x48] ss:$12 sps:$4 sm:$0xff]   ;;  %v6247_v12 = vld [vmem:[#allocation2 + $0x30] ss:$12 sps:$4 sm:$0xff]   ;;  %5737 = vmatprep.subr.bf16.mxu1 %v7255_v19 }
 0x18f   : > { %v6245_v11 = vld [vmem:[#allocation2 + $0x34] ss:$12 sps:$4 sm:$0xff]   ;;  %v6248_v13 = vld [vmem:[#allocation2 + $0x1c] ss:$12 sps:$4 sm:$0xff]   ;;  %v6250_v14 = vld [vmem:[#allocation2 + $0x18] ss:$12 sps:$4 sm:$0xff]  }
 0x190   : > { %1703 = vmatpush1.bf16.msra.mxu0 %v6235_v4  ;;  %v6251_v15 = vld [vmem:[#allocation2 + $0x4] ss:$12 sps:$4 sm:$0xff]   ;;  %v6253_v16 = vld [vmem:[#allocation2] ss:$12 sps:$4 sm:$0xff]   ;;  %vm7256_vm0 = vmmov 0   ;;  %v7713_v21 = vshrl.u32 %v1557_v20, 7 }
 0x191   : > { %1704 = vmatprep.subr.bf16.mxu0 %v6236_v5  ;;  %5753 = vmatprep.mubr.msk.bf16.mxu1 %vm7256_vm0, %v7255_v19  ;;  %v7721_v24 = vld [vmem:[#allocation4] sm:$0x7]  ;;  %vm1783_vm1 = vcmask 523264   ;;  %s7257_s2 = smov 64   ;;  %v6254_v36 = vld [vmem:[#allocation2 + $0xb0] ss:$12 sps:$4 sm:$0xff]  }
 0x192   : > { %s1510_s26 = scalar_lea.vmem %s8088_s7, %s7699_s15  ;;  %v7716_v22 = vsub.s32 1, %v7713_v21  ;;  %v7719_v23 = vsub.s32 0, %v7713_v21  ;;  %5738 = vmatpush3.bf16.msra.mxu1 %v6254_v36  ;;  %v6255_v37 = vld [vmem:[#allocation2 + $0x98] ss:$12 sps:$4 sm:$0xff]   ;;  %v6256_v38 = vld [vmem:[#allocation2 + $0x80] ss:$12 sps:$4 sm:$0xff]  }
 0x193   : > { %v7703_v17 = vld [vmem:[%s1510_s26] sm:$0xff]  ;;  %5739 = vmatprep.subr.bf16.mxu1 %v7255_v19  ;;  %v6257_v39 = vld [vmem:[#allocation2 + $0x68] ss:$12 sps:$4 sm:$0xff]   ;;  %v6258_v40 = vld [vmem:[#allocation2 + $0x50] ss:$12 sps:$4 sm:$0xff]   ;;  %vm1831_vm2 = vcmask 64512  }
 0x194   : > { %1705 = vmatpush1.bf16.msra.mxu0 %v6238_v6  ;;  %v1522_v18 = vpack.c.bf16 %v7703_v17, %v7703_v17  ;;  %v1564_v25 = vrot.slane %v7721_v24, %v7716_v22  ;;  %v1560_v27 = vrot.slane %v7721_v24, %v7719_v23  ;;  %v6259_v41 = vld [vmem:[#allocation2 + $0x38] ss:$12 sps:$4 sm:$0xff]   ;;  %v6260_v42 = vld [vmem:[#allocation2 + $0x20] ss:$12 sps:$4 sm:$0xff]   ;;  %v6261_v43 = vld [vmem:[#allocation2 + $0x8] ss:$12 sps:$4 sm:$0xff]  }
 0x195   : > { %1706 = vmatprep.subr.bf16.mxu0 %v6239_v7  ;;  %v7752_v62 = vsub.s32 2, %v7713_v21  ;;  %vm1848_vm3 = vcmask 1043456   ;;  %s8089_s23 = sld [smem:[#allocation50_spill]] }
 0x196   : > { %5740 = vmatpush3.bf16.msra.mxu1 %v6255_v37  ;;  %s8090_s11 = sld [smem:[#allocation55_spill]] }
 0x197   : > { %5741 = vmatprep.subr.bf16.mxu1 %v7255_v19  ;;  %v1568_v1 = vrot.slane %v7721_v24, %v7752_v62  ;;  %s8091_s8 = sld [smem:[#allocation49_spill]] }
 0x198   : > { %1707 = vmatpush1.bf16.msra.mxu0 %v6241_v8  ;;  %s8092_s18 = sld [smem:[#allocation58_spill]] }
 0x199   : > { %1708 = vmatprep.subr.bf16.mxu0 %v6242_v9  ;;  %s8093_s22 = sld [smem:[#allocation67_spill]] }
 0x19a   : > { %5742 = vmatpush3.bf16.msra.mxu1 %v6256_v38  ;;  %v6266_v38 = vld [vmem:[#allocation6 + $0x18] sm:$0xff]   ;;  %s8094_s10 = sld [smem:[#allocation68_spill]] }
 0x19b   : > { %5743 = vmatprep.subr.bf16.mxu1 %v7255_v19  ;;  %s8095_s1 = sld [smem:[#allocation60_spill]] }
 0x19c   : > { %1709 = vmatpush1.bf16.msra.mxu0 %v6244_v10  ;;  %s8096_s6 = sld [smem:[#allocation62_spill]] }
 0x19d   : > { %1710 = vmatprep.subr.bf16.mxu0 %v6245_v11  ;;  %s1514_s0 = scalar_lea.vmem %s8091_s8, %s7699_s15  ;;  %s8097_s4 = sld [smem:[#allocation69_spill]] }
 0x19e   : > { %5744 = vmatpush3.bf16.msra.mxu1 %v6257_v39  ;;  %v6267_v39 = vld [vmem:[#allocation6 + $0x10] sm:$0xff]   ;;  %s8098_s16 = sld [smem:[#allocation70_spill]] }
 0x19f   : > { %5745 = vmatprep.subr.bf16.mxu1 %v7255_v19  ;;  %s8099_s7 = sld [smem:[#allocation64_spill]] }
 0x1a0   : > { %1711 = vmatpush1.bf16.msra.mxu0 %v6247_v12  ;;  %s8100_s26 = sld [smem:[#allocation66_spill]] }
 0x1a1   : > { %1712 = vmatprep.subr.bf16.mxu0 %v6248_v13  ;;  %s8102_s8 = sld [smem:[#allocation72_spill]] }
 0x1a2   : > { %5746 = vmatpush3.bf16.msra.mxu1 %v6258_v40  ;;  %v6268_v40 = vld [vmem:[#allocation6 + $0x8] sm:$0xff]  }
 0x1a3   : > { %5747 = vmatprep.subr.bf16.mxu1 %v7255_v19 }
 0x1a4   : > { %1713 = vmatpush1.bf16.msra.mxu0 %v6250_v14 }
 0x1a5   : > { %1714 = vmatprep.subr.bf16.mxu0 %v6251_v15 }
 0x1a6   : > { %5748 = vmatpush3.bf16.msra.mxu1 %v6259_v41  ;;  %v6269_v41 = vld [vmem:[#allocation6] sm:$0xff]  }
 0x1a7   : > { %5749 = vmatprep.subr.bf16.mxu1 %v7255_v19 }
 0x1a8   : > { %1715 = vmatpush1.bf16.msra.mxu0 %v6253_v16 }
 0x1a9   : > { %5757 = vmatprep.subr.bf16.mxu0 %v7255_v19 }
 0x1aa   : > { %5750 = vmatpush3.bf16.msra.mxu1 %v6260_v42 }
 0x1ab   : > { %1733 = vmatmul.mubr.bf16.vlgmr.msra.gmra.mxu0 %v1522_v18  ;;  %5751 = vmatprep.subr.bf16.mxu1 %v7255_v19 }
 0x1ac   : > { %5759 = vmatprep.mubr.msk.bf16.mxu0 %vm7256_vm0, %v7255_v19 }
 0x1ae   : > { %5752 = vmatpush3.bf16.msra.mxu1 %v6261_v43 }
 0x1af   : > { %5763 = vmatprep.subr.bf16.mxu1 %v7255_v19 }
 0x1b1   : > { %5754 = vmatmul.mubr.bf16.vlgmr.msra.gmra.mxu1 %v1522_v18 }
 0x1b2   : > { %5765 = vmatprep.mubr.msk.bf16.mxu1 %vm7256_vm0, %v7255_v19 }
 0x26b   : > { %v1734_v26 = vpop.f32.mrf.mxu0 }
 0x26c   : > { %v1735_v31 = vadd.f32 %v1734_v26, %v1560_v27 }
 0x26d   : > { %v1736_v28 = vpop.f32.mrf.mxu0 }
 0x26e   : > { %v1737_v29 = vadd.f32 %v1736_v28, %v1564_v25  ;;  %v1781_v35 = vpack.c.bf16 %v1735_v31, %v1735_v31  ;;  %v6263_v31 = vld [vmem:[#allocation6 + $0x30] sm:$0xff]  }
 0x26f   : > { %v1738_v30 = vpop.f32.mrf.mxu0 }
 0x270   : > { %v1782_v32 = vpack.c.bf16 %v1737_v29, %v1737_v29  ;;  %v6262_v30 = vld [vmem:[#allocation6 + $0x38] sm:$0xff]  }
 0x271   : > { %v1739_v33 = vpop.f32.mrf.mxu0  ;;  %v1775_v63 = vpop.f32.mrf.mxu1 }
 0x272   : > { %v1788_v34 = vsel %vm1783_vm1, %v1782_v32, 0  ;;  %1896 = vrot.lane.b32.xlu0 %v1782_v32, %s7257_s2  ;;  %v1776_v3 = vadd.f32 %v1775_v63, %v1568_v1  ;;  %v6264_v32 = vld [vmem:[#allocation6 + $0x28] sm:$0xff]  }
 0x273   : > { %5758 = vmatpush3.bf16.xpose.msra.mxu0 %v1788_v34  ;;  %v5755_v2 = vpop.f32.mrf.mxu1  ;;  %v6276_v63 = vld [vmem:[%s8089_s23 + $0xc0] ss:$16 sps:$4 sm:$0xff]  }
 0x274   : > { %5769 = vmatprep.subr.bf16.mxu0 %v7255_v19  ;;  %v1844_v5 = vpack.c.bf16 %v1776_v3, %v1776_v3 }
 0x275   : > { %v1778_v4 = vpop.f32.mrf.mxu1 }
 0x276   : > { %1893 = vrot.lane.b32.xlu0 %v1781_v35, %s7257_s2  ;;  %v1850_v7 = vsel %vm1848_vm3, %v1844_v5, 0 }
 0x277   : > { %v5756_v6 = vpop.f32.mrf.mxu1  ;;  %5764 = vmatpush3.bf16.msra.mxu1 %v1850_v7  ;;  %v6282_v7 = vld [vmem:[%s8089_s23 + $0xa0] ss:$16 sps:$4 sm:$0xff]  }
 0x278   : > { %5775 = vmatprep.subr.bf16.mxu1 %v7255_v19  ;;  %v6287_v6 = vld [vmem:[%s8089_s23 + $0xac] ss:$16 sps:$4 sm:$0xff]  }
 0x27a   : > { %5760 = vmatmul.mubr.msk.bf16.vlgmr.msra.gmra.mxu0 %vm1783_vm1, %v1781_v35  ;;  %v6265_v35 = vld [vmem:[#allocation6 + $0x20] sm:$0xff]  }
 0x27b   : > { %5771 = vmatprep.mubr.msk.bf16.mxu0 %vm7256_vm0, %v7255_v19 }
 0x2e4   : > { %v1897_v44 = vpop.permute.xlu0 %1896 }
 0x2e5   : > { %v1902_v45 = vsel %vm1783_vm1, %v1897_v44, 0 }
 0x2e6   : > { %5770 = vmatpush3.bf16.xpose.msra.mxu0 %v1902_v45 }
 0x2e7   : > { %5781 = vmatprep.subr.bf16.mxu0 %v7255_v19 }
 0x2e8   : > { %v1894_v46 = vpop.permute.xlu0 %1893 }
 0x2ed   : > { %5772 = vmatmul.mubr.msk.bf16.vlgmr.msra.gmra.mxu0 %vm1783_vm1, %v1894_v46 }
 0x2ee   : > { %5797 = vmatprep.mubr.msk.bf16.mxu0 %vm7256_vm0, %v7255_v19  ;;  %5782 = vmatpush3.bf16.msra.mxu0 %v6262_v30  ;;  %v6314_v30 = vld [vmem:[%s8089_s23 + $0x4] ss:$16 sps:$4 sm:$0xff]  }
 0x2ef   : > { %5783 = vmatprep.subr.bf16.mxu0 %v7255_v19 }
 0x2f2   : > { %5784 = vmatpush3.bf16.msra.mxu0 %v6263_v31  ;;  %v6317_v31 = vld [vmem:[%s8089_s23 + $0xc] ss:$16 sps:$4 sm:$0xff]  }
 0x2f3   : > { %5785 = vmatprep.subr.bf16.mxu0 %v7255_v19 }
 0x2f6   : > { %5786 = vmatpush3.bf16.msra.mxu0 %v6264_v32  ;;  %v6312_v32 = vld [vmem:[%s8089_s23] ss:$16 sps:$4 sm:$0xff]  }
 0x2f7   : > { %5787 = vmatprep.subr.bf16.mxu0 %v7255_v19 }
 0x2fa   : > { %5788 = vmatpush3.bf16.msra.mxu0 %v6265_v35  ;;  %v6320_v35 = vld [vmem:[#allocation10 + $0xf8] sm:$0xff]  }
 0x2fb   : > { %5789 = vmatprep.subr.bf16.mxu0 %v7255_v19 }
 0x2fe   : > { %5790 = vmatpush3.bf16.msra.mxu0 %v6266_v38 }
 0x2ff   : > { %5791 = vmatprep.subr.bf16.mxu0 %v7255_v19 }
 0x302   : > { %5792 = vmatpush3.bf16.msra.mxu0 %v6267_v39 }
 0x303   : > { %5793 = vmatprep.subr.bf16.mxu0 %v7255_v19 }
 0x306   : > { %5794 = vmatpush3.bf16.msra.mxu0 %v6268_v40  ;;  %v5332_v40 = vld [vmem:[#allocation13] ss:$0 sm:$0xff] }
 0x307   : > { %5795 = vmatprep.subr.bf16.mxu0 %v7255_v19 }
 0x30a   : > { %5796 = vmatpush3.bf16.msra.mxu0 %v6269_v41 }
 0x33a   : > { %v1824_v47 = vpop.f32.mrf.mxu0 }
 0x33b   : > { %v1830_v48 = vmul.f32 0.125, %v1824_v47 }
 0x33c   : > { %v5761_v49 = vpop.f32.mrf.mxu0 }
 0x33d   : > { %v1832_v50 = vsel %vm1831_vm2, %v1830_v48, -inf  ;;  %v5323_v49 = vld [vmem:[#allocation7] ss:$0 sm:$0xff] }
 0x33e   : > { %1833 = vmax.xlane.f32.xlu1 %v1832_v50  ;;  %v1827_v51 = vpop.f32.mrf.mxu0 }
 0x340   : > { %v5762_v52 = vpop.f32.mrf.mxu0 }
 0x3ad   : > { %v1938_v53 = vpop.f32.mrf.mxu0 }
 0x3ae   : > { %v1944_v54 = vmul.f32 0.125, %v1938_v53 }
 0x3af   : > { %v5773_v55 = vpop.f32.mrf.mxu0 }
 0x3b0   : > { %v1945_v56 = vsel %vm1831_vm2, %v1944_v54, -inf }
 0x3b1   : > { %1946 = vmax.xlane.f32.xlu1 %v1945_v56  ;;  %v1941_v57 = vpop.f32.mrf.mxu0  ;;  %v6270_v56 = vld [vmem:[%s8089_s23 + $0xe0] ss:$16 sps:$4 sm:$0xff]  }
 0x3b2   : > { %v6272_v57 = vld [vmem:[%s8089_s23 + $0xe4] ss:$16 sps:$4 sm:$0xff]  }
 0x3b3   : > { %v5774_v58 = vpop.f32.mrf.mxu0 }
 0x3b4   : > { %v6273_v58 = vld [vmem:[%s8089_s23 + $0xe8] ss:$16 sps:$4 sm:$0xff]  }
 0x3c7   : > { %v1834_v59 = vpop.xlane.xlu1 %1833 }
 0x3c8   : > { %v1835_v60 = vsub.f32 %v1830_v48, %v1834_v59  ;;  %v6275_v59 = vld [vmem:[%s8089_s23 + $0xec] ss:$16 sps:$4 sm:$0xff]  }
 0x3c9   : > { %2408 = vmatprep.subr.bf16.mxu0 %v6275_v59  ;;  %v6333_v59 = vld [vmem:[#allocation10 + $0xa0] sm:$0xff]  }
 0x3ca   : > { %v1836_v61 = vmul.f32 1.442695, %v1835_v60  ;;  %v6278_v60 = vld [vmem:[%s8089_s23 + $0xc4] ss:$16 sps:$4 sm:$0xff]  }
 0x3cc   : > { %6518 = vpow2.f32 %v1836_v61  ;;  %v6281_v61 = vld [vmem:[%s8089_s23 + $0xcc] ss:$16 sps:$4 sm:$0xff]  }
 0x3d9   : > { %v6519_v8 = vpop.eup %6518 }
 0x3da   : > { %v1838_v9 = vsel %vm1831_vm2, %v6519_v8, 0.0 }
 0x3db   : > { %1839 = vadd.xlane.f32.xlu0 %v1838_v9  ;;  %v6288_v9 = vld [vmem:[%s8089_s23 + $0x80] ss:$16 sps:$4 sm:$0xff]  }
 0x43a   : > { %v1947_v10 = vpop.xlane.xlu1 %1946 }
 0x43b   : > { %v1948_v11 = vsub.f32 %v1944_v54, %v1947_v10  ;;  %v6290_v10 = vld [vmem:[%s8089_s23 + $0x84] ss:$16 sps:$4 sm:$0xff]  }
 0x43d   : > { %v1949_v12 = vmul.f32 1.442695, %v1948_v11  ;;  %v6291_v11 = vld [vmem:[%s8089_s23 + $0x88] ss:$16 sps:$4 sm:$0xff]  }
 0x43f   : > { %6520 = vpow2.f32 %v1949_v12  ;;  %v6293_v12 = vld [vmem:[%s8089_s23 + $0x8c] ss:$16 sps:$4 sm:$0xff]  }
 0x44c   : > { %v6521_v13 = vpop.eup %6520 }
 0x44d   : > { %v1951_v14 = vsel %vm1831_vm2, %v6521_v13, 0.0 }
 0x44e   : > { %1952 = vadd.xlane.f32.xlu1 %v1951_v14  ;;  %v6299_v14 = vld [vmem:[%s8089_s23 + $0x6c] ss:$16 sps:$4 sm:$0xff]  }
 0x45f   : > { %1958 = vrot.lane.b32.xlu1 %v1844_v5, %s7257_s2  ;;  %v6284_v5 = vld [vmem:[%s8089_s23 + $0xa4] ss:$16 sps:$4 sm:$0xff]  }
 0x464   : > { %v1840_v15 = vpop.xlane.xlu0 %1839 }
 0x465   : > { %6522 = vrcp.f32 %v1840_v15  ;;  %v6294_v15 = vld [vmem:[%s8089_s23 + $0x60] ss:$16 sps:$4 sm:$0xff]  }
 0x472   : > { %v6523_v16 = vpop.eup %6522 }
 0x473   : > { %v1842_v18 = vmul.f32 %v6523_v16, %v6519_v8  ;;  %v6285_v8 = vld [vmem:[%s8089_s23 + $0xa8] ss:$16 sps:$4 sm:$0xff]  }
 0x474   : > { %v6297_v16 = vld [vmem:[%s8089_s23 + $0x68] ss:$16 sps:$4 sm:$0xff]  }
 0x475   : > { %v1843_v20 = vpack.c.bf16 %v1842_v18, %v1842_v18  ;;  %v6302_v18 = vld [vmem:[%s8089_s23 + $0x44] ss:$16 sps:$4 sm:$0xff]  }
 0x477   : > { %5766 = vmatmul.mubr.msk.bf16.vlgmr.msra.gmra.mxu1 %vm1831_vm2, %v1843_v20  ;;  %v6305_v20 = vld [vmem:[%s8089_s23 + $0x4c] ss:$16 sps:$4 sm:$0xff]  }
 0x478   : > { %5777 = vmatprep.mubr.msk.bf16.mxu1 %vm7256_vm0, %v7255_v19 }
 0x4d7   : > { %v1953_v24 = vpop.xlane.xlu1 %1952 }
 0x4d8   : > { %6524 = vrcp.f32 %v1953_v24  ;;  %v6300_v24 = vld [vmem:[%s8089_s23 + $0x40] ss:$16 sps:$4 sm:$0xff]  }
 0x4db   : > { %v1959_v25 = vpop.permute.xlu1 %1958 }
 0x4dc   : > { %v1964_v26 = vsel %vm1848_vm3, %v1959_v25, 0  ;;  %v6303_v25 = vld [vmem:[%s8089_s23 + $0x48] ss:$16 sps:$4 sm:$0xff]  }
 0x4dd   : > { %5776 = vmatpush3.bf16.msra.mxu1 %v1964_v26  ;;  %v6308_v26 = vld [vmem:[%s8089_s23 + $0x24] ss:$16 sps:$4 sm:$0xff]  }
 0x4de   : > { %2367 = vmatprep.subr.bf16.mxu1 %v6272_v57  ;;  %v6332_v57 = vld [vmem:[#allocation10 + $0xe0] sm:$0xff]  }
 0x4e5   : > { %v6525_v27 = vpop.eup %6524 }
 0x4e6   : > { %v1955_v28 = vmul.f32 %v6525_v27, %v6521_v13  ;;  %v6296_v13 = vld [vmem:[%s8089_s23 + $0x64] ss:$16 sps:$4 sm:$0xff]   ;;  %v6311_v27 = vld [vmem:[%s8089_s23 + $0x2c] ss:$16 sps:$4 sm:$0xff]  }
 0x4e8   : > { %v1956_v29 = vpack.c.bf16 %v1955_v28, %v1955_v28  ;;  %v6306_v28 = vld [vmem:[%s8089_s23 + $0x20] ss:$16 sps:$4 sm:$0xff]  }
 0x4ea   : > { %5778 = vmatmul.mubr.msk.bf16.vlgmr.msra.gmra.mxu1 %vm1831_vm2, %v1956_v29  ;;  %v6309_v29 = vld [vmem:[%s8089_s23 + $0x28] ss:$16 sps:$4 sm:$0xff]  }
 0x4eb   : > { %2399 = vmatprep.mubr.bf16.mxu1 %v7254_v0  ;;  %2368 = vmatpush1.bf16.msra.mxu1 %v6270_v56  ;;  %v6330_v56 = vld [vmem:[#allocation10 + $0x60] sm:$0xff]  }
 0x4ec   : > { %2369 = vmatprep.subr.bf16.mxu1 %v6278_v60  ;;  %v6334_v60 = vld [vmem:[#allocation10 + $0x58] sm:$0xff]  }
 0x4ef   : > { %2370 = vmatpush1.bf16.msra.mxu1 %v6276_v63  ;;  %v6335_v63 = vld [vmem:[#allocation10 + $0x18] sm:$0xff]  }
 0x4f0   : > { %2371 = vmatprep.subr.bf16.mxu1 %v6284_v5  ;;  %v6342_v5 = vld [vmem:[#allocation10 + $0x48] sm:$0xff]  }
 0x4f3   : > { %2372 = vmatpush1.bf16.msra.mxu1 %v6282_v7  ;;  %v6344_v7 = vld [vmem:[#allocation10 + $0xc8] sm:$0xff]  }
 0x4f4   : > { %2373 = vmatprep.subr.bf16.mxu1 %v6290_v10  ;;  %v6347_v10 = vld [vmem:[#allocation10] sm:$0xff]  }
 0x4f7   : > { %2374 = vmatpush1.bf16.msra.mxu1 %v6288_v9  ;;  %v6346_v9 = vld [vmem:[#allocation10 + $0x40] sm:$0xff]  }
 0x4f8   : > { %2375 = vmatprep.subr.bf16.mxu1 %v6296_v13  ;;  %v6352_v13 = vld [vmem:[%s8090_s11 + $0xac] ss:$12 sps:$4 sm:$0xff]  }
 0x4fb   : > { %2376 = vmatpush1.bf16.msra.mxu1 %v6294_v15  ;;  %v2201_v15 = vsub.s32 3, %v7713_v21 }
 0x4fc   : > { %2377 = vmatprep.subr.bf16.mxu1 %v6302_v18 }
 0x4ff   : > { %2378 = vmatpush1.bf16.msra.mxu1 %v6300_v24 }
 0x500   : > { %2379 = vmatprep.subr.bf16.mxu1 %v6308_v26 }
 0x503   : > { %2380 = vmatpush1.bf16.msra.mxu1 %v6306_v28 }
 0x504   : > { %2381 = vmatprep.subr.bf16.mxu1 %v6314_v30 }
 0x507   : > { %2382 = vmatpush1.bf16.msra.mxu1 %v6312_v32 }
 0x537   : > { %v1886_v33 = vpop.f32.mrf.mxu1 }
 0x539   : > { %v5767_v34 = vpop.f32.mrf.mxu1 }
 0x53a   : > { %v6318_v34 = vld [vmem:[#allocation10 + $0x78] sm:$0xff]  }
 0x53b   : > { %v1889_v36 = vpop.f32.mrf.mxu1  ;;  %5588 = vmatprep.subr.bf16.mxu1 %v6318_v34 }
 0x53d   : > { %v5768_v37 = vpop.f32.mrf.mxu1 }
 0x5aa   : > { %v2000_v42 = vpop.f32.mrf.mxu1 }
 0x5ab   : > { %2007 = vrot.lane.b32.xlu1 %v2000_v42, %s7257_s2  ;;  %v5333_v42 = vld [vmem:[#allocation15] ss:$0 sm:$0xff] }
 0x5ac   : > { %v5779_v43 = vpop.f32.mrf.mxu1 }
 0x5ae   : > { %v2003_v44 = vpop.f32.mrf.mxu1 }
 0x5b0   : > { %v5780_v45 = vpop.f32.mrf.mxu1 }
 0x5b1   : > { %v6319_v45 = vld [vmem:[#allocation10 + $0x38] sm:$0xff]  }
 0x61d   : > { %v2008_v46 = vpop.permute.xlu1 %2007 }
 0x61e   : > { %v2010_v47 = vsel %vm1783_vm1, %v1886_v33, %v2008_v46  ;;  %v6315_v33 = vld [vmem:[%s8089_s23 + $0x8] ss:$16 sps:$4 sm:$0xff]  }
 0x61f   : > { %v2011_v48 = vpack.c.bf16 %v2010_v47, %v2010_v47  ;;  %v6321_v46 = vld [vmem:[#allocation10 + $0xb8] sm:$0xff]  }
 0x621   : > { %5798 = vmatmul.mubr.bf16.vlgmr.msra.gmra.mxu0 %v2011_v48  ;;  %v6322_v48 = vld [vmem:[#allocation10 + $0x70] sm:$0xff]  }
 0x622   : > { %2440 = vmatprep.mubr.bf16.mxu0 %v7254_v0  ;;  %2409 = vmatpush1.bf16.msra.mxu0 %v6273_v58  ;;  %v6331_v58 = vld [vmem:[#allocation10 + $0x20] sm:$0xff]  }
 0x623   : > { %2410 = vmatprep.subr.bf16.mxu0 %v6281_v61  ;;  %v6336_v61 = vld [vmem:[#allocation10 + $0xd8] sm:$0xff]  }
 0x6e1   : > { %v2117_v50 = vpop.f32.mrf.mxu0 }
 0x6e2   : > { %v2118_v51 = vadd.f32 %v5323_v49, %v2117_v50  ;;  %v6324_v49 = vld [vmem:[#allocation10 + $0xf0] sm:$0xff]  }
 0x6e3   : > { %v5799_v52 = vpop.f32.mrf.mxu0  ;;  %v6323_v50 = vld [vmem:[#allocation10 + $0x30] sm:$0xff]  }
 0x6e4   : > { %v2123_v53 = vadd.f32 %v2118_v51, %v7703_v17  ;;  %v6279_v17 = vld [vmem:[%s8089_s23 + $0xc8] ss:$16 sps:$4 sm:$0xff]  }
 0x6e5   : > { %v2120_v54 = vpop.f32.mrf.mxu0  ;;  %2411 = vmatpush1.bf16.msra.mxu0 %v6279_v17  ;;  %v6325_v51 = vld [vmem:[#allocation10 + $0xb0] sm:$0xff]   ;;  %v6326_v52 = vld [vmem:[#allocation10 + $0x68] sm:$0xff]   ;;  %v6337_v17 = vld [vmem:[#allocation10 + $0x98] sm:$0xff]  }
 0x6e6   : > { %2124 = vadd.xlane.f32.xlu1 %v2123_v53  ;;  %2412 = vmatprep.subr.bf16.mxu0 %v6287_v6  ;;  %v6327_v54 = vld [vmem:[#allocation10 + $0x28] sm:$0xff]  }
 0x6e7   : > { %v5800_v55 = vpop.f32.mrf.mxu0  ;;  %v6343_v6 = vld [vmem:[#allocation10 + $0x8] sm:$0xff]  }
 0x6e8   : > { %v6329_v55 = vld [vmem:[#allocation10 + $0xa8] sm:$0xff]  }
 0x6e9   : > { %2413 = vmatpush1.bf16.msra.mxu0 %v6285_v8  ;;  %v6345_v8 = vld [vmem:[#allocation10 + $0x88] sm:$0xff]  }
 0x6ea   : > { %2414 = vmatprep.subr.bf16.mxu0 %v6293_v12  ;;  %v6349_v12 = vld [vmem:[#allocation10 + $0x80] sm:$0xff]  }
 0x6ed   : > { %2415 = vmatpush1.bf16.msra.mxu0 %v6291_v11  ;;  %v6348_v11 = vld [vmem:[#allocation10 + $0xc0] sm:$0xff]  }
 0x6ee   : > { %2416 = vmatprep.subr.bf16.mxu0 %v6299_v14  ;;  %v2185_v14 = vld [vmem:[#allocation9] sm:$0xf] }
 0x6ef   : > { %v2198_v18 = vrot.slane %v2185_v14, %v7752_v62  ;;  %v2202_v24 = vrot.slane %v2185_v14, %v2201_v15 }
 0x6f1   : > { %2417 = vmatpush1.bf16.msra.mxu0 %v6297_v16  ;;  %v2190_v16 = vrot.slane %v2185_v14, %v7719_v23 }
 0x6f2   : > { %2418 = vmatprep.subr.bf16.mxu0 %v6305_v20  ;;  %v2194_v20 = vrot.slane %v2185_v14, %v7716_v22 }
 0x6f5   : > { %2419 = vmatpush1.bf16.msra.mxu0 %v6303_v25 }
 0x6f6   : > { %2420 = vmatprep.subr.bf16.mxu0 %v6311_v27 }
 0x6f9   : > { %2421 = vmatpush1.bf16.msra.mxu0 %v6309_v29 }
 0x6fa   : > { %2422 = vmatprep.subr.bf16.mxu0 %v6317_v31 }
 0x6fd   : > { %2423 = vmatpush1.bf16.msra.mxu0 %v6315_v33 }
 0x6fe   : > { %5610 = vmatprep.subr.bf16.mxu0 %v6320_v35 }
 0x76f   : > { %v2125_v1 = vpop.xlane.xlu1 %2124 }
 0x770   : > { %v2127_v2 = vmul.f32 0.0078125, %v2125_v1  ;;  %v6338_v1 = vld [vmem:[#allocation10 + $0x50] sm:$0xff]  }
 0x772   : > { %v2128_v3 = vsub.f32 %v2123_v53, %v2127_v2  ;;  %v6328_v53 = vld [vmem:[#allocation10 + $0xe8] sm:$0xff]   ;;  %v6340_v2 = vld [vmem:[#allocation10 + $0xd0] sm:$0xff]  }
 0x774   : > { %v2129_v4 = vmul.f32 %v2128_v3, %v2128_v3 }
 0x776   : > { %2130 = vadd.xlane.f32.xlu0 %v2129_v4  ;;  %v6341_v4 = vld [vmem:[#allocation10 + $0x90] sm:$0xff]  }
 0x7ff   : > { %v2131_v36 = vpop.xlane.xlu0 %2130 }
 0x800   : > { %v2132_v37 = vmul.f32 0.0078125, %v2131_v36 }
 0x802   : > { %v2133_v38 = vadd.f32 1e-05, %v2132_v37 }
 0x804   : > { %6526 = vrsqrt.f32 %v2133_v38 }
 0x811   : > { %v6527_v39 = vpop.eup %6526 }
 0x812   : > { %v2135_v41 = vmul.f32 %v6527_v39, %v2128_v3  ;;  %v6339_v3 = vld [vmem:[#allocation10 + $0x10] sm:$0xff]  }
 0x814   : > { %v2143_v43 = vmul.f32 %v5332_v40, %v2135_v41 }
 0x816   : > { %v7810_v44 = vadd.f32 %v5333_v42, %v2143_v43  ;;  %v6350_v43 = vld [vmem:[%s8090_s11 + $0xa8] ss:$12 sps:$4 sm:$0xff]  }
 0x818   : > { %v2152_v47 = vpack.c.bf16 %v7810_v44, %v7810_v44 }
 0x81a   : > { %2400 = vmatmul.mubr.bf16.vlgmr.msra.gmra.mxu1 %v2152_v47  ;;  %2441 = vmatmul.mubr.bf16.vlgmr.msra.gmra.mxu0 %v2152_v47  ;;  %v6355_v47 = vld [vmem:[%s8090_s11 + $0x94] ss:$12 sps:$4 sm:$0xff]  }
 0x81b   : > { %5589 = vmatpush3.bf16.msra.mxu1 %v6319_v45  ;;  %5611 = vmatpush3.bf16.msra.mxu0 %v6321_v46 }
 0x81c   : > { %5590 = vmatprep.subr.bf16.mxu1 %v6322_v48  ;;  %5612 = vmatprep.subr.bf16.mxu0 %v6324_v49  ;;  %v6353_v48 = vld [vmem:[%s8090_s11 + $0x90] ss:$12 sps:$4 sm:$0xff]  }
 0x81d   : > { %v6358_v49 = vld [vmem:[%s8090_s11 + $0x7c] ss:$12 sps:$4 sm:$0xff]  }
 0x81f   : > { %5591 = vmatpush3.bf16.msra.mxu1 %v6323_v50  ;;  %5613 = vmatpush3.bf16.msra.mxu0 %v6325_v51  ;;  %v6356_v50 = vld [vmem:[%s8090_s11 + $0x78] ss:$12 sps:$4 sm:$0xff]  }
 0x820   : > { %5592 = vmatprep.subr.bf16.mxu1 %v6326_v52  ;;  %5614 = vmatprep.subr.bf16.mxu0 %v6328_v53  ;;  %v6361_v51 = vld [vmem:[%s8090_s11 + $0x64] ss:$12 sps:$4 sm:$0xff]   ;;  %v6359_v52 = vld [vmem:[%s8090_s11 + $0x60] ss:$12 sps:$4 sm:$0xff]  }
 0x821   : > { %v6364_v53 = vld [vmem:[%s8090_s11 + $0x4c] ss:$12 sps:$4 sm:$0xff]  }
 0x823   : > { %5593 = vmatpush3.bf16.msra.mxu1 %v6327_v54  ;;  %5615 = vmatpush3.bf16.msra.mxu0 %v6329_v55  ;;  %v6362_v54 = vld [vmem:[%s8090_s11 + $0x48] ss:$12 sps:$4 sm:$0xff]  }
 0x824   : > { %5594 = vmatprep.subr.bf16.mxu1 %v6330_v56  ;;  %5616 = vmatprep.subr.bf16.mxu0 %v6332_v57  ;;  %v6367_v55 = vld [vmem:[%s8090_s11 + $0x34] ss:$12 sps:$4 sm:$0xff]   ;;  %v6365_v56 = vld [vmem:[%s8090_s11 + $0x30] ss:$12 sps:$4 sm:$0xff]  }
 0x825   : > { %v6370_v57 = vld [vmem:[%s8090_s11 + $0x1c] ss:$12 sps:$4 sm:$0xff]  }
 0x827   : > { %5595 = vmatpush3.bf16.msra.mxu1 %v6331_v58  ;;  %5617 = vmatpush3.bf16.msra.mxu0 %v6333_v59  ;;  %v6368_v58 = vld [vmem:[%s8090_s11 + $0x18] ss:$12 sps:$4 sm:$0xff]  }
 0x828   : > { %5596 = vmatprep.subr.bf16.mxu1 %v6334_v60  ;;  %5618 = vmatprep.subr.bf16.mxu0 %v6336_v61  ;;  %v6373_v59 = vld [vmem:[%s8090_s11 + $0x4] ss:$12 sps:$4 sm:$0xff]   ;;  %v6371_v60 = vld [vmem:[%s8090_s11] ss:$12 sps:$4 sm:$0xff]  }
 0x829   : > { %v7842_v61 = vld [vmem:[%s1514_s0] sm:$0xff]  ;;  %s8103_s0 = sld [smem:[#allocation73_spill]] }
 0x82b   : > { %5597 = vmatpush3.bf16.msra.mxu1 %v6335_v63  ;;  %5619 = vmatpush3.bf16.msra.mxu0 %v6337_v17  ;;  %v2855_v63 = vpack.c.bf16 %v7842_v61, %v7842_v61 }
 0x82c   : > { %5598 = vmatprep.subr.bf16.mxu1 %v6338_v1  ;;  %5620 = vmatprep.subr.bf16.mxu0 %v6340_v2  ;;  %v5366_v2 = vld [vmem:[#allocation12] ss:$0 sm:$0xff] }
 0x82f   : > { %5599 = vmatpush3.bf16.msra.mxu1 %v6339_v3  ;;  %5621 = vmatpush3.bf16.msra.mxu0 %v6341_v4 }
 0x830   : > { %5600 = vmatprep.subr.bf16.mxu1 %v6342_v5  ;;  %5622 = vmatprep.subr.bf16.mxu0 %v6344_v7 }
 0x833   : > { %5601 = vmatpush3.bf16.msra.mxu1 %v6343_v6  ;;  %5623 = vmatpush3.bf16.msra.mxu0 %v6345_v8 }
 0x834   : > { %5602 = vmatprep.subr.bf16.mxu1 %v6346_v9  ;;  %5624 = vmatprep.subr.bf16.mxu0 %v6348_v11 }
 0x837   : > { %5603 = vmatpush3.bf16.msra.mxu1 %v6347_v10  ;;  %5625 = vmatpush3.bf16.msra.mxu0 %v6349_v12 }
 0x838   : > { %5801 = vmatprep.subr.bf16.mxu0 %v7255_v19  ;;  %3033 = vmatprep.subr.bf16.mxu1 %v6352_v13  ;;  %v2888_v13 = vld [vmem:[#allocation22] sm:$0x7] }
 0x839   : > { %v2893_v14 = vrot.slane %v2888_v13, %v7719_v23 }
 0x8da   : > { %v2401_v25 = vpop.f32.mrf.mxu1  ;;  %v2442_v26 = vpop.f32.mrf.mxu0 }
 0x8db   : > { %v2402_v27 = vadd.f32 %v2401_v25, %v2190_v16  ;;  %v2443_v28 = vadd.f32 %v2442_v26, %v2198_v18  ;;  %v2897_v16 = vrot.slane %v2888_v13, %v7716_v22 }
 0x8dc   : > { %v2403_v29 = vpop.f32.mrf.mxu1  ;;  %v2444_v30 = vpop.f32.mrf.mxu0 }
 0x8dd   : > { %v2404_v31 = vadd.f32 %v2403_v29, %v2194_v20  ;;  %v2445_v32 = vadd.f32 %v2444_v30, %v2202_v24  ;;  %v2449_v33 = vmax.f32 %v2402_v27, 0.0  ;;  %v2451_v34 = vmax.f32 %v2443_v28, 0.0 }
 0x8de   : > { %v2405_v35 = vpop.f32.mrf.mxu1  ;;  %v2446_v36 = vpop.f32.mrf.mxu0 }
 0x8df   : > { %v2450_v37 = vmax.f32 %v2404_v31, 0.0  ;;  %v2452_v38 = vmax.f32 %v2445_v32, 0.0  ;;  %v2453_v45 = vpack.c.bf16 %v2449_v33, %v2449_v33  ;;  %v2455_v46 = vpack.c.bf16 %v2451_v34, %v2451_v34  ;;  %v6374_v31 = vld [vmem:[%s8090_s11 + $0xb0] ss:$12 sps:$4 sm:$0xff]   ;;  %v6375_v32 = vld [vmem:[%s8090_s11 + $0x98] ss:$12 sps:$4 sm:$0xff]  }
 0x8e0   : > { %v2406_v39 = vpop.f32.mrf.mxu1  ;;  %v2447_v40 = vpop.f32.mrf.mxu0  ;;  %v6376_v33 = vld [vmem:[%s8090_s11 + $0x80] ss:$12 sps:$4 sm:$0xff]   ;;  %v6377_v34 = vld [vmem:[%s8090_s11 + $0x68] ss:$12 sps:$4 sm:$0xff]   ;;  %v6378_v35 = vld [vmem:[%s8090_s11 + $0x50] ss:$12 sps:$4 sm:$0xff]  }
 0x8e1   : > { %v2454_v41 = vpack.c.bf16 %v2450_v37, %v2450_v37  ;;  %v2456_v42 = vpack.c.bf16 %v2452_v38, %v2452_v38  ;;  %v6379_v36 = vld [vmem:[%s8090_s11 + $0x38] ss:$12 sps:$4 sm:$0xff]   ;;  %v6380_v37 = vld [vmem:[%s8090_s11 + $0x20] ss:$12 sps:$4 sm:$0xff]   ;;  %v6381_v38 = vld [vmem:[%s8090_s11 + $0x8] ss:$12 sps:$4 sm:$0xff]  }
 0x8e3   : > { %2752 = vmatprep.mubr.bf16.mxu1 %v2454_v41  ;;  %2792 = vmatprep.mubr.bf16.mxu0 %v2456_v42 }
 0x8e4   : > { %2753 = vmatmul.mubr.bf16.vlgmr.msra.gmra.mxu1 %v2453_v45  ;;  %2793 = vmatmul.mubr.bf16.vlgmr.msra.gmra.mxu0 %v2455_v46 }
 0x8e5   : > { %3034 = vmatpush1.bf16.msra.mxu1 %v6350_v43  ;;  %3065 = vmatprep.mubr.bf16.mxu1 %v7254_v0 }
 0x8e6   : > { %3035 = vmatprep.subr.bf16.mxu1 %v6355_v47  ;;  %5817 = vmatprep.mubr.msk.bf16.mxu0 %vm7256_vm0, %v7255_v19 }
 0x8e7   : > { %5802 = vmatpush3.bf16.msra.mxu0 %v6374_v31 }
 0x8e8   : > { %5803 = vmatprep.subr.bf16.mxu0 %v7255_v19 }
 0x8e9   : > { %3036 = vmatpush1.bf16.msra.mxu1 %v6353_v48 }
 0x8ea   : > { %3037 = vmatprep.subr.bf16.mxu1 %v6358_v49 }
 0x8eb   : > { %5804 = vmatpush3.bf16.msra.mxu0 %v6375_v32  ;;  %v6383_v32 = vld [vmem:[#allocation24 + $0x30] sm:$0xff]  }
 0x8ec   : > { %5805 = vmatprep.subr.bf16.mxu0 %v7255_v19 }
 0x8ed   : > { %3038 = vmatpush1.bf16.msra.mxu1 %v6356_v50 }
 0x8ee   : > { %3039 = vmatprep.subr.bf16.mxu1 %v6361_v51  ;;  %v2901_v51 = vrot.slane %v2888_v13, %v7752_v62 }
 0x8ef   : > { %5806 = vmatpush3.bf16.msra.mxu0 %v6376_v33  ;;  %v6384_v33 = vld [vmem:[#allocation24 + $0x28] sm:$0xff]  }
 0x8f0   : > { %5807 = vmatprep.subr.bf16.mxu0 %v7255_v19 }
 0x8f1   : > { %3040 = vmatpush1.bf16.msra.mxu1 %v6359_v52 }
 0x8f2   : > { %3041 = vmatprep.subr.bf16.mxu1 %v6364_v53 }
 0x8f3   : > { %5808 = vmatpush3.bf16.msra.mxu0 %v6377_v34  ;;  %v6385_v34 = vld [vmem:[#allocation24 + $0x20] sm:$0xff]  }
 0x8f4   : > { %5809 = vmatprep.subr.bf16.mxu0 %v7255_v19 }
 0x8f5   : > { %3042 = vmatpush1.bf16.msra.mxu1 %v6362_v54 }
 0x8f6   : > { %3043 = vmatprep.subr.bf16.mxu1 %v6367_v55 }
 0x8f7   : > { %5810 = vmatpush3.bf16.msra.mxu0 %v6378_v35  ;;  %v6386_v35 = vld [vmem:[#allocation24 + $0x18] sm:$0xff]  }
 0x8f8   : > { %5811 = vmatprep.subr.bf16.mxu0 %v7255_v19 }
 0x8f9   : > { %3044 = vmatpush1.bf16.msra.mxu1 %v6365_v56 }
 0x8fa   : > { %3045 = vmatprep.subr.bf16.mxu1 %v6370_v57 }
 0x8fb   : > { %5812 = vmatpush3.bf16.msra.mxu0 %v6379_v36  ;;  %v6387_v36 = vld [vmem:[#allocation24 + $0x10] sm:$0xff]  }
 0x8fc   : > { %5813 = vmatprep.subr.bf16.mxu0 %v7255_v19 }
 0x8fd   : > { %3046 = vmatpush1.bf16.msra.mxu1 %v6368_v58 }
 0x8fe   : > { %3047 = vmatprep.subr.bf16.mxu1 %v6373_v59 }
 0x8ff   : > { %5814 = vmatpush3.bf16.msra.mxu0 %v6380_v37  ;;  %v6388_v37 = vld [vmem:[#allocation24 + $0x8] sm:$0xff]  }
 0x900   : > { %5815 = vmatprep.subr.bf16.mxu0 %v7255_v19 }
 0x901   : > { %3048 = vmatpush1.bf16.msra.mxu1 %v6371_v60 }
 0x902   : > { %5821 = vmatprep.subr.bf16.mxu1 %v7255_v19 }
 0x903   : > { %5816 = vmatpush3.bf16.msra.mxu0 %v6381_v38  ;;  %v6389_v38 = vld [vmem:[#allocation24] sm:$0xff]  }
 0x904   : > { %3066 = vmatmul.mubr.bf16.vlgmr.msra.gmra.mxu1 %v2855_v63  ;;  %5845 = vmatprep.subr.bf16.mxu0 %v7255_v19 }
 0x905   : > { %5823 = vmatprep.mubr.msk.bf16.mxu1 %vm7256_vm0, %v7255_v19 }
 0x906   : > { %5818 = vmatmul.mubr.bf16.vlgmr.msra.gmra.mxu0 %v2855_v63 }
 0x907   : > { %5861 = vmatprep.mubr.msk.bf16.mxu0 %vm7256_vm0, %v7255_v19 }
 0x9a4   : > { %v5604_v17 = vpop.f32.mrf.mxu1  ;;  %v5626_v1 = vpop.f32.mrf.mxu0 }
 0x9a6   : > { %v5605_v3 = vpop.f32.mrf.mxu1  ;;  %v5627_v4 = vpop.f32.mrf.mxu0 }
 0x9a7   : > { %v5606_v5 = vadd.f32 %v5605_v3, %v5604_v17  ;;  %v5628_v6 = vadd.f32 %v5627_v4, %v5626_v1 }
 0x9a8   : > { %v5607_v7 = vpop.f32.mrf.mxu1  ;;  %v5629_v8 = vpop.f32.mrf.mxu0 }
 0x9a9   : > { %v2755_v9 = vadd.f32 %v5606_v5, %v5366_v2 }
 0x9aa   : > { %v5608_v10 = vpop.f32.mrf.mxu1  ;;  %v5630_v11 = vpop.f32.mrf.mxu0 }
 0x9ab   : > { %v7849_v12 = vadd.f32 %v5628_v6, %v2755_v9 }
 0x9c4   : > { %v3067_v18 = vpop.f32.mrf.mxu1 }
 0x9c5   : > { %v3068_v20 = vadd.f32 %v3067_v18, %v2893_v14 }
 0x9c6   : > { %v3069_v24 = vpop.f32.mrf.mxu1  ;;  %v3108_v52 = vpop.f32.mrf.mxu0 }
 0x9c7   : > { %v3114_v25 = vpack.c.bf16 %v3068_v20, %v3068_v20  ;;  %v3070_v26 = vadd.f32 %v3069_v24, %v2897_v16  ;;  %v3109_v53 = vadd.f32 %v3108_v52, %v2901_v51  ;;  %v2800_v16 = vadd.f32 %v7849_v12, %v7810_v44  ;;  %v6382_v12 = vld [vmem:[#allocation24 + $0x38] sm:$0xff]  }
 0x9c8   : > { %v3071_v27 = vpop.f32.mrf.mxu1  ;;  %v5819_v54 = vpop.f32.mrf.mxu0  ;;  %5846 = vmatpush3.bf16.msra.mxu0 %v6382_v12 }
 0x9c9   : > { %v3115_v28 = vpack.c.bf16 %v3070_v26, %v3070_v26  ;;  %3223 = vrot.lane.b32.xlu1 %v3114_v25, %s7257_s2  ;;  %v3175_v55 = vpack.c.bf16 %v3109_v53, %v3109_v53  ;;  %5847 = vmatprep.subr.bf16.mxu0 %v7255_v19 }
 0x9ca   : > { %v3072_v29 = vpop.f32.mrf.mxu1  ;;  %v3111_v56 = vpop.f32.mrf.mxu0 }
 0x9cb   : > { %v3120_v30 = vsel %vm1783_vm1, %v3115_v28, 0  ;;  %v3180_v57 = vsel %vm1848_vm3, %v3175_v55, 0 }
 0x9cc   : > { %5822 = vmatpush3.bf16.xpose.msra.mxu1 %v3120_v30  ;;  %v5820_v58 = vpop.f32.mrf.mxu0  ;;  %5848 = vmatpush3.bf16.msra.mxu0 %v6383_v32 }
 0x9cd   : > { %5827 = vmatprep.subr.bf16.mxu1 %v7255_v19  ;;  %5849 = vmatprep.subr.bf16.mxu0 %v7255_v19 }
 0x9d0   : > { %5850 = vmatpush3.bf16.msra.mxu0 %v6384_v33 }
 0x9d1   : > { %5851 = vmatprep.subr.bf16.mxu0 %v7255_v19 }
 0x9d3   : > { %5824 = vmatmul.mubr.msk.bf16.vlgmr.msra.gmra.mxu1 %vm1783_vm1, %v3114_v25 }
 0x9d4   : > { %5829 = vmatprep.mubr.msk.bf16.mxu1 %vm7256_vm0, %v7255_v19  ;;  %5828 = vmatpush3.bf16.msra.mxu1 %v3180_v57  ;;  %v5400_v57 = vld [vmem:[#allocation18] ss:$0 sm:$0xff] }
 0x9d5   : > { %5833 = vmatprep.subr.bf16.mxu1 %v7255_v19  ;;  %5852 = vmatpush3.bf16.msra.mxu0 %v6385_v34 }
 0x9d6   : > { %5853 = vmatprep.subr.bf16.mxu0 %v7255_v19 }
 0x9d9   : > { %5854 = vmatpush3.bf16.msra.mxu0 %v6386_v35  ;;  %v6416_v35 = vld [vmem:[#allocation25 + $0x28] sm:$0xff]  }
 0x9da   : > { %5855 = vmatprep.subr.bf16.mxu0 %v7255_v19 }
 0x9dd   : > { %5856 = vmatpush3.bf16.msra.mxu0 %v6387_v36  ;;  %v6417_v36 = vld [vmem:[#allocation25 + $0x20] sm:$0xff]  }
 0x9de   : > { %5857 = vmatprep.subr.bf16.mxu0 %v7255_v19 }
 0x9e1   : > { %5858 = vmatpush3.bf16.msra.mxu0 %v6388_v37  ;;  %v6418_v37 = vld [vmem:[#allocation25 + $0x18] sm:$0xff]  }
 0x9e2   : > { %5859 = vmatprep.subr.bf16.mxu0 %v7255_v19 }
 0x9e5   : > { %5860 = vmatpush3.bf16.msra.mxu0 %v6389_v38 }
 0xa3b   : > { %v3224_v3 = vpop.permute.xlu1 %3223 }
 0xa93   : > { %v3156_v39 = vpop.f32.mrf.mxu1 }
 0xa94   : > { %v3162_v40 = vmul.f32 0.125, %v3156_v39 }
 0xa95   : > { %v5825_v41 = vpop.f32.mrf.mxu1 }
 0xa96   : > { %v3163_v42 = vsel %vm1831_vm2, %v3162_v40, -inf }
 0xa97   : > { %3164 = vmax.xlane.f32.xlu0 %v3163_v42  ;;  %v3159_v43 = vpop.f32.mrf.mxu1 }
 0xa99   : > { %v5826_v45 = vpop.f32.mrf.mxu1 }
 0xb20   : > { %v3165_v46 = vpop.xlane.xlu0 %3164 }
 0xb21   : > { %v3166_v47 = vsub.f32 %v3162_v40, %v3165_v46 }
 0xb23   : > { %v3167_v48 = vmul.f32 1.442695, %v3166_v47 }
 0xb25   : > { %6528 = vpow2.f32 %v3167_v48 }
 0xb32   : > { %v6529_v49 = vpop.eup %6528 }
 0xb33   : > { %v3169_v50 = vsel %vm1831_vm2, %v6529_v49, 0.0 }
 0xb34   : > { %3170 = vadd.xlane.f32.xlu0 %v3169_v50 }
 0xb4a   : > { %3226 = vrot.lane.b32.xlu0 %v3115_v28, %s7257_s2 }
 0xbbd   : > { %v3171_v59 = vpop.xlane.xlu0 %3170 }
 0xbbe   : > { %6530 = vrcp.f32 %v3171_v59 }
 0xbc1   : > { %v3227_v17 = vpop.permute.xlu0 %3226 }
 0xbc2   : > { %v3232_v2 = vsel %vm1783_vm1, %v3227_v17, 0 }
 0xbcb   : > { %v6531_v60 = vpop.eup %6530 }
 0xbcc   : > { %v3173_v63 = vmul.f32 %v6531_v60, %v6529_v49  ;;  %v5431_v60 = vld [vmem:[%s8092_s18] ss:$0 sm:$0xff]  ;;  %s1518_s18 = scalar_lea.vmem %s7466_s20, %s7699_s15 }
 0xbce   : > { %v3174_v1 = vpack.c.bf16 %v3173_v63, %v3173_v63 }
 0xbd0   : > { %5830 = vmatmul.mubr.msk.bf16.vlgmr.msra.gmra.mxu1 %vm1831_vm2, %v3174_v1 }
 0xbd1   : > { %5834 = vmatpush3.bf16.xpose.msra.mxu1 %v3232_v2  ;;  %5835 = vmatprep.mubr.msk.bf16.mxu1 %vm7256_vm0, %v7255_v19 }
 0xbd2   : > { %5839 = vmatprep.subr.bf16.mxu1 %v7255_v19 }
 0xbd8   : > { %5836 = vmatmul.mubr.msk.bf16.vlgmr.msra.gmra.mxu1 %vm1783_vm1, %v3224_v3 }
 0xbd9   : > { %5841 = vmatprep.mubr.msk.bf16.mxu1 %vm7256_vm0, %v7255_v19 }
 0xc90   : > { %v7891_v4 = vpop.f32.mrf.mxu1 }
 0xc92   : > { %v5831_v5 = vpop.f32.mrf.mxu1 }
 0xc93   : > { %v6390_v5 = vld [vmem:[#allocation28 + $0x70] ss:$8 sps:$4 sm:$0xff]  }
 0xc94   : > { %v3219_v6 = vpop.f32.mrf.mxu1 }
 0xc95   : > { %v6392_v6 = vld [vmem:[#allocation28 + $0x74] ss:$8 sps:$4 sm:$0xff]  }
 0xc96   : > { %v5832_v7 = vpop.f32.mrf.mxu1  ;;  %3702 = vmatprep.subr.bf16.mxu0 %v6392_v6 }
 0xc97   : > { %v6395_v7 = vld [vmem:[#allocation28 + $0x64] ss:$8 sps:$4 sm:$0xff]  }
 0xc98   : > { %v3268_v8 = vpop.f32.mrf.mxu1 }
 0xc99   : > { %v3274_v9 = vmul.f32 0.125, %v3268_v8  ;;  %v6393_v8 = vld [vmem:[#allocation28 + $0x60] ss:$8 sps:$4 sm:$0xff]  }
 0xc9a   : > { %v5837_v10 = vpop.f32.mrf.mxu1 }
 0xc9b   : > { %v3275_v11 = vsel %vm1831_vm2, %v3274_v9, -inf }
 0xc9c   : > { %3276 = vmax.xlane.f32.xlu0 %v3275_v11  ;;  %v3271_v13 = vpop.f32.mrf.mxu1 }
 0xc9e   : > { %v5838_v14 = vpop.f32.mrf.mxu1 }
 0xc9f   : > { %v6396_v14 = vld [vmem:[#allocation28 + $0x50] ss:$8 sps:$4 sm:$0xff]  }
 0xcb2   : > { %3288 = vrot.lane.b32.xlu0 %v3175_v55, %s7257_s2  ;;  %v5399_v55 = vld [vmem:[#allocation16] ss:$0 sm:$0xff] }
 0xcd1   : > { %2801 = vadd.xlane.f32.xlu0 %v2800_v16 }
 0xd25   : > { %v3277_v18 = vpop.xlane.xlu0 %3276 }
 0xd26   : > { %v3278_v20 = vsub.f32 %v3274_v9, %v3277_v18  ;;  %v6401_v18 = vld [vmem:[#allocation28 + $0x44] ss:$8 sps:$4 sm:$0xff]  }
 0xd28   : > { %v3279_v24 = vmul.f32 1.442695, %v3278_v20  ;;  %v6404_v20 = vld [vmem:[#allocation28 + $0x34] ss:$8 sps:$4 sm:$0xff]  }
 0xd29   : > { %v3289_v25 = vpop.permute.xlu0 %3288 }
 0xd2a   : > { %6532 = vpow2.f32 %v3279_v24  ;;  %v3294_v26 = vsel %vm1848_vm3, %v3289_v25, 0  ;;  %v6402_v24 = vld [vmem:[#allocation28 + $0x30] ss:$8 sps:$4 sm:$0xff]   ;;  %v6407_v25 = vld [vmem:[#allocation28 + $0x24] ss:$8 sps:$4 sm:$0xff]  }
 0xd2b   : > { %5840 = vmatpush3.bf16.msra.mxu1 %v3294_v26  ;;  %v6405_v26 = vld [vmem:[#allocation28 + $0x20] ss:$8 sps:$4 sm:$0xff]  }
 0xd2c   : > { %5865 = vmatprep.subr.bf16.mxu1 %v7255_v19 }
 0xd37   : > { %v6533_v27 = vpop.eup %6532 }
 0xd38   : > { %v3281_v28 = vsel %vm1831_vm2, %v6533_v27, 0.0 }
 0xd39   : > { %3282 = vadd.xlane.f32.xlu1 %v3281_v28  ;;  %v6408_v28 = vld [vmem:[#allocation28 + $0x10] ss:$8 sps:$4 sm:$0xff]  }
 0xd5a   : > { %v2802_v43 = vpop.xlane.xlu0 %2801 }
 0xd5b   : > { %v2803_v45 = vmul.f32 0.0078125, %v2802_v43  ;;  %v6421_v43 = vld [vmem:[#allocation25] sm:$0xff]  }
 0xd5d   : > { %v2804_v46 = vsub.f32 %v2800_v16, %v2803_v45  ;;  %v6399_v16 = vld [vmem:[#allocation28 + $0x40] ss:$8 sps:$4 sm:$0xff]  }
 0xd5f   : > { %v2805_v47 = vmul.f32 %v2804_v46, %v2804_v46 }
 0xdc2   : > { %v3283_v29 = vpop.xlane.xlu1 %3282 }
 0xdc3   : > { %6534 = vrcp.f32 %v3283_v29  ;;  %v6413_v29 = vld [vmem:[#allocation28 + $0x4] ss:$8 sps:$4 sm:$0xff]  }
 0xdd0   : > { %v6535_v30 = vpop.eup %6534 }
 0xdd1   : > { %v3285_v31 = vmul.f32 %v6535_v30, %v6533_v27  ;;  %v6410_v27 = vld [vmem:[#allocation28 + $0x14] ss:$8 sps:$4 sm:$0xff]   ;;  %v6411_v30 = vld [vmem:[#allocation28] ss:$8 sps:$4 sm:$0xff]  }
 0xdd3   : > { %v3286_v44 = vpack.c.bf16 %v3285_v31, %v3285_v31  ;;  %v6414_v31 = vld [vmem:[#allocation25 + $0x38] sm:$0xff]  }
 0xdd5   : > { %5842 = vmatmul.mubr.msk.bf16.vlgmr.msra.gmra.mxu1 %vm1831_vm2, %v3286_v44  ;;  %v6415_v44 = vld [vmem:[#allocation25 + $0x30] sm:$0xff]  }
 0xdd6   : > { %5881 = vmatprep.mubr.msk.bf16.mxu1 %vm7256_vm0, %v7255_v19  ;;  %5866 = vmatpush3.bf16.msra.mxu1 %v6414_v31 }
 0xdd7   : > { %5867 = vmatprep.subr.bf16.mxu1 %v7255_v19 }
 0xdda   : > { %5868 = vmatpush3.bf16.msra.mxu1 %v6415_v44 }
 0xddb   : > { %5869 = vmatprep.subr.bf16.mxu1 %v7255_v19 }
 0xdde   : > { %5870 = vmatpush3.bf16.msra.mxu1 %v6416_v35 }
 0xddf   : > { %5871 = vmatprep.subr.bf16.mxu1 %v7255_v19 }
 0xde2   : > { %5872 = vmatpush3.bf16.msra.mxu1 %v6417_v36 }
 0xde3   : > { %5873 = vmatprep.subr.bf16.mxu1 %v7255_v19 }
 0xde6   : > { %5874 = vmatpush3.bf16.msra.mxu1 %v6418_v37 }
 0xde7   : > { %5875 = vmatprep.subr.bf16.mxu1 %v7255_v19 }
 0xe95   : > { %v3330_v39 = vpop.f32.mrf.mxu1 }
 0xe96   : > { %3337 = vrot.lane.b32.xlu1 %v3330_v39, %s7257_s2 }
 0xe97   : > { %v5843_v40 = vpop.f32.mrf.mxu1 }
 0xe98   : > { %v6419_v40 = vld [vmem:[#allocation25 + $0x10] sm:$0xff]  }
 0xe99   : > { %v3333_v41 = vpop.f32.mrf.mxu1  ;;  %5876 = vmatpush3.bf16.msra.mxu1 %v6419_v40 }
 0xe9a   : > { %5877 = vmatprep.subr.bf16.mxu1 %v7255_v19 }
 0xe9b   : > { %v5844_v42 = vpop.f32.mrf.mxu1 }
 0xe9c   : > { %v6420_v42 = vld [vmem:[#allocation25 + $0x8] sm:$0xff]  }
 0xe9d   : > { %5878 = vmatpush3.bf16.msra.mxu1 %v6420_v42 }
 0xe9e   : > { %5879 = vmatprep.subr.bf16.mxu1 %v7255_v19 }
 0xea1   : > { %5880 = vmatpush3.bf16.msra.mxu1 %v6421_v43 }
 0xea2   : > { %5885 = vmatprep.subr.bf16.mxu1 %v7255_v19 }
 0xeba   : > { %2806 = vadd.xlane.f32.xlu1 %v2805_v47 }
 0xf08   : > { %v3338_v48 = vpop.permute.xlu1 %3337 }
 0xf09   : > { %v3340_v49 = vsel %vm1783_vm1, %v7891_v4, %v3338_v48  ;;  %v5402_v48 = vld [vmem:[#allocation21] ss:$0 sm:$0xff] }
 0xf0a   : > { %v3341_v50 = vpack.c.bf16 %v3340_v49, %v3340_v49 }
 0xf0c   : > { %5862 = vmatmul.mubr.bf16.vlgmr.msra.gmra.mxu0 %v3341_v50 }
 0xf0d   : > { %3734 = vmatprep.mubr.bf16.mxu0 %v7254_v0  ;;  %3703 = vmatpush1.bf16.msra.mxu0 %v6390_v5 }
 0xf0e   : > { %3704 = vmatprep.subr.bf16.mxu0 %v6395_v7 }
 0xf11   : > { %3705 = vmatpush1.bf16.msra.mxu0 %v6393_v8 }
 0xf43   : > { %v2807_v51 = vpop.xlane.xlu1 %2806 }
 0xf44   : > { %v2808_v52 = vmul.f32 0.0078125, %v2807_v51 }
 0xf46   : > { %v2809_v53 = vadd.f32 1e-05, %v2808_v52 }
 0xf48   : > { %6536 = vrsqrt.f32 %v2809_v53 }
 0xf55   : > { %v6537_v54 = vpop.eup %6536 }
 0xf56   : > { %v2811_v56 = vmul.f32 %v6537_v54, %v2804_v46  ;;  %v5401_v46 = vld [vmem:[#allocation19] ss:$0 sm:$0xff] }
 0xf58   : > { %v2819_v58 = vmul.f32 %v5399_v55, %v2811_v56  ;;  %v5440_v56 = vld [vmem:[%s8093_s22] ss:$0 sm:$0xff] }
 0xf5a   : > { %v2827_v59 = vadd.f32 %v5400_v57, %v2819_v58  ;;  %v5441_v58 = vld [vmem:[%s8094_s10] ss:$0 sm:$0xff] }
 0xf5c   : > { %2828 = vadd.xlane.f32.xlu0 %v2827_v59 }
 0xfcc   : > { %v3447_v63 = vpop.f32.mrf.mxu0 }
 0xfcd   : > { %v3448_v17 = vadd.f32 %v5431_v60, %v3447_v63 }
 0xfce   : > { %v5863_v1 = vpop.f32.mrf.mxu0 }
 0xfcf   : > { %v3453_v2 = vadd.f32 %v3448_v17, %v7842_v61  ;;  %v6398_v61 = vld [vmem:[#allocation28 + $0x54] ss:$8 sps:$4 sm:$0xff]   ;;  %v3610_v17 = vld [vmem:[%s8095_s1] sm:$0x3] }
 0xfd0   : > { %v3450_v3 = vpop.f32.mrf.mxu0  ;;  %3706 = vmatprep.subr.bf16.mxu0 %v6398_v61  ;;  %v3615_v1 = vrot.slane %v3610_v17, %v7719_v23 }
 0xfd1   : > { %3454 = vadd.xlane.f32.xlu0 %v3453_v2  ;;  %3707 = vmatpush1.bf16.msra.mxu0 %v6396_v14 }
 0xfd2   : > { %v5864_v4 = vpop.f32.mrf.mxu0  ;;  %3708 = vmatprep.subr.bf16.mxu0 %v6401_v18 }
 0xfd5   : > { %3709 = vmatpush1.bf16.msra.mxu0 %v6399_v16 }
 0xfd6   : > { %3710 = vmatprep.subr.bf16.mxu0 %v6404_v20 }
 0xfd9   : > { %3711 = vmatpush1.bf16.msra.mxu0 %v6402_v24 }
 0xfda   : > { %3712 = vmatprep.subr.bf16.mxu0 %v6407_v25 }
 0xfdd   : > { %3713 = vmatpush1.bf16.msra.mxu0 %v6405_v26 }
 0xfde   : > { %3714 = vmatprep.subr.bf16.mxu0 %v6410_v27 }
 0xfe1   : > { %3715 = vmatpush1.bf16.msra.mxu0 %v6408_v28 }
 0xfe2   : > { %3716 = vmatprep.subr.bf16.mxu0 %v6413_v29 }
 0xfe5   : > { %v2829_v9 = vpop.xlane.xlu0 %2828  ;;  %3717 = vmatpush1.bf16.msra.mxu0 %v6411_v30 }
 0xfe6   : > { %v2830_v10 = vmul.f32 0.0078125, %v2829_v9  ;;  %5909 = vmatprep.subr.bf16.mxu0 %v7255_v19  ;;  %v3619_v9 = vrot.slane %v3610_v17, %v7716_v22 }
 0xfe8   : > { %v7916_v11 = vsub.f32 %v2827_v59, %v2830_v10 }
 0xfea   : > { %v2832_v13 = vmul.f32 %v7916_v11, %v7916_v11 }
 0xfec   : > { %2833 = vadd.xlane.f32.xlu0 %v2832_v13 }
0x105a   : > { %v3455_v12 = vpop.xlane.xlu0 %3454 }
0x105b   : > { %v3456_v32 = vmul.f32 0.0078125, %v3455_v12 }
0x105d   : > { %v3457_v33 = vsub.f32 %v3453_v2, %v3456_v32 }
0x105f   : > { %v3458_v34 = vmul.f32 %v3457_v33, %v3457_v33 }
0x1061   : > { %3459 = vadd.xlane.f32.xlu0 %v3458_v34 }
0x1075   : > { %v2834_v38 = vpop.xlane.xlu0 %2833 }
0x1076   : > { %v2835_v39 = vmul.f32 0.0078125, %v2834_v38 }
0x1078   : > { %v2836_v41 = vadd.f32 1e-05, %v2835_v39 }
0x107a   : > { %6538 = vrsqrt.f32 %v2836_v41 }
0x1087   : > { %v6539_v45 = vpop.eup %6538 }
0x1088   : > { %v2838_v47 = vmul.f32 %v6539_v45, %v7916_v11  ;;  %v5442_v11 = vld [vmem:[#allocation27] ss:$0 sm:$0xff] }
0x108a   : > { %v2846_v49 = vmul.f32 %v5401_v46, %v2838_v47 }
0x108c   : > { %v2854_v50 = vadd.f32 %v5402_v48, %v2846_v49 }
0x108e   : > { %v3593_v51 = vpack.c.bf16 %v2854_v50, %v2854_v50 }
0x1090   : > { %3735 = vmatmul.mubr.bf16.vlgmr.msra.gmra.mxu0 %v3593_v51 }
0x1091   : > { %5925 = vmatprep.mubr.msk.bf16.mxu0 %vm7256_vm0, %v7255_v19 }
0x10ea   : > { %v3460_v52 = vpop.xlane.xlu0 %3459 }
0x10eb   : > { %v3461_v53 = vmul.f32 0.0078125, %v3460_v52 }
0x10ed   : > { %v3462_v54 = vadd.f32 1e-05, %v3461_v53 }
0x10ef   : > { %6540 = vrsqrt.f32 %v3462_v54 }
0x10fc   : > { %v6541_v55 = vpop.eup %6540 }
0x10fd   : > { %v3464_v57 = vmul.f32 %v6541_v55, %v3457_v33 }
0x10ff   : > { %v3472_v59 = vmul.f32 %v5440_v56, %v3464_v57 }
0x1101   : > { %v7934_v60 = vadd.f32 %v5441_v58, %v3472_v59 }
0x1103   : > { %v3481_v63 = vpack.c.bf16 %v7934_v60, %v7934_v60 }
0x1105   : > { %5882 = vmatmul.mubr.bf16.vlgmr.msra.gmra.mxu1 %v3481_v63 }
0x1106   : > { %5887 = vmatprep.mubr.msk.bf16.mxu1 %vm7256_vm0, %v7255_v19 }
0x1150   : > { %v3736_v2 = vpop.f32.mrf.mxu0 }
0x1151   : > { %v3737_v3 = vadd.f32 %v3736_v2, %v3615_v1 }
0x1152   : > { %v3738_v4 = vpop.f32.mrf.mxu0 }
0x1153   : > { %v3744_v5 = vpack.c.bf16 %v3737_v3, %v3737_v3  ;;  %v3739_v10 = vadd.f32 %v3738_v4, %v3619_v9  ;;  %v6422_v3 = vld [vmem:[#allocation30 + $0x38] sm:$0xff]   ;;  %v6423_v4 = vld [vmem:[#allocation30 + $0x30] sm:$0xff]   ;;  %v6428_v9 = vld [vmem:[#allocation30 + $0x8] sm:$0xff]  }
0x1154   : > { %v3740_v6 = vpop.f32.mrf.mxu0  ;;  %5910 = vmatpush3.bf16.msra.mxu0 %v6422_v3  ;;  %v6478_v3 = vld [vmem:[#allocation33 + $0x78] sm:$0xff]  }
0x1155   : > { %v3749_v7 = vsel %vm1783_vm1, %v3744_v5, 0  ;;  %v3804_v61 = vpack.c.bf16 %v3739_v10, %v3739_v10  ;;  %5911 = vmatprep.subr.bf16.mxu0 %v7255_v19  ;;  %v6425_v6 = vld [vmem:[#allocation30 + $0x20] sm:$0xff]  }
0x1156   : > { %v3741_v8 = vpop.f32.mrf.mxu0  ;;  %5886 = vmatpush3.bf16.xpose.msra.mxu1 %v3749_v7  ;;  %v6426_v7 = vld [vmem:[#allocation30 + $0x18] sm:$0xff]   ;;  %v6429_v10 = vld [vmem:[#allocation30] sm:$0xff]  }
0x1157   : > { %5891 = vmatprep.subr.bf16.mxu1 %v7255_v19  ;;  %v3809_v24 = vsel %vm1848_vm3, %v3804_v61, 0  ;;  %v6427_v8 = vld [vmem:[#allocation30 + $0x10] sm:$0xff]  }
0x1158   : > { %5912 = vmatpush3.bf16.msra.mxu0 %v6423_v4  ;;  %v6479_v4 = vld [vmem:[#allocation33 + $0xf8] sm:$0xff]  }
0x1159   : > { %5913 = vmatprep.subr.bf16.mxu0 %v7255_v19 }
0x11c5   : > { %v3587_v13 = vpop.f32.mrf.mxu1 }
0x11c6   : > { %v3588_v14 = vadd.f32 %v5442_v11, %v3587_v13 }
0x11c7   : > { %v5883_v16 = vpop.f32.mrf.mxu1 }
0x11c8   : > { %v3743_v18 = vpack.c.bf16 %v3588_v14, %v3588_v14 }
0x11c9   : > { %v3590_v20 = vpop.f32.mrf.mxu1 }
0x11ca   : > { %5888 = vmatmul.mubr.msk.bf16.vlgmr.msra.gmra.mxu1 %vm1783_vm1, %v3743_v18 }
0x11cb   : > { %5892 = vmatpush3.bf16.msra.mxu1 %v3809_v24  ;;  %v5884_v25 = vpop.f32.mrf.mxu1  ;;  %5893 = vmatprep.mubr.msk.bf16.mxu1 %vm7256_vm0, %v7255_v19  ;;  %v5471_v24 = vld [vmem:[%s8096_s6] ss:$0 sm:$0xff] }
0x11cc   : > { %5897 = vmatprep.subr.bf16.mxu1 %v7255_v19 }
0x128a   : > { %v3785_v26 = vpop.f32.mrf.mxu1 }
0x128b   : > { %v3791_v27 = vmul.f32 0.125, %v3785_v26 }
0x128c   : > { %v5889_v28 = vpop.f32.mrf.mxu1 }
0x128d   : > { %v3792_v29 = vsel %vm1831_vm2, %v3791_v27, -inf }
0x128e   : > { %3793 = vmax.xlane.f32.xlu0 %v3792_v29  ;;  %v3788_v30 = vpop.f32.mrf.mxu1 }
0x1290   : > { %v5890_v31 = vpop.f32.mrf.mxu1 }
0x1291   : > { %v6430_v31 = vld [vmem:[#allocation31 + $0xe0] ss:$16 sps:$4 sm:$0xff]  }
0x12a4   : > { %3855 = vrot.lane.b32.xlu0 %v3744_v5, %s7257_s2  ;;  %v6424_v5 = vld [vmem:[#allocation30 + $0x28] sm:$0xff]  }
0x12a5   : > { %5914 = vmatpush3.bf16.msra.mxu0 %v6424_v5 }
0x12a6   : > { %5915 = vmatprep.subr.bf16.mxu0 %v7255_v19 }
0x12a9   : > { %5916 = vmatpush3.bf16.msra.mxu0 %v6425_v6 }
0x12aa   : > { %5917 = vmatprep.subr.bf16.mxu0 %v7255_v19 }
0x12ad   : > { %5918 = vmatpush3.bf16.msra.mxu0 %v6426_v7 }
0x12ae   : > { %5919 = vmatprep.subr.bf16.mxu0 %v7255_v19 }
0x12b1   : > { %5920 = vmatpush3.bf16.msra.mxu0 %v6427_v8 }
0x12b2   : > { %5921 = vmatprep.subr.bf16.mxu0 %v7255_v19 }
0x12b5   : > { %5922 = vmatpush3.bf16.msra.mxu0 %v6428_v9  ;;  %v5480_v9 = vld [vmem:[%s8097_s4] ss:$0 sm:$0xff] }
0x12b6   : > { %5923 = vmatprep.subr.bf16.mxu0 %v7255_v19 }
0x12b9   : > { %5924 = vmatpush3.bf16.msra.mxu0 %v6429_v10 }
0x1317   : > { %v3794_v44 = vpop.xlane.xlu0 %3793 }
0x1318   : > { %v3795_v12 = vsub.f32 %v3791_v27, %v3794_v44  ;;  %v6432_v44 = vld [vmem:[#allocation31 + $0xe4] ss:$16 sps:$4 sm:$0xff]  }
0x131a   : > { %v3796_v32 = vmul.f32 1.442695, %v3795_v12  ;;  %v6433_v12 = vld [vmem:[#allocation31 + $0xe8] ss:$16 sps:$4 sm:$0xff]  }
0x131b   : > { %v3856_v38 = vpop.permute.xlu0 %3855 }
0x131c   : > { %6542 = vpow2.f32 %v3796_v32  ;;  %v3861_v40 = vsel %vm1783_vm1, %v3856_v38, 0  ;;  %v6435_v32 = vld [vmem:[#allocation31 + $0xec] ss:$16 sps:$4 sm:$0xff]  }
0x131d   : > { %4366 = vmatprep.subr.bf16.mxu0 %v6435_v32  ;;  %v6493_v32 = vld [vmem:[#allocation33 + $0xa0] sm:$0xff]  }
0x1329   : > { %v6543_v33 = vpop.eup %6542 }
0x132a   : > { %v3798_v34 = vsel %vm1831_vm2, %v6543_v33, 0.0 }
0x132b   : > { %3799 = vadd.xlane.f32.xlu1 %v3798_v34  ;;  %v6441_v34 = vld [vmem:[#allocation31 + $0xcc] ss:$16 sps:$4 sm:$0xff]  }
0x133c   : > { %3852 = vrot.lane.b32.xlu1 %v3743_v18, %s7257_s2 }
0x13b4   : > { %v3800_v35 = vpop.xlane.xlu1 %3799 }
0x13b5   : > { %6544 = vrcp.f32 %v3800_v35  ;;  %v6436_v35 = vld [vmem:[#allocation31 + $0xc0] ss:$16 sps:$4 sm:$0xff]  }
0x13b8   : > { %v3853_v41 = vpop.permute.xlu1 %3852 }
0x13c2   : > { %v6545_v36 = vpop.eup %6544 }
0x13c3   : > { %v3802_v37 = vmul.f32 %v6545_v36, %v6543_v33  ;;  %v6438_v33 = vld [vmem:[#allocation31 + $0xc4] ss:$16 sps:$4 sm:$0xff]  }
0x13c5   : > { %v3803_v39 = vpack.c.bf16 %v3802_v37, %v3802_v37 }
0x13c7   : > { %5894 = vmatmul.mubr.msk.bf16.vlgmr.msra.gmra.mxu1 %vm1831_vm2, %v3803_v39  ;;  %v6444_v39 = vld [vmem:[#allocation31 + $0xa4] ss:$16 sps:$4 sm:$0xff]  }
0x13c8   : > { %5898 = vmatpush3.bf16.xpose.msra.mxu1 %v3861_v40  ;;  %5899 = vmatprep.mubr.msk.bf16.mxu1 %vm7256_vm0, %v7255_v19  ;;  %v6447_v40 = vld [vmem:[#allocation31 + $0xac] ss:$16 sps:$4 sm:$0xff]  }
0x13c9   : > { %5903 = vmatprep.subr.bf16.mxu1 %v7255_v19 }
0x13cf   : > { %5900 = vmatmul.mubr.msk.bf16.vlgmr.msra.gmra.mxu1 %vm1783_vm1, %v3853_v41  ;;  %v6442_v41 = vld [vmem:[#allocation31 + $0xa0] ss:$16 sps:$4 sm:$0xff]  }
0x13d0   : > { %5905 = vmatprep.mubr.msk.bf16.mxu1 %vm7256_vm0, %v7255_v19 }
0x1487   : > { %v3845_v42 = vpop.f32.mrf.mxu1 }
0x1489   : > { %v5895_v43 = vpop.f32.mrf.mxu1 }
0x148a   : > { %v6448_v43 = vld [vmem:[#allocation31 + $0x80] ss:$16 sps:$4 sm:$0xff]  }
0x148b   : > { %v3848_v45 = vpop.f32.mrf.mxu1 }
0x148c   : > { %v6450_v45 = vld [vmem:[#allocation31 + $0x84] ss:$16 sps:$4 sm:$0xff]  }
0x148d   : > { %v5896_v46 = vpop.f32.mrf.mxu1 }
0x148e   : > { %v6451_v46 = vld [vmem:[#allocation31 + $0x88] ss:$16 sps:$4 sm:$0xff]  }
0x148f   : > { %v3897_v47 = vpop.f32.mrf.mxu1 }
0x1490   : > { %v3903_v48 = vmul.f32 0.125, %v3897_v47  ;;  %v6453_v47 = vld [vmem:[#allocation31 + $0x8c] ss:$16 sps:$4 sm:$0xff]  }
0x1491   : > { %v5901_v49 = vpop.f32.mrf.mxu1 }
0x1492   : > { %v3904_v50 = vsel %vm1831_vm2, %v3903_v48, -inf  ;;  %v6459_v49 = vld [vmem:[#allocation31 + $0x6c] ss:$16 sps:$4 sm:$0xff]  }
0x1493   : > { %3905 = vmax.xlane.f32.xlu1 %v3904_v50  ;;  %v3900_v51 = vpop.f32.mrf.mxu1  ;;  %v6454_v50 = vld [vmem:[#allocation31 + $0x60] ss:$16 sps:$4 sm:$0xff]  }
0x1494   : > { %v6457_v51 = vld [vmem:[#allocation31 + $0x68] ss:$16 sps:$4 sm:$0xff]  }
0x1495   : > { %v5902_v52 = vpop.f32.mrf.mxu1 }
0x1496   : > { %v6462_v52 = vld [vmem:[#allocation31 + $0x44] ss:$16 sps:$4 sm:$0xff]  }
0x151c   : > { %v3906_v53 = vpop.xlane.xlu1 %3905 }
0x151d   : > { %v3907_v54 = vsub.f32 %v3903_v48, %v3906_v53  ;;  %v6456_v48 = vld [vmem:[#allocation31 + $0x64] ss:$16 sps:$4 sm:$0xff]   ;;  %v6465_v53 = vld [vmem:[#allocation31 + $0x4c] ss:$16 sps:$4 sm:$0xff]  }
0x151f   : > { %v3908_v55 = vmul.f32 1.442695, %v3907_v54  ;;  %v6460_v54 = vld [vmem:[#allocation31 + $0x40] ss:$16 sps:$4 sm:$0xff]  }
0x1521   : > { %6546 = vpow2.f32 %v3908_v55  ;;  %v6463_v55 = vld [vmem:[#allocation31 + $0x48] ss:$16 sps:$4 sm:$0xff]  }
0x152e   : > { %v6547_v56 = vpop.eup %6546 }
0x152f   : > { %v3910_v57 = vsel %vm1831_vm2, %v6547_v56, 0.0 }
0x1530   : > { %3911 = vadd.xlane.f32.xlu0 %v3910_v57  ;;  %v6471_v57 = vld [vmem:[#allocation31 + $0x2c] ss:$16 sps:$4 sm:$0xff]  }
0x1546   : > { %3917 = vrot.lane.b32.xlu0 %v3804_v61, %s7257_s2 }
0x15b9   : > { %v3912_v58 = vpop.xlane.xlu0 %3911 }
0x15ba   : > { %6548 = vrcp.f32 %v3912_v58  ;;  %v6466_v58 = vld [vmem:[#allocation31 + $0x20] ss:$16 sps:$4 sm:$0xff]  }
0x15bd   : > { %v3918_v59 = vpop.permute.xlu0 %3917 }
0x15be   : > { %v3923_v63 = vsel %vm1848_vm3, %v3918_v59, 0  ;;  %v6469_v59 = vld [vmem:[#allocation31 + $0x28] ss:$16 sps:$4 sm:$0xff]  }
0x15bf   : > { %5904 = vmatpush3.bf16.msra.mxu1 %v3923_v63  ;;  %v6474_v63 = vld [vmem:[#allocation31 + $0x4] ss:$16 sps:$4 sm:$0xff]  }
0x15c0   : > { %4325 = vmatprep.subr.bf16.mxu1 %v6432_v44  ;;  %v6491_v44 = vld [vmem:[#allocation33 + $0xe0] sm:$0xff]  }
0x15c7   : > { %v6549_v17 = vpop.eup %6548 }
0x15c8   : > { %v3914_v1 = vmul.f32 %v6549_v17, %v6547_v56  ;;  %v6468_v56 = vld [vmem:[#allocation31 + $0x24] ss:$16 sps:$4 sm:$0xff]   ;;  %v6477_v17 = vld [vmem:[#allocation31 + $0xc] ss:$16 sps:$4 sm:$0xff]  }
0x15ca   : > { %v3915_v2 = vpack.c.bf16 %v3914_v1, %v3914_v1  ;;  %v6472_v1 = vld [vmem:[#allocation31] ss:$16 sps:$4 sm:$0xff]  }
0x15cc   : > { %5906 = vmatmul.mubr.msk.bf16.vlgmr.msra.gmra.mxu1 %vm1831_vm2, %v3915_v2  ;;  %v6475_v2 = vld [vmem:[#allocation31 + $0x8] ss:$16 sps:$4 sm:$0xff]  }
0x15cd   : > { %4357 = vmatprep.mubr.bf16.mxu1 %v7254_v0  ;;  %4326 = vmatpush1.bf16.msra.mxu1 %v6430_v31  ;;  %v6490_v31 = vld [vmem:[#allocation33 + $0x60] sm:$0xff]  }
0x15ce   : > { %4327 = vmatprep.subr.bf16.mxu1 %v6438_v33  ;;  %v6494_v33 = vld [vmem:[#allocation33 + $0x58] sm:$0xff]  }
0x15d1   : > { %4328 = vmatpush1.bf16.msra.mxu1 %v6436_v35  ;;  %v6496_v35 = vld [vmem:[#allocation33 + $0x18] sm:$0xff]  }
0x15d2   : > { %4329 = vmatprep.subr.bf16.mxu1 %v6444_v39  ;;  %v6502_v39 = vld [vmem:[#allocation33 + $0x48] sm:$0xff]  }
0x15d5   : > { %4330 = vmatpush1.bf16.msra.mxu1 %v6442_v41  ;;  %v6504_v41 = vld [vmem:[#allocation33 + $0x8] sm:$0xff]  }
0x15d6   : > { %4331 = vmatprep.subr.bf16.mxu1 %v6450_v45  ;;  %v6507_v45 = vld [vmem:[#allocation33 + $0xc0] sm:$0xff]  }
0x15d9   : > { %4332 = vmatpush1.bf16.msra.mxu1 %v6448_v43  ;;  %v6506_v43 = vld [vmem:[#allocation33 + $0x40] sm:$0xff]  }
0x15da   : > { %4333 = vmatprep.subr.bf16.mxu1 %v6456_v48  ;;  %v4143_v48 = vld [vmem:[%s8099_s7] sm:$0xf] }
0x15dd   : > { %4334 = vmatpush1.bf16.msra.mxu1 %v6454_v50  ;;  %v4156_v50 = vrot.slane %v4143_v48, %v7752_v62 }
0x15de   : > { %4335 = vmatprep.subr.bf16.mxu1 %v6462_v52  ;;  %v4160_v52 = vrot.slane %v4143_v48, %v2201_v15 }
0x15e1   : > { %4336 = vmatpush1.bf16.msra.mxu1 %v6460_v54 }
0x15e2   : > { %4337 = vmatprep.subr.bf16.mxu1 %v6468_v56 }
0x15e5   : > { %4338 = vmatpush1.bf16.msra.mxu1 %v6466_v58 }
0x15e6   : > { %4339 = vmatprep.subr.bf16.mxu1 %v6474_v63 }
0x15e9   : > { %4340 = vmatpush1.bf16.msra.mxu1 %v6472_v1 }
0x15ea   : > { %5684 = vmatprep.subr.bf16.mxu1 %v6478_v3 }
0x168c   : > { %v3959_v11 = vpop.f32.mrf.mxu1 }
0x168d   : > { %3966 = vrot.lane.b32.xlu1 %v3959_v11, %s7257_s2  ;;  %v5481_v11 = vld [vmem:[%s8098_s16] ss:$0 sm:$0xff]  ;;  %s8101_s2 = sld [smem:[#allocation71_spill]] }
0x168e   : > { %v5907_v13 = vpop.f32.mrf.mxu1 }
0x1690   : > { %v3962_v61 = vpop.f32.mrf.mxu1 }
0x1692   : > { %v5908_v14 = vpop.f32.mrf.mxu1 }
0x1693   : > { %v6480_v14 = vld [vmem:[#allocation33 + $0x38] sm:$0xff]  }
0x16ff   : > { %v3967_v16 = vpop.permute.xlu1 %3966 }
0x1700   : > { %v3969_v18 = vsel %vm1783_vm1, %v3845_v42, %v3967_v16  ;;  %v6445_v42 = vld [vmem:[#allocation31 + $0xa8] ss:$16 sps:$4 sm:$0xff]  }
0x1701   : > { %v3970_v20 = vpack.c.bf16 %v3969_v18, %v3969_v18  ;;  %v6481_v16 = vld [vmem:[#allocation33 + $0xb8] sm:$0xff]  }
0x1703   : > { %5926 = vmatmul.mubr.bf16.vlgmr.msra.gmra.mxu0 %v3970_v20  ;;  %v6482_v20 = vld [vmem:[#allocation33 + $0x70] sm:$0xff]  }
0x1704   : > { %4398 = vmatprep.mubr.bf16.mxu0 %v7254_v0  ;;  %4367 = vmatpush1.bf16.msra.mxu0 %v6433_v12  ;;  %v6439_v0 = vld [vmem:[#allocation31 + $0xc8] ss:$16 sps:$4 sm:$0xff]   ;;  %v6492_v12 = vld [vmem:[#allocation33 + $0x20] sm:$0xff]  }
0x1705   : > { %4368 = vmatprep.subr.bf16.mxu0 %v6441_v34  ;;  %v6495_v34 = vld [vmem:[#allocation33 + $0xd8] sm:$0xff]  }
0x1708   : > { %4369 = vmatpush1.bf16.msra.mxu0 %v6439_v0  ;;  %v6497_v0 = vld [vmem:[#allocation33 + $0x98] sm:$0xff]  }
0x1709   : > { %4370 = vmatprep.subr.bf16.mxu0 %v6447_v40  ;;  %v6503_v40 = vld [vmem:[#allocation33 + $0xc8] sm:$0xff]  }
0x170c   : > { %4371 = vmatpush1.bf16.msra.mxu0 %v6445_v42  ;;  %v6505_v42 = vld [vmem:[#allocation33 + $0x88] sm:$0xff]  }
0x170d   : > { %4372 = vmatprep.subr.bf16.mxu0 %v6453_v47  ;;  %v6509_v47 = vld [vmem:[#allocation33 + $0x80] sm:$0xff]  }
0x1710   : > { %4373 = vmatpush1.bf16.msra.mxu0 %v6451_v46  ;;  %v6508_v46 = vld [vmem:[#allocation33] sm:$0xff]  }
0x1711   : > { %4374 = vmatprep.subr.bf16.mxu0 %v6459_v49  ;;  %v4148_v49 = vrot.slane %v4143_v48, %v7719_v23 }
0x1714   : > { %4375 = vmatpush1.bf16.msra.mxu0 %v6457_v51  ;;  %v4152_v51 = vrot.slane %v4143_v48, %v7716_v22  ;;  %v6517_v48 = vld [vmem:[#allocation34] sm:$0xff]  }
0x1715   : > { %4376 = vmatprep.subr.bf16.mxu0 %v6465_v53 }
0x1718   : > { %4377 = vmatpush1.bf16.msra.mxu0 %v6463_v55 }
0x1719   : > { %4378 = vmatprep.subr.bf16.mxu0 %v6471_v57 }
0x171c   : > { %4379 = vmatpush1.bf16.msra.mxu0 %v6469_v59 }
0x171d   : > { %4380 = vmatprep.subr.bf16.mxu0 %v6477_v17 }
0x1720   : > { %4381 = vmatpush1.bf16.msra.mxu0 %v6475_v2 }
0x1721   : > { %5706 = vmatprep.subr.bf16.mxu0 %v6479_v4 }
0x17c3   : > { %v4076_v25 = vpop.f32.mrf.mxu0 }
0x17c4   : > { %v4077_v26 = vadd.f32 %v5471_v24, %v4076_v25  ;;  %v6483_v24 = vld [vmem:[#allocation33 + $0xf0] sm:$0xff]  }
0x17c5   : > { %v5927_v27 = vpop.f32.mrf.mxu0  ;;  %v6484_v25 = vld [vmem:[#allocation33 + $0x30] sm:$0xff]  }
0x17c6   : > { %v4082_v28 = vadd.f32 %v4077_v26, %v7934_v60  ;;  %v6485_v26 = vld [vmem:[#allocation33 + $0xb0] sm:$0xff]   ;;  %v6486_v27 = vld [vmem:[#allocation33 + $0x68] sm:$0xff]  }
0x17c7   : > { %v4079_v29 = vpop.f32.mrf.mxu0 }
0x17c8   : > { %4083 = vadd.xlane.f32.xlu1 %v4082_v28  ;;  %v6488_v29 = vld [vmem:[#allocation33 + $0x28] sm:$0xff]  }
0x17c9   : > { %v5928_v30 = vpop.f32.mrf.mxu0 }
0x17ca   : > { %v6489_v30 = vld [vmem:[#allocation33 + $0xa8] sm:$0xff]  }
0x1851   : > { %v4084_v60 = vpop.xlane.xlu1 %4083 }
0x1852   : > { %v4085_v36 = vmul.f32 0.0078125, %v4084_v60  ;;  %v6498_v60 = vld [vmem:[#allocation33 + $0x50] sm:$0xff]  }
0x1854   : > { %v4086_v37 = vsub.f32 %v4082_v28, %v4085_v36  ;;  %v6487_v28 = vld [vmem:[#allocation33 + $0xe8] sm:$0xff]   ;;  %v6499_v36 = vld [vmem:[#allocation33 + $0xd0] sm:$0xff]  }
0x1856   : > { %v4087_v38 = vmul.f32 %v4086_v37, %v4086_v37 }
0x1858   : > { %4088 = vadd.xlane.f32.xlu0 %v4087_v38  ;;  %v6501_v38 = vld [vmem:[#allocation33 + $0x90] sm:$0xff]  }
0x18e1   : > { %v4089_v5 = vpop.xlane.xlu0 %4088 }
0x18e2   : > { %v4090_v6 = vmul.f32 0.0078125, %v4089_v5 }
0x18e4   : > { %v4091_v7 = vadd.f32 1e-05, %v4090_v6 }
0x18e6   : > { %6550 = vrsqrt.f32 %v4091_v7 }
0x18f3   : > { %v6551_v8 = vpop.eup %6550 }
0x18f4   : > { %v4093_v10 = vmul.f32 %v6551_v8, %v4086_v37  ;;  %v6500_v37 = vld [vmem:[#allocation33 + $0x10] sm:$0xff]  }
0x18f6   : > { %v4101_v13 = vmul.f32 %v5480_v9, %v4093_v10  ;;  %v5514_v9 = vld [vmem:[%s8100_s26] ss:$0 sm:$0xff] }
0x18f8   : > { %v7982_v61 = vadd.f32 %v5481_v11, %v4101_v13 }
0x18fa   : > { %v4110_v18 = vpack.c.bf16 %v7982_v61, %v7982_v61 }
0x18fc   : > { %4358 = vmatmul.mubr.bf16.vlgmr.msra.gmra.mxu1 %v4110_v18  ;;  %4399 = vmatmul.mubr.bf16.vlgmr.msra.gmra.mxu0 %v4110_v18 }
0x18fd   : > { %5685 = vmatpush3.bf16.msra.mxu1 %v6480_v14  ;;  %5707 = vmatpush3.bf16.msra.mxu0 %v6481_v16 }
0x18fe   : > { %5686 = vmatprep.subr.bf16.mxu1 %v6482_v20  ;;  %5708 = vmatprep.subr.bf16.mxu0 %v6483_v24 }
0x1901   : > { %5687 = vmatpush3.bf16.msra.mxu1 %v6484_v25  ;;  %5709 = vmatpush3.bf16.msra.mxu0 %v6485_v26 }
0x1902   : > { %5688 = vmatprep.subr.bf16.mxu1 %v6486_v27  ;;  %5710 = vmatprep.subr.bf16.mxu0 %v6487_v28 }
0x1905   : > { %5689 = vmatpush3.bf16.msra.mxu1 %v6488_v29  ;;  %5711 = vmatpush3.bf16.msra.mxu0 %v6489_v30 }
0x1906   : > { %5690 = vmatprep.subr.bf16.mxu1 %v6490_v31  ;;  %5712 = vmatprep.subr.bf16.mxu0 %v6491_v44 }
0x1909   : > { %5691 = vmatpush3.bf16.msra.mxu1 %v6492_v12  ;;  %5713 = vmatpush3.bf16.msra.mxu0 %v6493_v32 }
0x190a   : > { %5692 = vmatprep.subr.bf16.mxu1 %v6494_v33  ;;  %5714 = vmatprep.subr.bf16.mxu0 %v6495_v34  ;;  %v5547_v34 = vld [vmem:[%s8101_s2] ss:$0 sm:$0xff] }
0x190d   : > { %5693 = vmatpush3.bf16.msra.mxu1 %v6496_v35  ;;  %5715 = vmatpush3.bf16.msra.mxu0 %v6497_v0  ;;  %v5548_v0 = vld [vmem:[%s8102_s8] ss:$0 sm:$0xff] }
0x190e   : > { %5694 = vmatprep.subr.bf16.mxu1 %v6498_v60  ;;  %5716 = vmatprep.subr.bf16.mxu0 %v6499_v36 }
0x1911   : > { %5695 = vmatpush3.bf16.msra.mxu1 %v6500_v37  ;;  %5717 = vmatpush3.bf16.msra.mxu0 %v6501_v38  ;;  %v6510_v37 = vld [vmem:[#allocation34 + $0x38] sm:$0xff]  }
0x1912   : > { %5696 = vmatprep.subr.bf16.mxu1 %v6502_v39  ;;  %5718 = vmatprep.subr.bf16.mxu0 %v6503_v40 }
0x1915   : > { %5697 = vmatpush3.bf16.msra.mxu1 %v6504_v41  ;;  %5719 = vmatpush3.bf16.msra.mxu0 %v6505_v42  ;;  %v6512_v42 = vld [vmem:[#allocation34 + $0x28] sm:$0xff]  }
0x1916   : > { %5698 = vmatprep.subr.bf16.mxu1 %v6506_v43  ;;  %5720 = vmatprep.subr.bf16.mxu0 %v6507_v45  ;;  %v6513_v43 = vld [vmem:[#allocation34 + $0x20] sm:$0xff]   ;;  %v6514_v45 = vld [vmem:[#allocation34 + $0x18] sm:$0xff]  }
0x1919   : > { %5699 = vmatpush3.bf16.msra.mxu1 %v6508_v46  ;;  %5721 = vmatpush3.bf16.msra.mxu0 %v6509_v47  ;;  %v6515_v46 = vld [vmem:[#allocation34 + $0x10] sm:$0xff]   ;;  %v6516_v47 = vld [vmem:[#allocation34 + $0x8] sm:$0xff]  }
0x191a   : > { %5929 = vmatprep.subr.bf16.mxu1 %v7255_v19 }
0x19bc   : > { %v4359_v53 = vpop.f32.mrf.mxu1  ;;  %v4400_v54 = vpop.f32.mrf.mxu0 }
0x19bd   : > { %v4360_v55 = vadd.f32 %v4359_v53, %v4148_v49  ;;  %v4401_v56 = vadd.f32 %v4400_v54, %v4156_v50  ;;  %v5549_v53 = vld [vmem:[%s8103_s0] ss:$0 sm:$0xff] }
0x19be   : > { %v4361_v57 = vpop.f32.mrf.mxu1  ;;  %v4402_v58 = vpop.f32.mrf.mxu0 }
0x19bf   : > { %v4362_v59 = vadd.f32 %v4361_v57, %v4152_v51  ;;  %v4403_v63 = vadd.f32 %v4402_v58, %v4160_v52  ;;  %v4407_v17 = vmax.f32 %v4360_v55, 0.0  ;;  %v4409_v1 = vmax.f32 %v4401_v56, 0.0  ;;  %v5550_v55 = vld [vmem:[%s7451_s5] ss:$0 sm:$0xff] }
0x19c0   : > { %v4363_v2 = vpop.f32.mrf.mxu1  ;;  %v4404_v3 = vpop.f32.mrf.mxu0 }
0x19c1   : > { %v4408_v23 = vmax.f32 %v4362_v59, 0.0  ;;  %v4410_v62 = vmax.f32 %v4403_v63, 0.0  ;;  %v4411_v15 = vpack.c.bf16 %v4407_v17, %v4407_v17  ;;  %v4413_v6 = vpack.c.bf16 %v4409_v1, %v4409_v1  ;;  %v5551_v59 = vld [vmem:[%s7461_s29] ss:$0 sm:$0xff] }
0x19c2   : > { %v4364_v4 = vpop.f32.mrf.mxu1  ;;  %v4405_v22 = vpop.f32.mrf.mxu0 }
0x19c3   : > { %v4412_v5 = vpack.c.bf16 %v4408_v23, %v4408_v23  ;;  %v4414_v21 = vpack.c.bf16 %v4410_v62, %v4410_v62 }
0x19c5   : > { %4710 = vmatprep.mubr.bf16.mxu1 %v4412_v5  ;;  %4750 = vmatprep.mubr.bf16.mxu0 %v4414_v21 }
0x19c6   : > { %4711 = vmatmul.mubr.bf16.vlgmr.msra.gmra.mxu1 %v4411_v15  ;;  %4751 = vmatmul.mubr.bf16.vlgmr.msra.gmra.mxu0 %v4413_v6 }
0x19c7   : > { %5945 = vmatprep.mubr.msk.bf16.mxu1 %vm7256_vm0, %v7255_v19  ;;  %5930 = vmatpush3.bf16.msra.mxu1 %v6510_v37 }
0x19c8   : > { %5931 = vmatprep.subr.bf16.mxu1 %v7255_v19 }
0x1a86   : > { %v5700_v7 = vpop.f32.mrf.mxu1  ;;  %v5722_v8 = vpop.f32.mrf.mxu0 }
0x1a88   : > { %v5701_v10 = vpop.f32.mrf.mxu1  ;;  %v5723_v11 = vpop.f32.mrf.mxu0 }
0x1a89   : > { %v5702_v13 = vadd.f32 %v5701_v10, %v5700_v7  ;;  %v5724_v20 = vadd.f32 %v5723_v11, %v5722_v8 }
0x1a8a   : > { %v5703_v14 = vpop.f32.mrf.mxu1  ;;  %v5725_v16 = vpop.f32.mrf.mxu0 }
0x1a8b   : > { %v4713_v18 = vadd.f32 %v5702_v13, %v5514_v9 }
0x1a8c   : > { %v5704_v24 = vpop.f32.mrf.mxu1  ;;  %v5726_v25 = vpop.f32.mrf.mxu0 }
0x1a8d   : > { %v4753_v26 = vadd.f32 %v5724_v20, %v4713_v18 }
0x1a8f   : > { %v4758_v27 = vadd.f32 %v4753_v26, %v7982_v61  ;;  %v6511_v61 = vld [vmem:[#allocation34 + $0x30] sm:$0xff]  }
0x1a90   : > { %5932 = vmatpush3.bf16.msra.mxu1 %v6511_v61 }
0x1a91   : > { %4759 = vadd.xlane.f32.xlu0 %v4758_v27  ;;  %5933 = vmatprep.subr.bf16.mxu1 %v7255_v19 }
0x1a94   : > { %5934 = vmatpush3.bf16.msra.mxu1 %v6512_v42 }
0x1a95   : > { %5935 = vmatprep.subr.bf16.mxu1 %v7255_v19 }
0x1a98   : > { %5936 = vmatpush3.bf16.msra.mxu1 %v6513_v43 }
0x1a99   : > { %5937 = vmatprep.subr.bf16.mxu1 %v7255_v19 }
0x1a9c   : > { %5938 = vmatpush3.bf16.msra.mxu1 %v6514_v45 }
0x1a9d   : > { %5939 = vmatprep.subr.bf16.mxu1 %v7255_v19 }
0x1aa0   : > { %5940 = vmatpush3.bf16.msra.mxu1 %v6515_v46 }
0x1aa1   : > { %5941 = vmatprep.subr.bf16.mxu1 %v7255_v19 }
0x1aa4   : > { %5942 = vmatpush3.bf16.msra.mxu1 %v6516_v47 }
0x1aa5   : > { %5943 = vmatprep.subr.bf16.mxu1 %v7255_v19 }
0x1aa8   : > { %5944 = vmatpush3.bf16.msra.mxu1 %v6517_v48 }
0x1b1a   : > { %v4760_v28 = vpop.xlane.xlu0 %4759 }
0x1b1b   : > { %v4761_v29 = vmul.f32 0.0078125, %v4760_v28 }
0x1b1d   : > { %v4762_v30 = vsub.f32 %v4758_v27, %v4761_v29 }
0x1b1f   : > { %v4763_v31 = vmul.f32 %v4762_v30, %v4762_v30 }
0x1b21   : > { %4764 = vadd.xlane.f32.xlu1 %v4763_v31 }
0x1baa   : > { %v4765_v44 = vpop.xlane.xlu1 %4764 }
0x1bab   : > { %v4766_v12 = vmul.f32 0.0078125, %v4765_v44 }
0x1bad   : > { %v4767_v32 = vadd.f32 1e-05, %v4766_v12 }
0x1baf   : > { %6552 = vrsqrt.f32 %v4767_v32 }
0x1bbc   : > { %v6553_v33 = vpop.eup %6552 }
0x1bbd   : > { %v4769_v35 = vmul.f32 %v6553_v33, %v4762_v30 }
0x1bbf   : > { %v4777_v60 = vmul.f32 %v5547_v34, %v4769_v35 }
0x1bc1   : > { %v4785_v36 = vadd.f32 %v5548_v0, %v4777_v60 }
0x1bc3   : > { %4786 = vadd.xlane.f32.xlu0 %v4785_v36 }
0x1c4c   : > { %v4787_v38 = vpop.xlane.xlu0 %4786 }
0x1c4d   : > { %v4788_v39 = vmul.f32 0.0078125, %v4787_v38 }
0x1c4f   : > { %v4789_v40 = vsub.f32 %v4785_v36, %v4788_v39 }
0x1c51   : > { %v4790_v41 = vmul.f32 %v4789_v40, %v4789_v40 }
0x1c53   : > { %4791 = vadd.xlane.f32.xlu1 %v4790_v41 }
0x1cdc   : > { %v4792_v49 = vpop.xlane.xlu1 %4791 }
0x1cdd   : > { %v4793_v50 = vmul.f32 0.0078125, %v4792_v49 }
0x1cdf   : > { %v4794_v51 = vadd.f32 1e-05, %v4793_v50 }
0x1ce1   : > { %6554 = vrsqrt.f32 %v4794_v51 }
0x1cee   : > { %v6555_v52 = vpop.eup %6554 }
0x1cef   : > { %v4796_v54 = vmul.f32 %v6555_v52, %v4789_v40 }
0x1cf1   : > { %v4804_v56 = vmul.f32 %v5549_v53, %v4796_v54 }
0x1cf3   : > { %v4812_v57 = vadd.f32 %v5550_v55, %v4804_v56 }
0x1cf5   : > { %v4813_v58 = vpack.c.bf16 %v4812_v57, %v4812_v57 }
0x1cf7   : > { %5946 = vmatmul.mubr.bf16.vlgmr.msra.gmra.mxu1 %v4813_v58 }
0x1db7   : > { %v4919_v63 = vpop.f32.mrf.mxu1 }
0x1db8   : > { %v4920_v17 = vadd.f32 %v5551_v59, %v4919_v63 }
0x1db9   : > { %v5947_v1 = vpop.f32.mrf.mxu1 }
0x1dba   : > { %4925 = vst [vmem:[%s1518_s18] sm:$0xff] %v4920_v17 }
0x1dbb   : > { %v4922_v19 = vpop.f32.mrf.mxu1 }
0x1dbd   : > { %v5948_v2 = vpop.f32.mrf.mxu1 }
0x1dbe PF: > { %s103_s28 = sadd.s32 1, %s7182_s28  }
0x1dbf   : > { %p100_p9 = scmp.ge.s32.totalorder %s103_s28, 4  }
0x1dc1   :  { %102 = sbr.rel (!%p100_p9) target bundleno = 82 (0x52), region = 342 }
0x1dc6   :  { %4945 = vsyncpa [#allocation3], 1 }
0x1dc7   :  { %4947 = vsyncpa [#allocation3 + $0x1], 1 }
0x1dc8   :  { %4948 = vsyncpa [#allocation5], 1 }
0x1dc9   :  { %4949 = vsyncpa [#allocation8], 1 }
0x1dca   :  { %4950 = vsyncpa [#allocation11], 1 }
0x1dcb   :  { %4951 = vsyncpa [#allocation14], 1 }
0x1dcc   :  { %4952 = vsyncpa [#allocation17], 1 }
0x1dcd   :  { %4953 = vsyncpa [#allocation20], 1 }
0x1dce   :  { %4954 = vsyncpa [#allocation23], 1 }
0x1dcf   :  { %4955 = vsyncpa [#allocation26], 1 }
0x1dd0   :  { %4956 = vsyncpa [#allocation29], 1 }
0x1dd1   :  { %4957 = vsyncpa [#allocation32], 1 }
0x1dd2   :  { %4958 = vsyncpa [#allocation35], 1 }

</bundles_post_ra>
